<compile_context>
chip_gen: v7x
topology: tpu7x:2x2x1
jax: 0.10.0
libtpu: 0.0.40
codegen_flags: <defaults>
</compile_context>

<pallas_src>
import functools

import jax
import jax.numpy as jnp
from jax.experimental import pallas as pl
from jax.experimental.pallas import tpu as pltpu

LAYER_NORM_EPS = 1e-12     # config.layer_norm_eps
_NEG_BIG = -1e30           # bias for padded vocab columns


def _round_up(v, m):
    return (v + m - 1) // m * m


def _mlm_kernel(act_ref, lab_ref, x_ref, w1_ref, b1_ref, g_ref, be_ref,
                w2_ref, b2_ref, ce_ref, pred_ref,
                h_sc, m_sc, l_sc, lbl_sc, idx_sc, *, eps, tv):
    i = pl.program_id(0)
    j = pl.program_id(1)
    active = act_ref[i] > 0          # row tile contains at least one selected row

    # ---- hidden transform: once per active row tile (j == 0), reused for all vocab tiles
    @pl.when(jnp.logical_and(active, j == 0))
    def _():
        h = jnp.dot(x_ref[...], w1_ref[...],
                    preferred_element_type=jnp.float32) + b1_ref[...]
        # TODO(synk): config.hidden_act assumed "gelu" (tanh approximation); switch to
        # erf-based gelu if the TUTA config uses the exact variant.
        h = 0.5 * h * (1.0 + jnp.tanh(0.7978845608028654 *
                                      (h + 0.044715 * h * h * h)))
        mu = jnp.mean(h, axis=-1, keepdims=True)
        var = jnp.mean(jnp.square(h - mu), axis=-1, keepdims=True)
        h = (h - mu) * jax.lax.rsqrt(var + eps)
        h = h * g_ref[...] + be_ref[...]
        h_sc[...] = h.astype(jnp.bfloat16)          # bf16 at the MXU boundary
        m_sc[...] = jnp.full(m_sc.shape, -jnp.inf, jnp.float32)
        l_sc[...] = jnp.zeros_like(l_sc)
        lbl_sc[...] = jnp.zeros_like(lbl_sc)
        idx_sc[...] = jnp.zeros_like(idx_sc)

    # ---- one lane-dense vocab tile of predict_linear (skipped entirely if inactive)
    @pl.when(active)
    def _():
        s = jnp.dot(h_sc[...], w2_ref[...],
                    preferred_element_type=jnp.float32) + b2_ref[...]   # (TM, TV) f32
        labels = lab_ref[...]                                           # (TM, 1) int32
        col = jax.lax.broadcasted_iota(jnp.int32, (1, tv), 1)           # hoisted lane iota

        # label-logit gather (label outside this tile, or < 0, contributes 0)
        lbl_sc[...] += jnp.sum(jnp.where(col == labels - j * tv, s, 0.0),
                               axis=-1, keepdims=True)

        # online logsumexp + running argmax (first occurrence wins ties)
        # TODO(synk): max/argmax/label-gather/sum-exp = 4 cross-lane reductions per tile;
        # could be merged further (XLU pressure) once MXU-bound.
        tile_max = jnp.max(s, axis=-1, keepdims=True)
        tile_arg = jnp.min(jnp.where(s == tile_max, col, jnp.int32(2 ** 30)),
                           axis=-1, keepdims=True) + j * tv
        m_old = m_sc[...]
        idx_sc[...] = jnp.where(tile_max > m_old, tile_arg, idx_sc[...])
        m_new = jnp.maximum(m_old, tile_max)
        l_sc[...] = (l_sc[...] * jnp.exp(m_old - m_new)
                     + jnp.sum(jnp.exp(s - m_new), axis=-1, keepdims=True))
        m_sc[...] = m_new

    # ---- finalize: per-row cross entropy and argmax
    @pl.when(jnp.logical_and(active, j == pl.num_programs(1) - 1))
    def _():
        ce_ref[...] = (m_sc[...] + jnp.log(l_sc[...])) - lbl_sc[...]
        pred_ref[...] = idx_sc[...]


def _mlm_ce_pallas(tile_active, labels2d, x_bf, w1_t, b1, gamma, beta, w2_t, b2, *, tm):
    """Fused uniform_linear -> gelu -> layer_norm -> predict_linear -> per-row CE/argmax."""
    n_pad, H = x_bf.shape
    v_pad = w2_t.shape[1]
    tv = 512 if v_pad <= 1024 else 1024
    nr = n_pad // tm
    nv = v_pad // tv

    kernel = functools.partial(_mlm_kernel, eps=LAYER_NORM_EPS, tv=tv)

    return pl.pallas_call(
        kernel,
        out_shape=(jax.ShapeDtypeStruct((n_pad, 1), jnp.float32),
                   jax.ShapeDtypeStruct((n_pad, 1), jnp.int32)),
        grid_spec=pltpu.PrefetchScalarGridSpec(
            num_scalar_prefetch=1,                       # tile_active flags (SMEM)
            grid=(nr, nv),
            in_specs=[
                pl.BlockSpec((tm, 1), lambda i, j, act: (i, 0)),            # labels
                # inactive row tiles collapse their blocks to 0 -> no extra DMA
                pl.BlockSpec((tm, H), lambda i, j, act: (i * act[i], 0)),   # x (bf16)
                pl.BlockSpec((H, H), lambda i, j, act: (0, 0)),             # W1^T (bf16)
                pl.BlockSpec((1, H), lambda i, j, act: (0, 0)),             # b1
                pl.BlockSpec((1, H), lambda i, j, act: (0, 0)),             # ln gamma
                pl.BlockSpec((1, H), lambda i, j, act: (0, 0)),             # ln beta
                pl.BlockSpec((H, tv), lambda i, j, act: (0, j * act[i])),   # W2^T tile (bf16)
                pl.BlockSpec((1, tv), lambda i, j, act: (0, j * act[i])),   # b2 tile
            ],
            out_specs=[pl.BlockSpec((tm, 1), lambda i, j, act: (i, 0)),
                       pl.BlockSpec((tm, 1), lambda i, j, act: (i, 0))],
            scratch_shapes=[
                pltpu.VMEM((tm, H), jnp.bfloat16),   # h (LN output, bf16)
                pltpu.VMEM((tm, 1), jnp.float32),    # running max
                pltpu.VMEM((tm, 1), jnp.float32),    # running sum-exp
                pltpu.VMEM((tm, 1), jnp.float32),    # label logit
                pltpu.VMEM((tm, 1), jnp.int32),      # running argmax
            ]),
        compiler_params=pltpu.CompilerParams(
            dimension_semantics=("parallel", "arbitrary"),
            vmem_limit_bytes=48 * 1024 * 1024),
    )(tile_active, labels2d, x_bf, w1_t, b1, gamma, beta, w2_t, b2)


def prepare_mlm_params(w1, b1, gamma, beta, w2, b2):
    """One-time weight prep (transpose to [in,out], cast to bf16, pad vocab).

    Done outside the per-step jitted forward so the ~2*V*H transpose/cast traffic is
    not paid on every call.
    """
    V, H = w2.shape
    tv = 512 if V <= 1024 else 1024
    v_pad = _round_up(V, tv)
    w2_t = jnp.transpose(w2).astype(jnp.bfloat16)                  # (H, V)
    w2_t = jnp.pad(w2_t, ((0, 0), (0, v_pad - V)))                 # zero weight columns
    b2_p = jnp.pad(b2.astype(jnp.float32), (0, v_pad - V),
                   constant_values=_NEG_BIG)                       # padded logits ~ -1e30
    return {
        "w1_t": jnp.transpose(w1).astype(jnp.bfloat16),            # (H, H) [in, out]
        "b1": b1.reshape(1, H).astype(jnp.float32),
        "gamma": gamma.reshape(1, H).astype(jnp.float32),
        "beta": beta.reshape(1, H).astype(jnp.float32),
        "w2_t": w2_t,                                              # (H, V_pad) bf16
        "b2": b2_p.reshape(1, v_pad),
    }


@jax.jit
def mlm_head_forward(encoded_states, mlm_label, params):
    """Full MlmHead.forward -> (mlm_loss, mlm_correct, mlm_count)."""
    B, S, H = encoded_states.shape
    N = B * S
    x = encoded_states.reshape(N, H).astype(jnp.bfloat16)
    labels = mlm_label.reshape(N).astype(jnp.int32)

    valid = labels >= 0
    n_valid = jnp.sum(valid.astype(jnp.int32))

    # pack selected rows to the front (x and labels permuted identically)
    order = jnp.argsort(jnp.where(valid, 0, 1).astype(jnp.int32))
    x = jnp.take(x, order, axis=0)
    labels = jnp.take(labels, order, axis=0)

    # fixed row tile, pad rows with label = -1
    tm = min(512, _round_up(N, 128))
    n_pad = _round_up(N, tm)
    if n_pad > N:
        x = jnp.pad(x, ((0, n_pad - N), (0, 0)))
        labels = jnp.pad(labels, (0, n_pad - N), constant_values=-1)

    nr = n_pad // tm
    tile_active = (jnp.arange(nr, dtype=jnp.int32) * tm < n_valid).astype(jnp.int32)

    ce, pred = _mlm_ce_pallas(tile_active, labels.reshape(n_pad, 1), x,
                              params["w1_t"], params["b1"], params["gamma"],
                              params["beta"], params["w2_t"], params["b2"], tm=tm)

    # masked reductions over the packed valid rows (skipped tiles hold garbage ->
    # use where-selects, never multiplies, so NaNs cannot leak in)
    row = jnp.arange(n_pad, dtype=jnp.int32)
    sel = row < n_valid
    nf = n_valid.astype(jnp.float32)
    # NOTE: reference would produce NaN if zero rows are selected; divisor is guarded.
    loss = jnp.sum(jnp.where(sel, ce[:, 0], 0.0)) / jnp.maximum(nf, 1.0)
    correct = jnp.sum(jnp.where(sel & (pred[:, 0] == labels), 1.0, 0.0))
    count = nf + jnp.float32(1e-6)
    return loss, correct, count


def _reference_forward(encoded_states, mlm_label, w1, b1, gamma, beta, w2, b2):
    """Pure-JAX f32 reference of the PyTorch module (same tanh-approx gelu)."""
    B, S, H = encoded_states.shape
    x = encoded_states.reshape(-1, H)
    y = mlm_label.reshape(-1)
    m = y >= 0
    xs = x[m]
    ys = y[m]
    h = xs @ w1.T + b1
    h = 0.5 * h * (1.0 + jnp.tanh(0.7978845608028654 * (h + 0.044715 * h ** 3)))
    mu = h.mean(-1, keepdims=True)
    var = ((h - mu) ** 2).mean(-1, keepdims=True)
    h = (h - mu) / jnp.sqrt(var + LAYER_NORM_EPS) * gamma + beta
    logits = h @ w2.T + b2
    lse = jax.scipy.special.logsumexp(logits, axis=-1)
    ce = lse - jnp.take_along_axis(logits, ys[:, None], axis=-1)[:, 0]
    loss = ce.mean()
    pred = jnp.argmax(logits, axis=-1)
    correct = jnp.sum((pred == ys).astype(jnp.float32))
    count = ys.shape[0] + 1e-6
    return loss, correct, count


if __name__ == "__main__":
    B, S, H, V = 2, 8, 32, 1024
    key = jax.random.PRNGKey(0)
    k_x, k_w1, k_b1, k_w2, k_b2, k_g, k_be = jax.random.split(key, 7)

    encoded_states = jax.random.normal(k_x, (B, S, H), dtype=jnp.float32)
    # mlm labels: >= 0 -> masked-token rows (vocab ids), -1 -> ignored rows
    mlm_label = jnp.array([[-1, 5, -1, 100, -1, -1, 7, -1],
                           [3, -1, 200, -1, -1, 511, -1, 0]], dtype=jnp.int32)

    # deterministic synthetic parameters (PyTorch Linear layout: [out, in])
    w1 = jax.random.normal(k_w1, (H, H), dtype=jnp.float32) / jnp.sqrt(H)
    b1 = jax.random.normal(k_b1, (H,), dtype=jnp.float32) * 0.01
    gamma = 1.0 + 0.1 * jax.random.normal(k_g, (H,), dtype=jnp.float32)
    beta = 0.01 * jax.random.normal(k_be, (H,), dtype=jnp.float32)
    w2 = jax.random.normal(k_w2, (V, H), dtype=jnp.float32) / jnp.sqrt(H)
    b2 = jax.random.normal(k_b2, (V,), dtype=jnp.float32) * 0.01

    # one-time weight prep (outside the jitted forward)
    params = prepare_mlm_params(w1, b1, gamma, beta, w2, b2)

    loss, correct, count = mlm_head_forward(encoded_states, mlm_label, params)
    jax.block_until_ready((loss, correct, count))

    # light sanity check vs. an f32 pure-JAX reference (bf16 MXU tolerance on loss)
    ref_loss, ref_correct, ref_count = _reference_forward(
        encoded_states, mlm_label, w1, b1, gamma, beta, w2, b2)
    assert abs(float(count) - float(ref_count)) < 1e-3
    assert abs(float(loss) - float(ref_loss)) <= 0.05 * max(1.0, abs(float(ref_loss)))

    print("KERNEL_OK")
</pallas_src>

<mosaic_0001>
module attributes {stable_mosaic.version = 11 : i64} {
  func.func @_mlm_kernel(%arg0: i32, %arg1: i32, %arg2: memref<1xi32, #tpu.memory_space<smem>>, %arg3: memref<128x1xi32, #tpu.memory_space<vmem>>, %arg4: memref<128x32xbf16, #tpu.memory_space<vmem>>, %arg5: memref<32x32xbf16, #tpu.memory_space<vmem>>, %arg6: memref<1x32xf32, #tpu.memory_space<vmem>>, %arg7: memref<1x32xf32, #tpu.memory_space<vmem>>, %arg8: memref<1x32xf32, #tpu.memory_space<vmem>>, %arg9: memref<32x512xbf16, #tpu.memory_space<vmem>>, %arg10: memref<1x512xf32, #tpu.memory_space<vmem>>, %arg11: memref<128x1xf32, #tpu.memory_space<vmem>>, %arg12: memref<128x1xi32, #tpu.memory_space<vmem>>, %arg13: memref<128x32xbf16, #tpu.memory_space<vmem>>, %arg14: memref<128x1xf32, #tpu.memory_space<vmem>>, %arg15: memref<128x1xf32, #tpu.memory_space<vmem>>, %arg16: memref<128x1xf32, #tpu.memory_space<vmem>>, %arg17: memref<128x1xi32, #tpu.memory_space<vmem>>) attributes {dimension_semantics = [#tpu.dimension_semantics<parallel>, #tpu.dimension_semantics<arbitrary>], iteration_bounds = array<i64: 1, 2>, scalar_prefetch = 1 : i64, scratch_operands = 5 : i64, tpu.core_type = #tpu.core_type<tc>, window_params = [{transform_indices = @transform_0, window_bounds = array<i64: 128, 1>}, {transform_indices = @transform_1, window_bounds = array<i64: 128, 32>}, {pipeline_mode = #tpu.pipeline_mode<synchronous>, transform_indices = @transform_2, window_bounds = array<i64: 32, 32>}, {pipeline_mode = #tpu.pipeline_mode<synchronous>, transform_indices = @transform_3, window_bounds = array<i64: 1, 32>}, {pipeline_mode = #tpu.pipeline_mode<synchronous>, transform_indices = @transform_4, window_bounds = array<i64: 1, 32>}, {pipeline_mode = #tpu.pipeline_mode<synchronous>, transform_indices = @transform_5, window_bounds = array<i64: 1, 32>}, {transform_indices = @transform_6, window_bounds = array<i64: 32, 512>}, {transform_indices = @transform_7, window_bounds = array<i64: 1, 512>}, {transform_indices = @transform_8, window_bounds = array<i64: 128, 1>}, {transform_indices = @transform_9, window_bounds = array<i64: 128, 1>}]} {
    %0 = arith.index_cast %arg0 : i32 to index
    %1 = memref.load %arg2[%0] : memref<1xi32, #tpu.memory_space<smem>>
    %c0_i32 = arith.constant 0 : i32
    %2 = arith.cmpi sgt, %1, %c0_i32 : i32
    %c0_i32_0 = arith.constant 0 : i32
    %3 = arith.cmpi eq, %arg1, %c0_i32_0 : i32
    %4 = arith.andi %2, %3 : i1
    %5 = arith.extui %4 : i1 to i32
    %c0_i32_1 = arith.constant 0 : i32
    %6 = arith.cmpi ne, %5, %c0_i32_1 : i32
    scf.if %6 {
      %c0 = arith.constant 0 : index
      %c0_4 = arith.constant 0 : index
      %13 = vector.load %arg4[%c0, %c0_4] : memref<128x32xbf16, #tpu.memory_space<vmem>>, vector<128x32xbf16>
      %c0_5 = arith.constant 0 : index
      %c0_6 = arith.constant 0 : index
      %14 = vector.load %arg5[%c0_5, %c0_6] : memref<32x32xbf16, #tpu.memory_space<vmem>>, vector<32x32xbf16>
      %cst = arith.constant dense<0.000000e+00> : vector<128x32xf32>
      %15 = tpu.matmul %13, %14, %cst {dimension_numbers = #tpu.dot_dimension_numbers<[1], [0], [0], [1], [0, 0, 1, 1], [], []>} : vector<128x32xbf16>, vector<32x32xbf16>, vector<128x32xf32> -> vector<128x32xf32>
      %c0_7 = arith.constant 0 : index
      %c0_8 = arith.constant 0 : index
      %16 = vector.load %arg6[%c0_7, %c0_8] : memref<1x32xf32, #tpu.memory_space<vmem>>, vector<1x32xf32>
      %17 = vector.broadcast %16 : vector<1x32xf32> to vector<128x32xf32>
      %18 = arith.addf %15, %17 : vector<128x32xf32>
      %cst_9 = arith.constant 5.000000e-01 : f32
      %19 = vector.broadcast %cst_9 : f32 to vector<128x32xf32>
      %20 = arith.mulf %19, %18 : vector<128x32xf32>
      %cst_10 = arith.constant 4.471500e-02 : f32
      %21 = vector.broadcast %cst_10 : f32 to vector<128x32xf32>
      %22 = arith.mulf %21, %18 : vector<128x32xf32>
      %23 = arith.mulf %22, %18 : vector<128x32xf32>
      %24 = arith.mulf %23, %18 : vector<128x32xf32>
      %25 = arith.addf %18, %24 : vector<128x32xf32>
      %cst_11 = arith.constant 0.797884583 : f32
      %26 = vector.broadcast %cst_11 : f32 to vector<128x32xf32>
      %27 = arith.mulf %26, %25 : vector<128x32xf32>
      %28 = math.tanh %27 : vector<128x32xf32>
      %cst_12 = arith.constant 1.000000e+00 : f32
      %29 = vector.broadcast %cst_12 : f32 to vector<128x32xf32>
      %30 = arith.addf %29, %28 : vector<128x32xf32>
      %31 = arith.mulf %20, %30 : vector<128x32xf32>
      %cst_13 = arith.constant dense<0.000000e+00> : vector<128xf32>
      %32 = vector.multi_reduction <add>, %31, %cst_13 [1] : vector<128x32xf32> to vector<128xf32>
      %33 = vector.shape_cast %32 : vector<128xf32> to vector<128x1xf32>
      %cst_14 = arith.constant 3.200000e+01 : f32
      %34 = vector.broadcast %cst_14 : f32 to vector<128x1xf32>
      %35 = arith.divf %33, %34 : vector<128x1xf32>
      %36 = vector.broadcast %35 : vector<128x1xf32> to vector<128x32xf32>
      %37 = arith.subf %31, %36 : vector<128x32xf32>
      %38 = arith.mulf %37, %37 : vector<128x32xf32>
      %cst_15 = arith.constant dense<0.000000e+00> : vector<128xf32>
      %39 = vector.multi_reduction <add>, %38, %cst_15 [1] : vector<128x32xf32> to vector<128xf32>
      %40 = vector.shape_cast %39 : vector<128xf32> to vector<128x1xf32>
      %cst_16 = arith.constant 3.200000e+01 : f32
      %41 = vector.broadcast %cst_16 : f32 to vector<128x1xf32>
      %42 = arith.divf %40, %41 : vector<128x1xf32>
      %43 = vector.broadcast %35 : vector<128x1xf32> to vector<128x32xf32>
      %44 = arith.subf %31, %43 : vector<128x32xf32>
      %cst_17 = arith.constant 9.99999996E-13 : f32
      %45 = vector.broadcast %cst_17 : f32 to vector<128x1xf32>
      %46 = arith.addf %42, %45 : vector<128x1xf32>
      %47 = math.rsqrt %46 : vector<128x1xf32>
      %48 = vector.broadcast %47 : vector<128x1xf32> to vector<128x32xf32>
      %49 = arith.mulf %44, %48 : vector<128x32xf32>
      %c0_18 = arith.constant 0 : index
      %c0_19 = arith.constant 0 : index
      %50 = vector.load %arg7[%c0_18, %c0_19] : memref<1x32xf32, #tpu.memory_space<vmem>>, vector<1x32xf32>
      %51 = vector.broadcast %50 : vector<1x32xf32> to vector<128x32xf32>
      %52 = arith.mulf %49, %51 : vector<128x32xf32>
      %c0_20 = arith.constant 0 : index
      %c0_21 = arith.constant 0 : index
      %53 = vector.load %arg8[%c0_20, %c0_21] : memref<1x32xf32, #tpu.memory_space<vmem>>, vector<1x32xf32>
      %54 = vector.broadcast %53 : vector<1x32xf32> to vector<128x32xf32>
      %55 = arith.addf %52, %54 : vector<128x32xf32>
      %56 = arith.truncf %55 : vector<128x32xf32> to vector<128x32xbf16>
      %c0_22 = arith.constant 0 : index
      %c0_23 = arith.constant 0 : index
      %57 = vector.load %arg13[%c0_22, %c0_23] : memref<128x32xbf16, #tpu.memory_space<vmem>>, vector<128x32xbf16>
      tpu.vector_store %arg13[%c0_22, %c0_23], %56 {strides = array<i32>} : memref<128x32xbf16, #tpu.memory_space<vmem>>, vector<128x32xbf16>,
      %cst_24 = arith.constant 0xFF800000 : f32
      %58 = vector.broadcast %cst_24 : f32 to vector<128x1xf32>
      %c0_25 = arith.constant 0 : index
      %c0_26 = arith.constant 0 : index
      %59 = vector.load %arg14[%c0_25, %c0_26] : memref<128x1xf32, #tpu.memory_space<vmem>>, vector<128x1xf32>
      tpu.vector_store %arg14[%c0_25, %c0_26], %58 {strides = array<i32>} : memref<128x1xf32, #tpu.memory_space<vmem>>, vector<128x1xf32>,
      %cst_27 = arith.constant 0.000000e+00 : f32
      %60 = vector.broadcast %cst_27 : f32 to vector<128x1xf32>
      %c0_28 = arith.constant 0 : index
      %c0_29 = arith.constant 0 : index
      %61 = vector.load %arg15[%c0_28, %c0_29] : memref<128x1xf32, #tpu.memory_space<vmem>>, vector<128x1xf32>
      tpu.vector_store %arg15[%c0_28, %c0_29], %60 {strides = array<i32>} : memref<128x1xf32, #tpu.memory_space<vmem>>, vector<128x1xf32>,
      %cst_30 = arith.constant 0.000000e+00 : f32
      %62 = vector.broadcast %cst_30 : f32 to vector<128x1xf32>
      %c0_31 = arith.constant 0 : index
      %c0_32 = arith.constant 0 : index
      %63 = vector.load %arg16[%c0_31, %c0_32] : memref<128x1xf32, #tpu.memory_space<vmem>>, vector<128x1xf32>
      tpu.vector_store %arg16[%c0_31, %c0_32], %62 {strides = array<i32>} : memref<128x1xf32, #tpu.memory_space<vmem>>, vector<128x1xf32>,
      %c0_i32_33 = arith.constant 0 : i32
      %64 = vector.broadcast %c0_i32_33 : i32 to vector<128x1xi32>
      %c0_34 = arith.constant 0 : index
      %c0_35 = arith.constant 0 : index
      %65 = vector.load %arg17[%c0_34, %c0_35] : memref<128x1xi32, #tpu.memory_space<vmem>>, vector<128x1xi32>
      tpu.vector_store %arg17[%c0_34, %c0_35], %64 {strides = array<i32>} : memref<128x1xi32, #tpu.memory_space<vmem>>, vector<128x1xi32>,
    } else {
    }
    %7 = arith.extui %2 : i1 to i32
    %c0_i32_2 = arith.constant 0 : i32
    %8 = arith.cmpi ne, %7, %c0_i32_2 : i32
    scf.if %8 {
      %c0 = arith.constant 0 : index
      %c0_4 = arith.constant 0 : index
      %13 = vector.load %arg13[%c0, %c0_4] : memref<128x32xbf16, #tpu.memory_space<vmem>>, vector<128x32xbf16>
      %c0_5 = arith.constant 0 : index
      %c0_6 = arith.constant 0 : index
      %14 = vector.load %arg9[%c0_5, %c0_6] : memref<32x512xbf16, #tpu.memory_space<vmem>>, vector<32x512xbf16>
      %cst = arith.constant dense<0.000000e+00> : vector<128x512xf32>
      %15 = tpu.matmul %13, %14, %cst {dimension_numbers = #tpu.dot_dimension_numbers<[1], [0], [0], [1], [0, 0, 1, 1], [], []>} : vector<128x32xbf16>, vector<32x512xbf16>, vector<128x512xf32> -> vector<128x512xf32>
      %c0_7 = arith.constant 0 : index
      %c0_8 = arith.constant 0 : index
      %16 = vector.load %arg10[%c0_7, %c0_8] : memref<1x512xf32, #tpu.memory_space<vmem>>, vector<1x512xf32>
      %17 = vector.broadcast %16 : vector<1x512xf32> to vector<128x512xf32>
      %18 = arith.addf %15, %17 : vector<128x512xf32>
      %c0_9 = arith.constant 0 : index
      %c0_10 = arith.constant 0 : index
      %19 = vector.load %arg3[%c0_9, %c0_10] : memref<128x1xi32, #tpu.memory_space<vmem>>, vector<128x1xi32>
      %20 = tpu.iota {dimensions = array<i32: 1>} : vector<1x512xi32>
      %c0_11 = arith.constant 0 : index
      %c0_12 = arith.constant 0 : index
      %21 = vector.load %arg16[%c0_11, %c0_12] : memref<128x1xf32, #tpu.memory_space<vmem>>, vector<128x1xf32>
      %c512_i32 = arith.constant 512 : i32
      %22 = arith.muli %arg1, %c512_i32 : i32
      %23 = vector.broadcast %22 : i32 to vector<128x1xi32>
      %24 = arith.subi %19, %23 : vector<128x1xi32>
      %25 = vector.broadcast %20 : vector<1x512xi32> to vector<128x512xi32>
      %26 = vector.broadcast %24 : vector<128x1xi32> to vector<128x512xi32>
      %27 = arith.cmpi eq, %25, %26 : vector<128x512xi32>
      %cst_13 = arith.constant 0.000000e+00 : f32
      %28 = vector.broadcast %cst_13 : f32 to vector<128x512xf32>
      %29 = arith.select %27, %18, %28 : vector<128x512xi1>, vector<128x512xf32>
      %cst_14 = arith.constant dense<0.000000e+00> : vector<128xf32>
      %30 = vector.multi_reduction <add>, %29, %cst_14 [1] : vector<128x512xf32> to vector<128xf32>
      %31 = vector.shape_cast %30 : vector<128xf32> to vector<128x1xf32>
      %32 = arith.addf %21, %31 : vector<128x1xf32>
      %c0_15 = arith.constant 0 : index
      %c0_16 = arith.constant 0 : index
      %33 = vector.load %arg16[%c0_15, %c0_16] : memref<128x1xf32, #tpu.memory_space<vmem>>, vector<128x1xf32>
      tpu.vector_store %arg16[%c0_15, %c0_16], %32 {strides = array<i32>} : memref<128x1xf32, #tpu.memory_space<vmem>>, vector<128x1xf32>,
      %cst_17 = arith.constant dense<0xFF800000> : vector<128xf32>
      %34 = vector.multi_reduction <maximumf>, %18, %cst_17 [1] : vector<128x512xf32> to vector<128xf32>
      %35 = vector.shape_cast %34 : vector<128xf32> to vector<128x1xf32>
      %36 = vector.broadcast %35 : vector<128x1xf32> to vector<128x512xf32>
      %37 = arith.cmpf oeq, %18, %36 : vector<128x512xf32>
      %c1073741824_i32 = arith.constant 1073741824 : i32
      %38 = vector.shape_cast %20 : vector<1x512xi32> to vector<1x512xi32>
      %39 = vector.broadcast %38 : vector<1x512xi32> to vector<128x512xi32>
      %40 = vector.broadcast %c1073741824_i32 : i32 to vector<128x512xi32>
      %41 = arith.select %37, %39, %40 : vector<128x512xi1>, vector<128x512xi32>
      %cst_18 = arith.constant dense<2147483647> : vector<128xi32>
      %42 = vector.multi_reduction <minsi>, %41, %cst_18 [1] : vector<128x512xi32> to vector<128xi32>
      %43 = vector.shape_cast %42 : vector<128xi32> to vector<128x1xi32>
      %c512_i32_19 = arith.constant 512 : i32
      %44 = arith.muli %arg1, %c512_i32_19 : i32
      %45 = vector.broadcast %44 : i32 to vector<128x1xi32>
      %46 = arith.addi %43, %45 : vector<128x1xi32>
      %c0_20 = arith.constant 0 : index
      %c0_21 = arith.constant 0 : index
      %47 = vector.load %arg14[%c0_20, %c0_21] : memref<128x1xf32, #tpu.memory_space<vmem>>, vector<128x1xf32>
      %48 = arith.cmpf ogt, %35, %47 : vector<128x1xf32>
      %c0_22 = arith.constant 0 : index
      %c0_23 = arith.constant 0 : index
      %49 = vector.load %arg17[%c0_22, %c0_23] : memref<128x1xi32, #tpu.memory_space<vmem>>, vector<128x1xi32>
      %50 = arith.select %48, %46, %49 : vector<128x1xi1>, vector<128x1xi32>
      %c0_24 = arith.constant 0 : index
      %c0_25 = arith.constant 0 : index
      %51 = vector.load %arg17[%c0_24, %c0_25] : memref<128x1xi32, #tpu.memory_space<vmem>>, vector<128x1xi32>
      tpu.vector_store %arg17[%c0_24, %c0_25], %50 {strides = array<i32>} : memref<128x1xi32, #tpu.memory_space<vmem>>, vector<128x1xi32>,
      %52 = arith.maximumf %47, %35 : vector<128x1xf32>
      %c0_26 = arith.constant 0 : index
      %c0_27 = arith.constant 0 : index
      %53 = vector.load %arg15[%c0_26, %c0_27] : memref<128x1xf32, #tpu.memory_space<vmem>>, vector<128x1xf32>
      %54 = arith.subf %47, %52 : vector<128x1xf32>
      %55 = math.exp %54 : vector<128x1xf32>
      %56 = arith.mulf %53, %55 : vector<128x1xf32>
      %57 = vector.broadcast %52 : vector<128x1xf32> to vector<128x512xf32>
      %58 = arith.subf %18, %57 : vector<128x512xf32>
      %59 = math.exp %58 : vector<128x512xf32>
      %cst_28 = arith.constant dense<0.000000e+00> : vector<128xf32>
      %60 = vector.multi_reduction <add>, %59, %cst_28 [1] : vector<128x512xf32> to vector<128xf32>
      %61 = vector.shape_cast %60 : vector<128xf32> to vector<128x1xf32>
      %62 = arith.addf %56, %61 : vector<128x1xf32>
      %c0_29 = arith.constant 0 : index
      %c0_30 = arith.constant 0 : index
      %63 = vector.load %arg15[%c0_29, %c0_30] : memref<128x1xf32, #tpu.memory_space<vmem>>, vector<128x1xf32>
      tpu.vector_store %arg15[%c0_29, %c0_30], %62 {strides = array<i32>} : memref<128x1xf32, #tpu.memory_space<vmem>>, vector<128x1xf32>,
      %c0_31 = arith.constant 0 : index
      %c0_32 = arith.constant 0 : index
      %64 = vector.load %arg14[%c0_31, %c0_32] : memref<128x1xf32, #tpu.memory_space<vmem>>, vector<128x1xf32>
      tpu.vector_store %arg14[%c0_31, %c0_32], %52 {strides = array<i32>} : memref<128x1xf32, #tpu.memory_space<vmem>>, vector<128x1xf32>,
    } else {
    }
    %c1_i32 = arith.constant 1 : i32
    %9 = arith.cmpi eq, %arg1, %c1_i32 : i32
    %10 = arith.andi %2, %9 : i1
    %11 = arith.extui %10 : i1 to i32
    %c0_i32_3 = arith.constant 0 : i32
    %12 = arith.cmpi ne, %11, %c0_i32_3 : i32
    scf.if %12 {
      %c0 = arith.constant 0 : index
      %c0_4 = arith.constant 0 : index
      %13 = vector.load %arg14[%c0, %c0_4] : memref<128x1xf32, #tpu.memory_space<vmem>>, vector<128x1xf32>
      %c0_5 = arith.constant 0 : index
      %c0_6 = arith.constant 0 : index
      %14 = vector.load %arg15[%c0_5, %c0_6] : memref<128x1xf32, #tpu.memory_space<vmem>>, vector<128x1xf32>
      %15 = math.log %14 : vector<128x1xf32>
      %16 = arith.addf %13, %15 : vector<128x1xf32>
      %c0_7 = arith.constant 0 : index
      %c0_8 = arith.constant 0 : index
      %17 = vector.load %arg16[%c0_7, %c0_8] : memref<128x1xf32, #tpu.memory_space<vmem>>, vector<128x1xf32>
      %18 = arith.subf %16, %17 : vector<128x1xf32>
      %c0_9 = arith.constant 0 : index
      %c0_10 = arith.constant 0 : index
      %19 = vector.load %arg11[%c0_9, %c0_10] : memref<128x1xf32, #tpu.memory_space<vmem>>, vector<128x1xf32>
      tpu.vector_store %arg11[%c0_9, %c0_10], %18 {strides = array<i32>} : memref<128x1xf32, #tpu.memory_space<vmem>>, vector<128x1xf32>,
      %c0_11 = arith.constant 0 : index
      %c0_12 = arith.constant 0 : index
      %20 = vector.load %arg17[%c0_11, %c0_12] : memref<128x1xi32, #tpu.memory_space<vmem>>, vector<128x1xi32>
      %c0_13 = arith.constant 0 : index
      %c0_14 = arith.constant 0 : index
      %21 = vector.load %arg12[%c0_13, %c0_14] : memref<128x1xi32, #tpu.memory_space<vmem>>, vector<128x1xi32>
      tpu.vector_store %arg12[%c0_13, %c0_14], %20 {strides = array<i32>} : memref<128x1xi32, #tpu.memory_space<vmem>>, vector<128x1xi32>,
    } else {
    }
    return
  }
  func.func @transform_0(%arg0: i32, %arg1: i32, %arg2: memref<1xi32, #tpu.memory_space<smem>>) -> (i32, i32) {
    %c0_i32 = arith.constant 0 : i32
    %c0_i32_0 = arith.constant 0 : i32
    return %arg0, %c0_i32 : i32, i32
  }
  func.func @transform_1(%arg0: i32, %arg1: i32, %arg2: memref<1xi32, #tpu.memory_space<smem>>) -> (i32, i32) {
    %0 = arith.index_cast %arg0 : i32 to index
    %1 = memref.load %arg2[%0] : memref<1xi32, #tpu.memory_space<smem>>
    %2 = arith.muli %arg0, %1 : i32
    %c0_i32 = arith.constant 0 : i32
    %c0_i32_0 = arith.constant 0 : i32
    return %2, %c0_i32 : i32, i32
  }
  func.func @transform_2(%arg0: i32, %arg1: i32, %arg2: memref<1xi32, #tpu.memory_space<smem>>) -> (i32, i32) {
    %c0_i32 = arith.constant 0 : i32
    %c0_i32_0 = arith.constant 0 : i32
    %c0_i32_1 = arith.constant 0 : i32
    return %c0_i32, %c0_i32_0 : i32, i32
  }
  func.func @transform_3(%arg0: i32, %arg1: i32, %arg2: memref<1xi32, #tpu.memory_space<smem>>) -> (i32, i32) {
    %c0_i32 = arith.constant 0 : i32
    %c0_i32_0 = arith.constant 0 : i32
    %c0_i32_1 = arith.constant 0 : i32
    return %c0_i32, %c0_i32_0 : i32, i32
  }
  func.func @transform_4(%arg0: i32, %arg1: i32, %arg2: memref<1xi32, #tpu.memory_space<smem>>) -> (i32, i32) {
    %c0_i32 = arith.constant 0 : i32
    %c0_i32_0 = arith.constant 0 : i32
    %c0_i32_1 = arith.constant 0 : i32
    return %c0_i32, %c0_i32_0 : i32, i32
  }
  func.func @transform_5(%arg0: i32, %arg1: i32, %arg2: memref<1xi32, #tpu.memory_space<smem>>) -> (i32, i32) {
    %c0_i32 = arith.constant 0 : i32
    %c0_i32_0 = arith.constant 0 : i32
    %c0_i32_1 = arith.constant 0 : i32
    return %c0_i32, %c0_i32_0 : i32, i32
  }
  func.func @transform_6(%arg0: i32, %arg1: i32, %arg2: memref<1xi32, #tpu.memory_space<smem>>) -> (i32, i32) {
    %0 = arith.index_cast %arg0 : i32 to index
    %1 = memref.load %arg2[%0] : memref<1xi32, #tpu.memory_space<smem>>
    %2 = arith.muli %arg1, %1 : i32
    %c0_i32 = arith.constant 0 : i32
    %c0_i32_0 = arith.constant 0 : i32
    return %c0_i32, %2 : i32, i32
  }
  func.func @transform_7(%arg0: i32, %arg1: i32, %arg2: memref<1xi32, #tpu.memory_space<smem>>) -> (i32, i32) {
    %0 = arith.index_cast %arg0 : i32 to index
    %1 = memref.load %arg2[%0] : memref<1xi32, #tpu.memory_space<smem>>
    %2 = arith.muli %arg1, %1 : i32
    %c0_i32 = arith.constant 0 : i32
    %c0_i32_0 = arith.constant 0 : i32
    return %c0_i32, %2 : i32, i32
  }
  func.func @transform_8(%arg0: i32, %arg1: i32, %arg2: memref<1xi32, #tpu.memory_space<smem>>) -> (i32, i32) {
    %c0_i32 = arith.constant 0 : i32
    %c0_i32_0 = arith.constant 0 : i32
    return %arg0, %c0_i32 : i32, i32
  }
  func.func @transform_9(%arg0: i32, %arg1: i32, %arg2: memref<1xi32, #tpu.memory_space<smem>>) -> (i32, i32) {
    %c0_i32 = arith.constant 0 : i32
    %c0_i32_0 = arith.constant 0 : i32
    return %arg0, %c0_i32 : i32, i32
  }
}

</mosaic_0001>

<bundles_post_ra>
// kernel: mlm_head_forward.1
= control target key start
LH: loop header
LB: loop body
LE: loop exit
PB: predicated region body
PF: predicated region fallthrough
CT: control target
= control target key end

     0   :  { %s6144_s0 = inlined_call_operand.<no memory space> [shape: s32[1], index: 0, kind: input, shape index: {}]   ;;  %s6145_s1 = inlined_call_operand.vmem [shape: s32[128,1], index: 1, kind: input, shape index: {}]   ;;  %s6146_s2 = inlined_call_operand.vmem [shape: bf16[128,32], index: 2, kind: input, shape index: {}]   ;;  %s6147_s3 = inlined_call_operand.vmem [shape: bf16[32,32], index: 3, kind: input, shape index: {}]   ;;  %s6148_s4 = inlined_call_operand.vmem [shape: f32[1,32], index: 4, kind: input, shape index: {}]   ;;  %s6149_s5 = inlined_call_operand.vmem [shape: f32[1,32], index: 5, kind: input, shape index: {}]   ;;  %s6150_s6 = inlined_call_operand.vmem [shape: f32[1,32], index: 6, kind: input, shape index: {}]   ;;  %s6151_s7 = inlined_call_operand.vmem [shape: bf16[32,1024], index: 7, kind: input, shape index: {}]   ;;  %s6152_s8 = inlined_call_operand.vmem [shape: f32[1,1024], index: 8, kind: input, shape index: {}]   ;;  %s6153_s9 = inlined_call_operand.vmem [shape: f32[128,1], index: 9, kind: output, shape index: {0}]   ;;  %s6154_s10 = inlined_call_operand.vmem [shape: s32[128,1], index: 10, kind: output, shape index: {1}]  }
   0x1   :  { %16 = sst [smem:[#allocation8]] %s6144_s0 }
   0x2   :  { %s3810_s15 = smov 0   ;;  %s3812_s16 = smov 0  }
   0x3   :  { %s3814_s17 = smov 0   ;;  %s3816_s18 = smov 0  }
   0x4   :  { %s3818_s19 = smov 0  }
   0x5 LB: > { %s31_s0 = sadd.s32 1, %s3742_s18  ;;  %s178_s20 = sld [smem:[#allocation8]]  ;;  %s3746_s19 = sphi %s3818_s19, %s22_s19   ;;  %s3742_s18 = sphi %s3816_s18, %s6566_s18   ;;  %s3738_s17 = sphi %s3814_s17, %s6565_s17   ;;  %s3734_s16 = sphi %s3812_s16, %s6564_s16   ;;  %s3730_s15 = sphi %s3810_s15, %s6563_s15  }
   0x6   : > { %p32_p0 = scmp.ge.s32.totalorder %s31_s0, 2  ;;  %p192_p1 = scmp.ne.s32.totalorder %s3734_s16, %s3730_s15 }
   0x7   : > { %p193_p2 = scmp.eq.s32.totalorder %s3746_s19, 0  ;;  %s185_s24 = sadd.s32 1, %s3734_s16 }
   0x8   : > { %s6568_s0 = smov (%p32_p0, %s31_s0), 0  ;;  %p3289_p5 = scmp.ge.s32.totalorder %s3746_s19, 2 }
   0x9   : > { %p194_p3 = por %p193_p2, %p192_p1 }
   0xb   : > { %s179_s21 = smul.u32 %s3742_s18, %s178_s20 }
   0xc   : > { %s181_s22 = smul.u32 %s178_s20, %s6568_s0 }
   0xd   : > { %334 = sbr.rel (%p3289_p5) target bundleno = 35 (0x23), region = 40 }
   0xe   : > { %s182_s23 = ssub.s32 %s179_s21, %s181_s22 }
   0xf   : > { %p183_p4 = scmp.eq.s32.totalorder %s182_s23, 0 }
  0x11   : > { %s3845_s25 = scalar_select %p183_p4, %s3734_s16, %s185_s24  }
  0x14   : > { %337 = sbr.rel (!%p194_p3) target bundleno = 35 (0x23), region = 44  ;;  %s342_s26 = sld [smem:[#allocation8]] (%p194_p3) }
  0x15   : > { %s339_s27 = sand.u32 (%p194_p3), 1, %s3734_s16  }
  0x16   : > { %s3290_s28 = sshll.u32 (%p194_p3), %s339_s27, 6 }
  0x17   : > { %s341_s14 = scalar_lea.vmem (%p194_p3), [#allocation9], %s3290_s28 }
  0x1a   : > { %s343_s29 = smul.u32 (%p194_p3), %s3742_s18, %s342_s26 }
  0x1c   : > { %s3349_s30 = sshll.u32 %s343_s29, 4 }
  0x1d   : > { %s346_s13 = scalar_lea.vmem %s6151_s7, %s3349_s30 }
  0x1e   : > { %v359_v0 = vld [vmem:[%s346_s13] sm:$0xff]  ;;  %v361_v1 = vld [vmem:[%s346_s13 + $0x8] sm:$0xff] }
  0x1f   : > { %v363_v2 = vld [vmem:[%s346_s13 + $0x20] sm:$0xff]  ;;  %360 = vst [vmem:[%s341_s14] sm:$0xff] %v359_v0  ;;  %362 = vst [vmem:[%s341_s14 + $0x8] sm:$0xff] %v361_v1  ;;  %v365_v3 = vld [vmem:[%s346_s13 + $0x28] sm:$0xff] }
  0x20   : > { %364 = vst [vmem:[%s341_s14 + $0x10] sm:$0xff] %v363_v2  ;;  %v367_v4 = vld [vmem:[%s346_s13 + $0x40] sm:$0xff]  ;;  %v369_v5 = vld [vmem:[%s346_s13 + $0x48] sm:$0xff]  ;;  %366 = vst [vmem:[%s341_s14 + $0x18] sm:$0xff] %v365_v3 }
  0x21   : > { %368 = vst [vmem:[%s341_s14 + $0x20] sm:$0xff] %v367_v4  ;;  %370 = vst [vmem:[%s341_s14 + $0x28] sm:$0xff] %v369_v5  ;;  %v371_v6 = vld [vmem:[%s346_s13 + $0x60] sm:$0xff]  ;;  %v373_v7 = vld [vmem:[%s346_s13 + $0x68] sm:$0xff] }
  0x22   : > { %372 = vst [vmem:[%s341_s14 + $0x30] sm:$0xff] %v371_v6  ;;  %374 = vst [vmem:[%s341_s14 + $0x38] sm:$0xff] %v373_v7 }
  0x23 PF: > { %p3293_p6 = scmp.ge.s32.totalorder %s3746_s19, 1  ;;  %p391_p7 = scmp.lt.s32.totalorder %s3746_s19, 3 }
  0x25   : > { %p392_p8 = pnand %p3293_p6, %p391_p7 }
  0x26   : > { %s398_s20 = sand.u32 (!%p392_p8), 1, %s3730_s15   ;;  %s3856_s21 = sld [smem:[#allocation8]] (!%p392_p8) }
  0x27   : > { %395 = sbr.rel (%p392_p8) target bundleno = 1745 (0x6d1), region = 71  ;;  %s3294_s22 = sshll.u32 (!%p392_p8), %s398_s20, 6 }
  0x28   : > { %p499_p9 = scmp.eq.s32.totalorder (!%p392_p8), %s3738_s17, 0  ;;  %s3870_s28 = scalar_lea.vmem (!%p392_p8), [#allocation9], %s3294_s22 }
  0x2c   : > { %s476_s23 = smul.u32 (!%p392_p8), %s3738_s17, %s3856_s21  ;;  %p498_p10 = scmp.gt.s32.totalorder (!%p392_p8), %s3856_s21, 0 }
  0x2e   : > { %s3295_s24 = sshll.u32 %s476_s23, 2  ;;  %p500_p11 = pnand %p499_p9, %p498_p10 }
  0x2f   : > { %p478_p12 = scmp.lt.s32.totalorder %s3295_s24, 7  ;;  %v3428_v8 = vld [vmem:[%s6147_s3] sm:$0xff] (!%p500_p11)   ;;  %v3429_v9 = vld [vmem:[%s6147_s3 + $0x8] sm:$0xff] (!%p500_p11)   ;;  %vm583_vm0 = vcmask (!%p500_p11), 261120   ;;  %v3434_v14 = vld [vmem:[%s6146_s2 + $0x10] sm:$0xff] (!%p500_p11)   ;;  %vm1120_vm1 = vcmask (!%p500_p11), 7168  }
  0x30   : > { %503 = sbr.rel (%p500_p11) target bundleno = 644 (0x284), region = 79  ;;  %3360 = vmatprep.subr.bf16.mxu0 (!%p500_p11), %v3428_v8  ;;  %3380 = vmatprep.subr.bf16.mxu1 (!%p500_p11), %v3428_v8  ;;  %v3430_v10 = vld [vmem:[%s6146_s2] sm:$0xff] (!%p500_p11)   ;;  %v3432_v12 = vld [vmem:[%s6146_s2 + $0x8] sm:$0xff] (!%p500_p11)   ;;  %v3435_v15 = vld [vmem:[%s6146_s2 + $0x30] sm:$0xff] (!%p500_p11)  }
  0x31   : > { %s6570_s24 = smov (!%p478_p12, %s3295_s24), 7  ;;  %3361 = vmatpush3.bf16.msra.mxu0 (!%p500_p11), %v3428_v8  ;;  %3382 = vmatpush3.bf16.msra.mxu1 (!%p500_p11), %v3428_v8  ;;  %v3431_v11 = vld [vmem:[%s6146_s2 + $0x20] sm:$0xff] (!%p500_p11)   ;;  %v3433_v13 = vld [vmem:[%s6146_s2 + $0x28] sm:$0xff] (!%p500_p11)   ;;  %v3436_v16 = vld [vmem:[%s6146_s2 + $0x18] sm:$0xff] (!%p500_p11)  }
  0x32   : > { %s480_s15 = scalar_lea.vmem %s6152_s8, %s6570_s24  ;;  %3362 = vmatprep.subr.bf16.mxu0 (!%p500_p11), %v3429_v9  ;;  %3381 = vmatprep.subr.bf16.mxu1 (!%p500_p11), %v3429_v9  ;;  %v3437_v17 = vld [vmem:[%s6146_s2 + $0x38] sm:$0xff] (!%p500_p11)   ;;  %v3913_v18 = vld [vmem:[%s6148_s4] ss:$0 sm:$0xff] (!%p500_p11) }
  0x33   : > { %3364 = vmatprep.mubr.msk.bf16.mxu0 (!%p500_p11), %vm583_vm0, %v3430_v10  ;;  %3372 = vmatprep.mubr.msk.bf16.mxu1 (!%p500_p11), %vm583_vm0, %v3431_v11 }
  0x35   : > { %3363 = vmatpush3.bf16.msra.mxu0 (!%p500_p11), %v3429_v9  ;;  %3383 = vmatpush3.bf16.msra.mxu1 (!%p500_p11), %v3429_v9 }
  0x38   : > { %3365 = vmatmul.mubr.msk.bf16.vlgmr.msra.gmra.mrb[0].mxu0 %vm583_vm0, %v3432_v12  ;;  %3373 = vmatmul.mubr.msk.bf16.vlgmr.msra.gmra.mrb[0].mxu1 %vm583_vm0, %v3433_v13 }
  0x39   : > { %3368 = vmatprep.mubr.msk.bf16.mxu0 %vm583_vm0, %v3434_v14  ;;  %3376 = vmatprep.mubr.msk.bf16.mxu1 %vm583_vm0, %v3435_v15 }
  0x40   : > { %3369 = vmatmul.mubr.msk.bf16.gmra.mrb[4].mxu0 %vm583_vm0, %v3436_v16  ;;  %3377 = vmatmul.mubr.msk.bf16.gmra.mrb[4].mxu1 %vm583_vm0, %v3437_v17 }
 0x10b   : > { %v3366_v19 = vpop.f32.mrb[0].mxu0  ;;  %v3374_v20 = vpop.f32.mrb[0].mxu1 }
 0x10c   : > { %v651_v21 = vadd.f32 %v3366_v19, %v3913_v18  ;;  %v683_v22 = vadd.f32 %v3374_v20, %v3913_v18  ;;  %v642_v23 = vpop.f32.mrb[1].mxu0  ;;  %v674_v24 = vpop.f32.mrb[1].mxu1 }
 0x10d   : > { %v643_v25 = vadd.f32 %v3913_v18, %v642_v23  ;;  %v3367_v26 = vpop.f32.mrb[2].mxu0  ;;  %v3375_v27 = vpop.f32.mrb[2].mxu1  ;;  %v3923_v35 = vadd.f32 %v3913_v18, %v674_v24 }
 0x10e   : > { %v723_v28 = vmul.f32 0.044715, %v651_v21  ;;  %v731_v29 = vmul.f32 0.044715, %v683_v22  ;;  %v654_v30 = vadd.f32 %v3367_v26, %v3913_v18  ;;  %v3920_v31 = vadd.f32 %v3375_v27, %v3913_v18  ;;  %v645_v32 = vpop.f32.mrb[3].mxu0  ;;  %v677_v33 = vpop.f32.mrb[3].mxu1 }
 0x10f   : > { %v721_v34 = vmul.f32 0.044715, %v643_v25  ;;  %v3926_v38 = vadd.f32 %v3913_v18, %v645_v32  ;;  %v3930_v41 = vadd.f32 %v3913_v18, %v677_v33  ;;  %v729_v48 = vmul.f32 0.044715, %v3923_v35 }
 0x110   : > { %v724_v36 = vmul.f32 0.044715, %v654_v30  ;;  %v747_v37 = vmul.f32 %v731_v29, %v683_v22  ;;  %v739_v39 = vmul.f32 %v723_v28, %v651_v21  ;;  %v732_v40 = vmul.f32 0.044715, %v3920_v31 }
 0x111   : > { %v737_v47 = vmul.f32 %v721_v34, %v643_v25  ;;  %v3936_v56 = vmul.f32 0.5, %v683_v22  ;;  %v722_v59 = vmul.f32 0.044715, %v3926_v38  ;;  %v730_v60 = vmul.f32 0.044715, %v3930_v41 }
 0x112   : > { %v763_v42 = vmul.f32 %v747_v37, %v683_v22  ;;  %v740_v43 = vmul.f32 %v724_v36, %v654_v30  ;;  %v755_v46 = vmul.f32 %v739_v39, %v651_v21  ;;  %v748_v0 = vmul.f32 %v732_v40, %v3920_v31 }
 0x113   : > { %v3370_v44 = vpop.f32.mrb[4].mxu0  ;;  %v3378_v45 = vpop.f32.mrb[4].mxu1  ;;  %v753_v58 = vmul.f32 %v737_v47, %v643_v25  ;;  %v3947_v2 = vmul.f32 0.5, %v651_v21  ;;  %v3949_v3 = vmul.f32 0.5, %v654_v30  ;;  %v3951_v4 = vmul.f32 0.5, %v643_v25 }
 0x114   : > { %v658_v49 = vpop.f32.mrb[5].mxu0  ;;  %v690_v50 = vpop.f32.mrb[5].mxu1  ;;  %v779_v51 = vadd.f32 %v763_v42, %v683_v22  ;;  %v756_v52 = vmul.f32 %v740_v43, %v654_v30  ;;  %v3934_v53 = vadd.f32 %v3370_v44, %v3913_v18  ;;  %v771_v57 = vadd.f32 %v755_v46, %v651_v21 }
 0x115   : > { %v3371_v54 = vpop.f32.mrb[6].mxu0  ;;  %v3379_v55 = vpop.f32.mrb[6].mxu1  ;;  %v3945_v1 = vadd.f32 %v3378_v45, %v3913_v18  ;;  %v3954_v5 = vadd.f32 %v3913_v18, %v658_v49  ;;  %v3961_v10 = vadd.f32 %v3913_v18, %v690_v50  ;;  %v769_v12 = vadd.f32 %v753_v58, %v643_v25 }
 0x116   : > { %v3941_v61 = vadd.f32 %v3371_v54, %v3913_v18  ;;  %v661_v62 = vpop.f32.mrb[7].mxu0  ;;  %v693_v63 = vpop.f32.mrb[7].mxu1  ;;  %v795_v7 = vmul.f32 0.7978846, %v779_v51  ;;  %v772_v8 = vadd.f32 %v756_v52, %v654_v30  ;;  %v727_v9 = vmul.f32 0.044715, %v3934_v53 }
 0x117   : > { %v3957_v6 = vadd.f32 %v3913_v18, %v661_v62  ;;  %v787_v11 = vmul.f32 0.7978846, %v771_v57  ;;  %v764_v15 = vmul.f32 %v748_v0, %v3920_v31  ;;  %v3966_v16 = vadd.f32 %v3379_v55, %v3913_v18 }
 0x118   : > { %v728_v13 = vmul.f32 0.044715, %v3941_v61  ;;  %3438 = vtanh.f32 %v795_v7  ;;  %v788_v14 = vmul.f32 0.7978846, %v772_v8  ;;  %v785_v17 = vmul.f32 0.7978846, %v769_v12 }
 0x119   : > { %3440 = vtanh.f32 %v787_v11  ;;  %v745_v19 = vmul.f32 %v729_v48, %v3923_v35  ;;  %v726_v20 = vmul.f32 0.044715, %v3957_v6  ;;  %v780_v21 = vadd.f32 %v764_v15, %v3920_v31 }
 0x11a   : > { %3442 = vtanh.f32 %v788_v14  ;;  %v746_v22 = vmul.f32 %v730_v60, %v3930_v41  ;;  %v3973_v23 = vadd.f32 %v3913_v18, %v693_v63  ;;  %v738_v25 = vmul.f32 %v722_v59, %v3926_v38 }
 0x11b   : > { %3444 = vtanh.f32 %v785_v17  ;;  %v761_v24 = vmul.f32 %v745_v19, %v3923_v35  ;;  %v725_v26 = vmul.f32 0.044715, %v3954_v5  ;;  %v796_v27 = vmul.f32 0.7978846, %v780_v21 }
 0x11c   : > { %v762_v28 = vmul.f32 %v746_v22, %v3930_v41  ;;  %v744_v29 = vmul.f32 %v728_v13, %v3941_v61  ;;  %v733_v30 = vmul.f32 0.044715, %v3961_v10  ;;  %v754_v33 = vmul.f32 %v738_v25, %v3926_v38 }
 0x11d   : > { %v777_v32 = vadd.f32 %v761_v24, %v3923_v35  ;;  %v743_v18 = vmul.f32 %v727_v9, %v3934_v53  ;;  %3446 = vtanh.f32 %v796_v27  ;;  %v742_v37 = vmul.f32 %v726_v20, %v3957_v6 }
 0x11e   : > { %v778_v34 = vadd.f32 %v762_v28, %v3930_v41  ;;  %v760_v36 = vmul.f32 %v744_v29, %v3941_v61  ;;  %v734_v39 = vmul.f32 0.044715, %v3973_v23  ;;  %v770_v42 = vadd.f32 %v754_v33, %v3926_v38 }
 0x11f   : > { %v793_v40 = vmul.f32 0.7978846, %v777_v32  ;;  %v759_v43 = vmul.f32 %v743_v18, %v3934_v53  ;;  %v758_v46 = vmul.f32 %v742_v37, %v3957_v6  ;;  %v741_v47 = vmul.f32 %v725_v26, %v3954_v5 }
 0x120   : > { %v794_v44 = vmul.f32 0.7978846, %v778_v34  ;;  %v776_v45 = vadd.f32 %v760_v36, %v3941_v61  ;;  %v736_v48 = vmul.f32 0.044715, %v3966_v16  ;;  %v786_v49 = vmul.f32 0.7978846, %v770_v42 }
 0x121   : > { %3448 = vtanh.f32 %v793_v40  ;;  %v775_v50 = vadd.f32 %v759_v43, %v3934_v53  ;;  %v774_v54 = vadd.f32 %v758_v46, %v3957_v6  ;;  %v757_v55 = vmul.f32 %v741_v47, %v3954_v5 }
 0x122   : > { %v3439_v51 = vpop.eup %3438  ;;  %3450 = vtanh.f32 %v794_v44  ;;  %v792_v52 = vmul.f32 0.7978846, %v776_v45  ;;  %v750_v60 = vmul.f32 %v734_v39, %v3973_v23  ;;  %v735_v17 = vmul.f32 0.044715, %v3945_v1 }
 0x123   : > { %v3441_v57 = vpop.eup %3440  ;;  %v827_v58 = vadd.f32 1.0, %v3439_v51  ;;  %3452 = vtanh.f32 %v786_v49  ;;  %v791_v59 = vmul.f32 0.7978846, %v775_v50  ;;  %v790_v0 = vmul.f32 0.7978846, %v774_v54 }
 0x124   : > { %v3443_v62 = vpop.eup %3442  ;;  %v819_v63 = vadd.f32 1.0, %v3441_v57  ;;  %3454 = vtanh.f32 %v792_v52  ;;  %v773_v7 = vadd.f32 %v757_v55, %v3954_v5  ;;  %v766_v12 = vmul.f32 %v750_v60, %v3973_v23 }
 0x125   : > { %v3445_v8 = vpop.eup %3444  ;;  %v4000_v9 = vmul.f32 %v827_v58, %v3936_v56  ;;  %v820_v11 = vadd.f32 1.0, %v3443_v62  ;;  %3456 = vtanh.f32 %v791_v59  ;;  %v749_v24 = vmul.f32 %v733_v30, %v3961_v10 }
 0x126   : > { %v4004_v13 = vmul.f32 %v819_v63, %v3947_v2  ;;  %v817_v14 = vadd.f32 1.0, %v3445_v8  ;;  %3458 = vtanh.f32 %v790_v0  ;;  %v789_v15 = vmul.f32 0.7978846, %v773_v7 }
 0x127   : > { %v879_v19 = vsel %vm583_vm0, %v4000_v9, 0.0  ;;  %v4010_v20 = vmul.f32 %v820_v11, %v3949_v3  ;;  %v782_v56 = vadd.f32 %v766_v12, %v3973_v23  ;;  %v3447_v21 = vpop.eup %3446  ;;  %v716_v25 = vmul.f32 0.5, %v3920_v31 }
 0x128   : > { %880 = vadd.xlane.f32.xlu0 %v879_v19  ;;  %v855_v22 = vsel %vm583_vm0, %v4004_v13, 0.0  ;;  %v4016_v2 = vmul.f32 %v817_v14, %v3951_v4  ;;  %3460 = vtanh.f32 %v789_v15  ;;  %v828_v26 = vadd.f32 1.0, %v3447_v21 }
 0x129   : > { %856 = vadd.xlane.f32.xlu1 %v855_v22  ;;  %v798_v27 = vmul.f32 0.7978846, %v782_v56  ;;  %v713_v3 = vmul.f32 0.5, %v3923_v35  ;;  %v765_v28 = vmul.f32 %v749_v24, %v3961_v10  ;;  %v752_v29 = vmul.f32 %v736_v48, %v3966_v16 }
 0x12a   : > { %v849_v33 = vsel %vm583_vm0, %v4016_v2, 0.0  ;;  %v4025_v4 = vmul.f32 %v828_v26, %v716_v25  ;;  %v751_v30 = vmul.f32 %v735_v17, %v3945_v1  ;;  %v858_v31 = vsel %vm583_vm0, %v4010_v20, 0.0 }
 0x12b   : > { %v3449_v32 = vpop.eup %3448  ;;  %3462 = vtanh.f32 %v798_v27  ;;  %v781_v35 = vadd.f32 %v765_v28, %v3961_v10  ;;  %v768_v36 = vmul.f32 %v752_v29, %v3966_v16  ;;  %v714_v39 = vmul.f32 0.5, %v3930_v41 }
 0x12c   : > { %v3451_v18 = vpop.eup %3450  ;;  %850 = vadd.xlane.f32.xlu0 %v849_v33  ;;  %v825_v34 = vadd.f32 1.0, %v3449_v32  ;;  %v706_v42 = vmul.f32 0.5, %v3926_v38  ;;  %v767_v43 = vmul.f32 %v751_v30, %v3945_v1  ;;  %v882_v50 = vsel %vm583_vm0, %v4025_v4, 0.0 }
 0x12d   : > { %v3453_v37 = vpop.eup %3452  ;;  %859 = vadd.xlane.f32.xlu1 %v858_v31  ;;  %v826_v40 = vadd.f32 1.0, %v3451_v18  ;;  %v797_v47 = vmul.f32 0.7978846, %v781_v35  ;;  %v784_v48 = vadd.f32 %v768_v36, %v3966_v16  ;;  %v712_v58 = vmul.f32 0.5, %v3941_v61 }
 0x12e   : > { %v3455_v44 = vpop.eup %3454  ;;  %v4035_v45 = vmul.f32 %v825_v34, %v713_v3  ;;  %v818_v46 = vadd.f32 1.0, %v3453_v37  ;;  %v783_v41 = vadd.f32 %v767_v43, %v3945_v1  ;;  %v711_v62 = vmul.f32 0.5, %v3934_v53 }
 0x12f   : > { %v3457_v49 = vpop.eup %3456  ;;  %v4040_v51 = vmul.f32 %v826_v40, %v714_v39  ;;  %v824_v52 = vadd.f32 1.0, %v3455_v44  ;;  %3464 = vtanh.f32 %v797_v47  ;;  %v800_v59 = vmul.f32 0.7978846, %v784_v48 }
 0x130   : > { %v3459_v54 = vpop.eup %3458  ;;  %v873_v38 = vsel %vm583_vm0, %v4035_v45, 0.0  ;;  %v4045_v55 = vmul.f32 %v818_v46, %v706_v42  ;;  %v823_v57 = vadd.f32 1.0, %v3457_v49  ;;  %v799_v63 = vmul.f32 0.7978846, %v783_v41 }
 0x131   : > { %883 = vadd.xlane.f32.xlu1 %v882_v50  ;;  %874 = vadd.xlane.f32.xlu0 %v873_v38  ;;  %v876_v0 = vsel %vm583_vm0, %v4040_v51, 0.0  ;;  %v4051_v7 = vmul.f32 %v824_v52, %v712_v58  ;;  %v822_v8 = vadd.f32 1.0, %v3459_v54  ;;  %3466 = vtanh.f32 %v800_v59 }
 0x132   : > { %v3461_v60 = vpop.eup %3460  ;;  %v852_v11 = vsel %vm583_vm0, %v4045_v55, 0.0  ;;  %v4055_v12 = vmul.f32 %v823_v57, %v711_v62  ;;  %3468 = vtanh.f32 %v799_v63  ;;  %v710_v53 = vmul.f32 0.5, %v3957_v6 }
 0x133   : > { %v821_v14 = vadd.f32 1.0, %v3461_v60  ;;  %v709_v15 = vmul.f32 0.5, %v3954_v5  ;;  %v870_v17 = vsel %vm583_vm0, %v4051_v7, 0.0  ;;  %v718_v25 = vmul.f32 0.5, %v3973_v23 }
 0x134   : > { %v867_v19 = vsel %vm583_vm0, %v4055_v12, 0.0  ;;  %v4063_v56 = vmul.f32 %v822_v8, %v710_v53  ;;  %v717_v6 = vmul.f32 0.5, %v3961_v10  ;;  %v720_v33 = vmul.f32 0.5, %v3966_v16 }
 0x135   : > { %v3463_v61 = vpop.eup %3462  ;;  %877 = vadd.xlane.f32.xlu1 %v876_v0  ;;  %853 = vadd.xlane.f32.xlu0 %v852_v11  ;;  %v4065_v21 = vmul.f32 %v821_v14, %v709_v15  ;;  %v719_v10 = vmul.f32 0.5, %v3945_v1 }
 0x136   : > { %v830_v22 = vadd.f32 1.0, %v3463_v61  ;;  %v864_v5 = vsel %vm583_vm0, %v4063_v56, 0.0 }
 0x137   : > { %v861_v27 = vsel %vm583_vm0, %v4065_v21, 0.0 }
 0x138   : > { %v4073_v3 = vmul.f32 %v830_v22, %v718_v25 }
 0x139   : > { %871 = vadd.xlane.f32.xlu1 %v870_v17  ;;  %868 = vadd.xlane.f32.xlu0 %v867_v19  ;;  %v3465_v24 = vpop.eup %3464 }
 0x13a   : > { %v829_v26 = vadd.f32 1.0, %v3465_v24  ;;  %v888_v18 = vsel %vm583_vm0, %v4073_v3, 0.0 }
 0x13b   : > { %v3467_v28 = vpop.eup %3466 }
 0x13c   : > { %v4075_v29 = vmul.f32 %v829_v26, %v717_v6  ;;  %v3469_v32 = vpop.eup %3468  ;;  %v832_v23 = vadd.f32 1.0, %v3467_v28 }
 0x13d   : > { %865 = vadd.xlane.f32.xlu1 %v864_v5  ;;  %862 = vadd.xlane.f32.xlu0 %v861_v27  ;;  %v831_v30 = vadd.f32 1.0, %v3469_v32 }
 0x13e   : > { %v885_v31 = vsel %vm583_vm0, %v4075_v29, 0.0  ;;  %v4083_v34 = vmul.f32 %v832_v23, %v720_v33 }
 0x13f   : > { %v4085_v35 = vmul.f32 %v831_v30, %v719_v10 }
 0x140   : > { %v894_v36 = vsel %vm583_vm0, %v4083_v34, 0.0 }
 0x141   : > { %889 = vadd.xlane.f32.xlu1 %v888_v18  ;;  %886 = vadd.xlane.f32.xlu0 %v885_v31  ;;  %v891_v16 = vsel %vm583_vm0, %v4085_v35, 0.0 }
 0x145   : > { %895 = vadd.xlane.f32.xlu1 %v894_v36  ;;  %892 = vadd.xlane.f32.xlu0 %v891_v16 }
 0x1b5   : > { %v881_v1 = vpop.xlane.xlu0 %880 }
 0x1b6   : > { %v908_v37 = vmul.f32 0.03125, %v881_v1  ;;  %v857_v39 = vpop.xlane.xlu1 %856 }
 0x1b7   : > { %v900_v40 = vmul.f32 0.03125, %v857_v39 }
 0x1b8   : > { %v4092_v42 = vsub.f32 %v4000_v9, %v908_v37 }
 0x1b9   : > { %v4095_v43 = vsub.f32 %v4004_v13, %v900_v40  ;;  %v851_v44 = vpop.xlane.xlu0 %850 }
 0x1ba   : > { %v860_v46 = vpop.xlane.xlu1 %859  ;;  %v898_v47 = vmul.f32 0.03125, %v851_v44  ;;  %v940_v9 = vmul.f32 %v4092_v42, %v4092_v42 }
 0x1bb   : > { %v901_v48 = vmul.f32 0.03125, %v860_v46  ;;  %v932_v49 = vmul.f32 %v4095_v43, %v4095_v43 }
 0x1bc   : > { %v4100_v50 = vsub.f32 %v4016_v2, %v898_v47  ;;  %v976_v62 = vsel %vm583_vm0, %v940_v9, 0.0 }
 0x1bd   : > { %v4103_v52 = vsub.f32 %v4010_v20, %v901_v48  ;;  %v952_v41 = vsel %vm583_vm0, %v932_v49, 0.0 }
 0x1be   : > { %v884_v13 = vpop.xlane.xlu1 %883  ;;  %953 = vadd.xlane.f32.xlu0 %v952_v41  ;;  %v875_v54 = vpop.xlane.xlu0 %874  ;;  %v930_v2 = vmul.f32 %v4100_v50, %v4100_v50 }
 0x1bf   : > { %v909_v38 = vmul.f32 0.03125, %v884_v13  ;;  %v906_v57 = vmul.f32 0.03125, %v875_v54  ;;  %v933_v58 = vmul.f32 %v4103_v52, %v4103_v52 }
 0x1c0   : > { %v946_v61 = vsel %vm583_vm0, %v930_v2, 0.0  ;;  %v3748_v2 = vmov -inf  }
 0x1c1   : > { %v4113_v59 = vsub.f32 %v4025_v4, %v909_v38  ;;  %v4116_v20 = vsub.f32 %v4035_v45, %v906_v57  ;;  %v955_v60 = vsel %vm583_vm0, %v933_v58, 0.0  ;;  %1121 = vst.msk [vmem:[#allocation3] sm:$0xff] %vm1120_vm1, %v3748_v2  ;;  %1122 = vst.msk [vmem:[#allocation3 + $0x8] sm:$0xff] %vm1120_vm1, %v3748_v2 }
 0x1c2   : > { %v878_v63 = vpop.xlane.xlu1 %877  ;;  %956 = vadd.xlane.f32.xlu1 %v955_v60  ;;  %977 = vadd.xlane.f32.xlu0 %v976_v62  ;;  %v854_v0 = vpop.xlane.xlu0 %853  ;;  %1123 = vst.msk [vmem:[#allocation3 + $0x10] sm:$0xff] %vm1120_vm1, %v3748_v2  ;;  %1124 = vst.msk [vmem:[#allocation3 + $0x18] sm:$0xff] %vm1120_vm1, %v3748_v2  ;;  %v3749_v60 = vmov 0.0   ;;  %v3750_v62 = vmov 0  }
 0x1c3   : > { %v907_v8 = vmul.f32 0.03125, %v878_v63  ;;  %v899_v11 = vmul.f32 0.03125, %v854_v0  ;;  %v941_v14 = vmul.f32 %v4113_v59, %v4113_v59  ;;  %v938_v15 = vmul.f32 %v4116_v20, %v4116_v20  ;;  %1125 = vst.msk [vmem:[#allocation3 + $0x20] sm:$0xff] %vm1120_vm1, %v3748_v2  ;;  %1126 = vst.msk [vmem:[#allocation3 + $0x28] sm:$0xff] %vm1120_vm1, %v3748_v2 }
 0x1c4   : > { %1127 = vst.msk [vmem:[#allocation3 + $0x30] sm:$0xff] %vm1120_vm1, %v3748_v2  ;;  %1128 = vst.msk [vmem:[#allocation3 + $0x38] sm:$0xff] %vm1120_vm1, %v3748_v2 }
 0x1c5   : > { %v4124_v4 = vsub.f32 %v4040_v51, %v907_v8  ;;  %v4127_v45 = vsub.f32 %v4045_v55, %v899_v11  ;;  %v979_v53 = vsel %vm583_vm0, %v941_v14, 0.0  ;;  %v970_v26 = vsel %vm583_vm0, %v938_v15, 0.0  ;;  %1129 = vst.msk [vmem:[#allocation3 + $0x40] sm:$0xff] %vm1120_vm1, %v3748_v2  ;;  %1130 = vst.msk [vmem:[#allocation3 + $0x48] sm:$0xff] %vm1120_vm1, %v3748_v2 }
 0x1c6   : > { %v872_v17 = vpop.xlane.xlu1 %871  ;;  %980 = vadd.xlane.f32.xlu1 %v979_v53  ;;  %947 = vadd.xlane.f32.xlu0 %v946_v61  ;;  %v869_v19 = vpop.xlane.xlu0 %868  ;;  %1131 = vst.msk [vmem:[#allocation3 + $0x50] sm:$0xff] %vm1120_vm1, %v3748_v2  ;;  %1132 = vst.msk [vmem:[#allocation3 + $0x58] sm:$0xff] %vm1120_vm1, %v3748_v2 }
 0x1c7   : > { %v905_v22 = vmul.f32 0.03125, %v872_v17  ;;  %v904_v24 = vmul.f32 0.03125, %v869_v19  ;;  %v931_v25 = vmul.f32 %v4127_v45, %v4127_v45  ;;  %v939_v51 = vmul.f32 %v4124_v4, %v4124_v4  ;;  %1133 = vst.msk [vmem:[#allocation3 + $0x60] sm:$0xff] %vm1120_vm1, %v3748_v2  ;;  %1134 = vst.msk [vmem:[#allocation3 + $0x68] sm:$0xff] %vm1120_vm1, %v3748_v2 }
 0x1c8   : > { %1135 = vst.msk [vmem:[#allocation3 + $0x70] sm:$0xff] %vm1120_vm1, %v3748_v2  ;;  %1136 = vst.msk [vmem:[#allocation3 + $0x78] sm:$0xff] %vm1120_vm1, %v3748_v2 }
 0x1c9   : > { %v4137_v55 = vsub.f32 %v4051_v7, %v905_v22  ;;  %v4140_v6 = vsub.f32 %v4055_v12, %v904_v24  ;;  %v949_v5 = vsel %vm583_vm0, %v931_v25, 0.0  ;;  %v973_v10 = vsel %vm583_vm0, %v939_v51, 0.0  ;;  %1137 = vst.msk [vmem:[#allocation4] sm:$0xff] %vm1120_vm1, %v3749_v60  ;;  %1138 = vst.msk [vmem:[#allocation4 + $0x8] sm:$0xff] %vm1120_vm1, %v3749_v60 }
 0x1ca   : > { %v866_v27 = vpop.xlane.xlu1 %865  ;;  %971 = vadd.xlane.f32.xlu0 %v970_v26  ;;  %950 = vadd.xlane.f32.xlu1 %v949_v5  ;;  %v863_v28 = vpop.xlane.xlu0 %862  ;;  %1139 = vst.msk [vmem:[#allocation4 + $0x10] sm:$0xff] %vm1120_vm1, %v3749_v60  ;;  %1140 = vst.msk [vmem:[#allocation4 + $0x18] sm:$0xff] %vm1120_vm1, %v3749_v60 }
 0x1cb   : > { %v903_v32 = vmul.f32 0.03125, %v866_v27  ;;  %v902_v33 = vmul.f32 0.03125, %v863_v28  ;;  %v936_v23 = vmul.f32 %v4140_v6, %v4140_v6  ;;  %v937_v18 = vmul.f32 %v4137_v55, %v4137_v55  ;;  %1141 = vst.msk [vmem:[#allocation4 + $0x20] sm:$0xff] %vm1120_vm1, %v3749_v60  ;;  %1142 = vst.msk [vmem:[#allocation4 + $0x28] sm:$0xff] %vm1120_vm1, %v3749_v60 }
 0x1cc   : > { %1143 = vst.msk [vmem:[#allocation4 + $0x30] sm:$0xff] %vm1120_vm1, %v3749_v60  ;;  %1144 = vst.msk [vmem:[#allocation4 + $0x38] sm:$0xff] %vm1120_vm1, %v3749_v60 }
 0x1cd   : > { %v4148_v7 = vsub.f32 %v4063_v56, %v903_v32  ;;  %v4151_v12 = vsub.f32 %v4065_v21, %v902_v33  ;;  %v964_v30 = vsel %vm583_vm0, %v936_v23, 0.0  ;;  %v967_v40 = vsel %vm583_vm0, %v937_v18, 0.0  ;;  %1145 = vst.msk [vmem:[#allocation4 + $0x40] sm:$0xff] %vm1120_vm1, %v3749_v60  ;;  %1146 = vst.msk [vmem:[#allocation4 + $0x48] sm:$0xff] %vm1120_vm1, %v3749_v60 }
 0x1ce   : > { %v890_v31 = vpop.xlane.xlu1 %889  ;;  %974 = vadd.xlane.f32.xlu1 %v973_v10  ;;  %965 = vadd.xlane.f32.xlu0 %v964_v30  ;;  %v887_v36 = vpop.xlane.xlu0 %886  ;;  %1147 = vst.msk [vmem:[#allocation4 + $0x50] sm:$0xff] %vm1120_vm1, %v3749_v60  ;;  %1148 = vst.msk [vmem:[#allocation4 + $0x58] sm:$0xff] %vm1120_vm1, %v3749_v60 }
 0x1cf   : > { %v911_v16 = vmul.f32 0.03125, %v890_v31  ;;  %v910_v1 = vmul.f32 0.03125, %v887_v36  ;;  %v934_v37 = vmul.f32 %v4151_v12, %v4151_v12  ;;  %v935_v56 = vmul.f32 %v4148_v7, %v4148_v7  ;;  %1149 = vst.msk [vmem:[#allocation4 + $0x60] sm:$0xff] %vm1120_vm1, %v3749_v60  ;;  %1150 = vst.msk [vmem:[#allocation4 + $0x68] sm:$0xff] %vm1120_vm1, %v3749_v60  ;;  %v4255_v36 = vld [vmem:[%s6149_s5] ss:$0 sm:$0xff] }
 0x1d0   : > { %1151 = vst.msk [vmem:[#allocation4 + $0x70] sm:$0xff] %vm1120_vm1, %v3749_v60  ;;  %1152 = vst.msk [vmem:[#allocation4 + $0x78] sm:$0xff] %vm1120_vm1, %v3749_v60 }
 0x1d1   : > { %v4161_v21 = vsub.f32 %v4073_v3, %v911_v16  ;;  %v4164_v39 = vsub.f32 %v4075_v29, %v910_v1  ;;  %v958_v44 = vsel %vm583_vm0, %v934_v37, 0.0  ;;  %v961_v9 = vsel %vm583_vm0, %v935_v56, 0.0  ;;  %1153 = vst.msk [vmem:[#allocation5] sm:$0xff] %vm1120_vm1, %v3749_v60  ;;  %1154 = vst.msk [vmem:[#allocation5 + $0x8] sm:$0xff] %vm1120_vm1, %v3749_v60 }
 0x1d2   : > { %v896_v46 = vpop.xlane.xlu1 %895  ;;  %968 = vadd.xlane.f32.xlu1 %v967_v40  ;;  %959 = vadd.xlane.f32.xlu0 %v958_v44  ;;  %v893_v47 = vpop.xlane.xlu0 %892  ;;  %1155 = vst.msk [vmem:[#allocation5 + $0x10] sm:$0xff] %vm1120_vm1, %v3749_v60  ;;  %1156 = vst.msk [vmem:[#allocation5 + $0x18] sm:$0xff] %vm1120_vm1, %v3749_v60 }
 0x1d3   : > { %v913_v48 = vmul.f32 0.03125, %v896_v46  ;;  %v912_v49 = vmul.f32 0.03125, %v893_v47  ;;  %v942_v41 = vmul.f32 %v4164_v39, %v4164_v39  ;;  %v943_v54 = vmul.f32 %v4161_v21, %v4161_v21  ;;  %1157 = vst.msk [vmem:[#allocation5 + $0x20] sm:$0xff] %vm1120_vm1, %v3749_v60  ;;  %1158 = vst.msk [vmem:[#allocation5 + $0x28] sm:$0xff] %vm1120_vm1, %v3749_v60 }
 0x1d4   : > { %1159 = vst.msk [vmem:[#allocation5 + $0x30] sm:$0xff] %vm1120_vm1, %v3749_v60  ;;  %1160 = vst.msk [vmem:[#allocation5 + $0x38] sm:$0xff] %vm1120_vm1, %v3749_v60 }
 0x1d5   : > { %v4172_v3 = vsub.f32 %v4083_v34, %v913_v48  ;;  %v4175_v29 = vsub.f32 %v4085_v35, %v912_v49  ;;  %v982_v13 = vsel %vm583_vm0, %v942_v41, 0.0  ;;  %v985_v57 = vsel %vm583_vm0, %v943_v54, 0.0  ;;  %1161 = vst.msk [vmem:[#allocation5 + $0x40] sm:$0xff] %vm1120_vm1, %v3749_v60  ;;  %1162 = vst.msk [vmem:[#allocation5 + $0x48] sm:$0xff] %vm1120_vm1, %v3749_v60  ;;  %v4262_v49 = vld [vmem:[%s6150_s6] ss:$0 sm:$0xff] }
 0x1d6   : > { %962 = vadd.xlane.f32.xlu1 %v961_v9  ;;  %983 = vadd.xlane.f32.xlu0 %v982_v13  ;;  %1163 = vst.msk [vmem:[#allocation5 + $0x50] sm:$0xff] %vm1120_vm1, %v3749_v60  ;;  %1164 = vst.msk [vmem:[#allocation5 + $0x58] sm:$0xff] %vm1120_vm1, %v3749_v60 }
 0x1d7   : > { %v944_v38 = vmul.f32 %v4175_v29, %v4175_v29  ;;  %v945_v34 = vmul.f32 %v4172_v3, %v4172_v3  ;;  %1165 = vst.msk [vmem:[#allocation5 + $0x60] sm:$0xff] %vm1120_vm1, %v3749_v60  ;;  %1166 = vst.msk [vmem:[#allocation5 + $0x68] sm:$0xff] %vm1120_vm1, %v3749_v60 }
 0x1d8   : > { %1167 = vst.msk [vmem:[#allocation5 + $0x70] sm:$0xff] %vm1120_vm1, %v3749_v60  ;;  %1168 = vst.msk [vmem:[#allocation5 + $0x78] sm:$0xff] %vm1120_vm1, %v3749_v60 }
 0x1d9   : > { %v988_v58 = vsel %vm583_vm0, %v944_v38, 0.0  ;;  %v991_v35 = vsel %vm583_vm0, %v945_v34, 0.0  ;;  %1169 = vst.msk [vmem:[#allocation6] sm:$0xff] %vm1120_vm1, %v3750_v62  ;;  %1170 = vst.msk [vmem:[#allocation6 + $0x8] sm:$0xff] %vm1120_vm1, %v3750_v62 }
 0x1da   : > { %986 = vadd.xlane.f32.xlu1 %v985_v57  ;;  %989 = vadd.xlane.f32.xlu0 %v988_v58  ;;  %1171 = vst.msk [vmem:[#allocation6 + $0x10] sm:$0xff] %vm1120_vm1, %v3750_v62  ;;  %1172 = vst.msk [vmem:[#allocation6 + $0x18] sm:$0xff] %vm1120_vm1, %v3750_v62 }
 0x1db   : > { %1173 = vst.msk [vmem:[#allocation6 + $0x20] sm:$0xff] %vm1120_vm1, %v3750_v62  ;;  %1174 = vst.msk [vmem:[#allocation6 + $0x28] sm:$0xff] %vm1120_vm1, %v3750_v62 }
 0x1dc   : > { %1175 = vst.msk [vmem:[#allocation6 + $0x30] sm:$0xff] %vm1120_vm1, %v3750_v62  ;;  %1176 = vst.msk [vmem:[#allocation6 + $0x38] sm:$0xff] %vm1120_vm1, %v3750_v62 }
 0x1dd   : > { %1177 = vst.msk [vmem:[#allocation6 + $0x40] sm:$0xff] %vm1120_vm1, %v3750_v62  ;;  %1178 = vst.msk [vmem:[#allocation6 + $0x48] sm:$0xff] %vm1120_vm1, %v3750_v62 }
 0x1de   : > { %992 = vadd.xlane.f32.xlu1 %v991_v35  ;;  %1179 = vst.msk [vmem:[#allocation6 + $0x50] sm:$0xff] %vm1120_vm1, %v3750_v62  ;;  %1180 = vst.msk [vmem:[#allocation6 + $0x58] sm:$0xff] %vm1120_vm1, %v3750_v62 }
 0x1df   : > { %1181 = vst.msk [vmem:[#allocation6 + $0x60] sm:$0xff] %vm1120_vm1, %v3750_v62  ;;  %1182 = vst.msk [vmem:[#allocation6 + $0x68] sm:$0xff] %vm1120_vm1, %v3750_v62 }
 0x1e0   : > { %1183 = vst.msk [vmem:[#allocation6 + $0x70] sm:$0xff] %vm1120_vm1, %v3750_v62  ;;  %1184 = vst.msk [vmem:[#allocation6 + $0x78] sm:$0xff] %vm1120_vm1, %v3750_v62 }
 0x24b   : > { %v954_v63 = vpop.xlane.xlu0 %953 }
 0x24c   : > { %v996_v0 = vmul.f32 0.03125, %v954_v63 }
 0x24e   : > { %v1012_v8 = vadd.f32 1e-12, %v996_v0 }
 0x24f   : > { %v957_v11 = vpop.xlane.xlu1 %956  ;;  %v978_v14 = vpop.xlane.xlu0 %977 }
 0x250   : > { %3470 = vrsqrt.f32 %v1012_v8  ;;  %v997_v61 = vmul.f32 0.03125, %v957_v11  ;;  %v1004_v53 = vmul.f32 0.03125, %v978_v14 }
 0x252   : > { %v1013_v15 = vadd.f32 1e-12, %v997_v61  ;;  %v1020_v17 = vadd.f32 1e-12, %v1004_v53 }
 0x253   : > { %v981_v19 = vpop.xlane.xlu1 %980  ;;  %v948_v22 = vpop.xlane.xlu0 %947 }
 0x254   : > { %3472 = vrsqrt.f32 %v1013_v15  ;;  %v1005_v24 = vmul.f32 0.03125, %v981_v19  ;;  %v994_v25 = vmul.f32 0.03125, %v948_v22 }
 0x255   : > { %3474 = vrsqrt.f32 %v1020_v17 }
 0x256   : > { %v1021_v51 = vadd.f32 1e-12, %v1005_v24  ;;  %v1010_v26 = vadd.f32 1e-12, %v994_v25 }
 0x257   : > { %v951_v5 = vpop.xlane.xlu1 %950  ;;  %v972_v27 = vpop.xlane.xlu0 %971 }
 0x258   : > { %3476 = vrsqrt.f32 %v1021_v51  ;;  %v995_v28 = vmul.f32 0.03125, %v951_v5  ;;  %v1002_v32 = vmul.f32 0.03125, %v972_v27 }
 0x259   : > { %3478 = vrsqrt.f32 %v1010_v26 }
 0x25a   : > { %v3471_v33 = vpop.eup %3470  ;;  %v1011_v23 = vadd.f32 1e-12, %v995_v28  ;;  %v1018_v10 = vadd.f32 1e-12, %v1002_v32 }
 0x25b   : > { %v1044_v30 = vmul.f32 %v3471_v33, %v4095_v43  ;;  %v975_v18 = vpop.xlane.xlu1 %974  ;;  %v966_v31 = vpop.xlane.xlu0 %965 }
 0x25c   : > { %3480 = vrsqrt.f32 %v1011_v23  ;;  %v1003_v16 = vmul.f32 0.03125, %v975_v18  ;;  %v1000_v1 = vmul.f32 0.03125, %v966_v31 }
 0x25d   : > { %3482 = vrsqrt.f32 %v1018_v10  ;;  %v1067_v46 = vmul.f32 %v4255_v36, %v1044_v30 }
 0x25e   : > { %v3473_v37 = vpop.eup %3472  ;;  %v1019_v56 = vadd.f32 1e-12, %v1003_v16  ;;  %v1016_v40 = vadd.f32 1e-12, %v1000_v1 }
 0x25f   : > { %v3475_v44 = vpop.eup %3474  ;;  %v1045_v47 = vmul.f32 %v3473_v37, %v4103_v52  ;;  %v969_v43 = vpop.xlane.xlu1 %968  ;;  %v1090_v52 = vadd.f32 %v4262_v49, %v1067_v46 }
 0x260   : > { %v960_v48 = vpop.xlane.xlu0 %959  ;;  %v1052_v41 = vmul.f32 %v3475_v44, %v4092_v42  ;;  %3484 = vrsqrt.f32 %v1019_v56  ;;  %v1001_v9 = vmul.f32 0.03125, %v969_v43 }
 0x261   : > { %v998_v13 = vmul.f32 0.03125, %v960_v48  ;;  %v1068_v54 = vmul.f32 %v4255_v36, %v1045_v47  ;;  %3486 = vrsqrt.f32 %v1016_v40 }
 0x262   : > { %v3477_v38 = vpop.eup %3476  ;;  %v1017_v57 = vadd.f32 1e-12, %v1001_v9  ;;  %v1075_v2 = vmul.f32 %v4255_v36, %v1052_v41 }
 0x263   : > { %v1014_v58 = vadd.f32 1e-12, %v998_v13  ;;  %v3479_v34 = vpop.eup %3478  ;;  %v1091_v35 = vadd.f32 %v4262_v49, %v1068_v54  ;;  %v1053_v60 = vmul.f32 %v3477_v38, %v4113_v59  ;;  %v963_v62 = vpop.xlane.xlu1 %962 }
 0x264   : > { %v984_v42 = vpop.xlane.xlu0 %983  ;;  %v1042_v63 = vmul.f32 %v3479_v34, %v4100_v50  ;;  %3488 = vrsqrt.f32 %v1017_v57  ;;  %v999_v0 = vmul.f32 0.03125, %v963_v62  ;;  %v1098_v59 = vadd.f32 %v4262_v49, %v1075_v2 }
 0x265   : > { %v1105_v8 = vpack.c.bf16 %v1091_v35, %v1090_v52  ;;  %v1076_v11 = vmul.f32 %v4255_v36, %v1053_v60  ;;  %3490 = vrsqrt.f32 %v1014_v58  ;;  %v1006_v14 = vmul.f32 0.03125, %v984_v42 }
 0x266   : > { %v3481_v61 = vpop.eup %3480  ;;  %v1065_v53 = vmul.f32 %v4255_v36, %v1042_v63  ;;  %v1015_v15 = vadd.f32 1e-12, %v999_v0 }
 0x267   : > { %v3483_v17 = vpop.eup %3482  ;;  %1113 = vst.msk [vmem:[#allocation2 + $0x8] sm:$0xff] %vm583_vm0, %v1105_v8  ;;  %v1099_v19 = vadd.f32 %v4262_v49, %v1076_v11  ;;  %v1043_v50 = vmul.f32 %v3481_v61, %v4127_v45  ;;  %v1022_v22 = vadd.f32 1e-12, %v1006_v14  ;;  %v987_v24 = vpop.xlane.xlu1 %986 }
 0x268   : > { %v990_v25 = vpop.xlane.xlu0 %989  ;;  %v1050_v51 = vmul.f32 %v3483_v17, %v4116_v20  ;;  %3492 = vrsqrt.f32 %v1015_v15  ;;  %v1007_v26 = vmul.f32 0.03125, %v987_v24  ;;  %v1088_v33 = vadd.f32 %v4262_v49, %v1065_v53 }
 0x269   : > { %v1109_v5 = vpack.c.bf16 %v1099_v19, %v1098_v59  ;;  %v1066_v27 = vmul.f32 %v4255_v36, %v1043_v50  ;;  %3494 = vrsqrt.f32 %v1022_v22  ;;  %v1008_v28 = vmul.f32 0.03125, %v990_v25 }
 0x26a   : > { %v3485_v32 = vpop.eup %3484  ;;  %v1023_v23 = vadd.f32 1e-12, %v1007_v26  ;;  %v1073_v30 = vmul.f32 %v4255_v36, %v1050_v51 }
 0x26b   : > { %v3487_v10 = vpop.eup %3486  ;;  %1117 = vst.msk [vmem:[#allocation2 + $0x28] sm:$0xff] %vm583_vm0, %v1109_v5  ;;  %v1089_v45 = vadd.f32 %v4262_v49, %v1066_v27  ;;  %v1051_v20 = vmul.f32 %v3485_v32, %v4124_v4  ;;  %v1024_v18 = vadd.f32 1e-12, %v1008_v28  ;;  %v993_v31 = vpop.xlane.xlu1 %992 }
 0x26c   : > { %v1048_v16 = vmul.f32 %v3487_v10, %v4140_v6  ;;  %3496 = vrsqrt.f32 %v1023_v23  ;;  %v1009_v1 = vmul.f32 0.03125, %v993_v31  ;;  %v1096_v47 = vadd.f32 %v4262_v49, %v1073_v30 }
 0x26d   : > { %v1104_v37 = vpack.c.bf16 %v1089_v45, %v1088_v33  ;;  %v1074_v56 = vmul.f32 %v4255_v36, %v1051_v20  ;;  %3498 = vrsqrt.f32 %v1024_v18 }
 0x26e   : > { %v3489_v40 = vpop.eup %3488  ;;  %v1025_v44 = vadd.f32 1e-12, %v1009_v1  ;;  %v1071_v4 = vmul.f32 %v4255_v36, %v1048_v16 }
 0x26f   : > { %v3491_v46 = vpop.eup %3490  ;;  %1112 = vst.msk [vmem:[#allocation2] sm:$0xff] %vm583_vm0, %v1104_v37  ;;  %v1097_v43 = vadd.f32 %v4262_v49, %v1074_v56  ;;  %v1049_v48 = vmul.f32 %v3489_v40, %v4137_v55 }
 0x270   : > { %v1046_v6 = vmul.f32 %v3491_v46, %v4151_v12  ;;  %3500 = vrsqrt.f32 %v1025_v44  ;;  %v1094_v38 = vadd.f32 %v4262_v49, %v1071_v4 }
 0x271   : > { %v1108_v41 = vpack.c.bf16 %v1097_v43, %v1096_v47  ;;  %v1072_v9 = vmul.f32 %v4255_v36, %v1049_v48 }
 0x272   : > { %v3493_v13 = vpop.eup %3492  ;;  %v1069_v58 = vmul.f32 %v4255_v36, %v1046_v6 }
 0x273   : > { %v3495_v54 = vpop.eup %3494  ;;  %1116 = vst.msk [vmem:[#allocation2 + $0x20] sm:$0xff] %vm583_vm0, %v1108_v41  ;;  %v1095_v57 = vadd.f32 %v4262_v49, %v1072_v9  ;;  %v1047_v34 = vmul.f32 %v3493_v13, %v4148_v7 }
 0x274   : > { %v1054_v55 = vmul.f32 %v3495_v54, %v4164_v39  ;;  %v1092_v60 = vadd.f32 %v4262_v49, %v1069_v58 }
 0x275   : > { %v1107_v52 = vpack.c.bf16 %v1095_v57, %v1094_v38  ;;  %v1070_v12 = vmul.f32 %v4255_v36, %v1047_v34 }
 0x276   : > { %v3497_v35 = vpop.eup %3496  ;;  %v1077_v42 = vmul.f32 %v4255_v36, %v1054_v55 }
 0x277   : > { %v3499_v2 = vpop.eup %3498  ;;  %1115 = vst.msk [vmem:[#allocation2 + $0x18] sm:$0xff] %vm583_vm0, %v1107_v52  ;;  %v1093_v62 = vadd.f32 %v4262_v49, %v1070_v12  ;;  %v1055_v63 = vmul.f32 %v3497_v35, %v4161_v21 }
 0x278   : > { %v1056_v0 = vmul.f32 %v3499_v2, %v4175_v29  ;;  %v1100_v11 = vadd.f32 %v4262_v49, %v1077_v42 }
 0x279   : > { %v1106_v7 = vpack.c.bf16 %v1093_v62, %v1092_v60  ;;  %v1078_v39 = vmul.f32 %v4255_v36, %v1055_v63 }
 0x27a   : > { %v3501_v8 = vpop.eup %3500  ;;  %v1079_v61 = vmul.f32 %v4255_v36, %v1056_v0 }
 0x27b   : > { %1114 = vst.msk [vmem:[#allocation2 + $0x10] sm:$0xff] %vm583_vm0, %v1106_v7  ;;  %v1101_v14 = vadd.f32 %v4262_v49, %v1078_v39  ;;  %v1057_v53 = vmul.f32 %v3501_v8, %v4172_v3 }
 0x27c   : > { %v1102_v21 = vadd.f32 %v4262_v49, %v1079_v61 }
 0x27d   : > { %v1110_v15 = vpack.c.bf16 %v1101_v14, %v1100_v11  ;;  %v1080_v17 = vmul.f32 %v4255_v36, %v1057_v53 }
 0x27f   : > { %1118 = vst.msk [vmem:[#allocation2 + $0x30] sm:$0xff] %vm583_vm0, %v1110_v15  ;;  %v1103_v29 = vadd.f32 %v4262_v49, %v1080_v17 }
 0x281   : > { %v1111_v59 = vpack.c.bf16 %v1103_v29, %v1102_v21 }
 0x283   : > { %1119 = vst.msk [vmem:[#allocation2 + $0x38] sm:$0xff] %vm583_vm0, %v1111_v59 }
 0x284 PF: > { %p3317_p13 = scmp.le.s32.totalorder %s3856_s21, 0 }
 0x286   : > { %1187 = sbr.rel (%p3317_p13) target bundleno = 1708 (0x6ac), region = 83 }
 0x28d   : > { %v3504_v3 = vld [vmem:[%s3870_s28 + $0x4] ss:$16 sps:$4 sm:$0xff]   ;;  %v3506_v36 = vld [vmem:[%s3870_s28 + $0xc] ss:$16 sps:$4 sm:$0xff]   ;;  %v3751_v19 = vmov 0   ;;  %s3342_s13 = sshll.u32 %s3738_s17, 9  ;;  %v1206_v63 = vlaneseq }
 0x28e   : > { %1323 = vmatprep.mubr.bf16.mxu0 %v3751_v19  ;;  %1436 = vmatprep.mubr.bf16.mxu1 %v3751_v19  ;;  %v3508_v49 = vld [vmem:[%s3870_s28] ss:$16 sps:$4 sm:$0xff]   ;;  %v3509_v50 = vld [vmem:[%s3870_s28 + $0x8] ss:$16 sps:$4 sm:$0xff]   ;;  %v3510_v22 = vld [vmem:[%s3870_s28 + $0x24] ss:$16 sps:$4 sm:$0xff]   ;;  %v4331_v26 = vstv %s3342_s13 }
 0x28f   : > { %1291 = vmatprep.subr.bf16.mxu0 %v3504_v3  ;;  %3502 = vset.pattern.permute.xlu0 %v3751_v19  ;;  %v3512_v24 = vld [vmem:[%s3870_s28 + $0x2c] ss:$16 sps:$4 sm:$0xff]   ;;  %v3514_v25 = vld [vmem:[%s3870_s28 + $0x20] ss:$16 sps:$4 sm:$0xff]   ;;  %v3515_v51 = vld [vmem:[%s3870_s28 + $0x28] ss:$16 sps:$4 sm:$0xff]  }
 0x290   : > { %1404 = vmatprep.subr.bf16.mxu1 %v3506_v36  ;;  %3503 = vset.pattern.permute.xlu1 %v3751_v19  ;;  %6321 = vst [vmem:[#allocation10_spill] sm:$0xff] %v4331_v26  ;;  %v1188_v5 = vld [vmem:[#allocation2] sm:$0xff]  ;;  %vm1266_vm2 = vcmask 261120   ;;  %v1518_v32 = vld [vmem:[%s6145_s1 + $0x8] sm:$0xff]  ;;  %v1519_v33 = vld [vmem:[%s6145_s1 + $0x10] sm:$0xff]  ;;  %v1207_v0 = vshrl.u32 %v1206_v63, 7 }
 0x291   : > { %1292 = vmatpush1.bf16.msra.mxu0 %v3508_v49  ;;  %1405 = vmatpush1.bf16.msra.mxu1 %v3509_v50  ;;  %v1517_v27 = vld [vmem:[%s6145_s1] sm:$0xff]  ;;  %v1558_v23 = vsub.s32 %v1519_v33, %v4331_v26  ;;  %v1520_v10 = vld [vmem:[%s6145_s1 + $0x18] sm:$0xff]  ;;  %v1557_v45 = vsub.s32 %v1518_v32, %v4331_v26  ;;  %v1522_v18 = vld [vmem:[%s6145_s1 + $0x28] sm:$0xff]  ;;  %v4427_v7 = vand.u32 127, %v1206_v63 }
 0x292   : > { %1293 = vmatprep.subr.bf16.mxu0 %v3510_v22  ;;  %1406 = vmatprep.subr.bf16.mxu1 %v3512_v24  ;;  %v1556_v28 = vsub.s32 %v1517_v27, %v4331_v26  ;;  %v1559_v30 = vsub.s32 %v1520_v10, %v4331_v26  ;;  %v1521_v20 = vld [vmem:[%s6145_s1 + $0x20] sm:$0xff]  ;;  %v1189_v31 = vld [vmem:[#allocation2 + $0x8] sm:$0xff]  ;;  %v1561_v1 = vsub.s32 %v1522_v18, %v4331_v26  ;;  %v1523_v37 = vld [vmem:[%s6145_s1 + $0x30] sm:$0xff]  ;;  %v1208_v8 = vsub.s32 0, %v1207_v0 }
 0x293   : > { %1579 = vperm.xlu1 %3503, %v1558_v23   ;;  %v1560_v16 = vsub.s32 %v1521_v20, %v4331_v26  ;;  %v1524_v56 = vld [vmem:[%s6145_s1 + $0x38] sm:$0xff]  ;;  %v1562_v40 = vsub.s32 %v1523_v37, %v4331_v26  ;;  %v1525_v46 = vld [vmem:[%s6145_s1 + $0x40] sm:$0xff]  ;;  %v1526_v47 = vld [vmem:[%s6145_s1 + $0x48] sm:$0xff]  ;;  %v1216_v11 = vsub.s32 2, %v1207_v0  ;;  %v1212_v53 = vsub.s32 1, %v1207_v0 }
 0x294   : > { %1573 = vperm.xlu0 %3502, %v1556_v28   ;;  %v1563_v44 = vsub.s32 %v1524_v56, %v4331_v26  ;;  %v1190_v43 = vld [vmem:[#allocation2 + $0x10] sm:$0xff]  ;;  %v1564_v4 = vsub.s32 %v1525_v46, %v4331_v26  ;;  %v1565_v48 = vsub.s32 %v1526_v47, %v4331_v26  ;;  %v1528_v41 = vld [vmem:[%s6145_s1 + $0x58] sm:$0xff]  ;;  %v1529_v54 = vld [vmem:[%s6145_s1 + $0x60] sm:$0xff]  ;;  %v1220_v15 = vsub.s32 3, %v1207_v0 }
 0x295   : > { %1294 = vmatpush1.bf16.msra.mxu0 %v3514_v25  ;;  %1407 = vmatpush1.bf16.msra.mxu1 %v3515_v51  ;;  %v1527_v6 = vld [vmem:[%s6145_s1 + $0x50] sm:$0xff]  ;;  %v1567_v13 = vsub.s32 %v1528_v41, %v4331_v26  ;;  %v1530_v38 = vld [vmem:[%s6145_s1 + $0x68] sm:$0xff]  ;;  %v1191_v57 = vld [vmem:[#allocation2 + $0x18] sm:$0xff]  ;;  %v1568_v58 = vsub.s32 %v1529_v54, %v4331_v26  ;;  %v4439_v17 = vadd.s32 128, %v4427_v7  ;;  %v4442_v21 = vadd.s32 256, %v4427_v7 }
 0x296   : > { %v1566_v9 = vsub.s32 %v1527_v6, %v4331_v26  ;;  %v1569_v34 = vsub.s32 %v1530_v38, %v4331_v26  ;;  %v1531_v55 = vld [vmem:[%s6145_s1 + $0x70] sm:$0xff]  ;;  %v1532_v52 = vld [vmem:[%s6145_s1 + $0x78] sm:$0xff]  ;;  %v1192_v2 = vld [vmem:[#allocation2 + $0x20] sm:$0xff]  ;;  %v4445_v29 = vadd.s32 384, %v4427_v7 }
 0x297   : > { %1582 = vperm.xlu1 %3503, %v1559_v30   ;;  %v1570_v12 = vsub.s32 %v1531_v55, %v4331_v26  ;;  %v1571_v35 = vsub.s32 %v1532_v52, %v4331_v26  ;;  %v1193_v60 = vld [vmem:[#allocation2 + $0x28] sm:$0xff]  ;;  %v1194_v62 = vld [vmem:[#allocation2 + $0x30] sm:$0xff]  ;;  %v1195_v42 = vld [vmem:[#allocation2 + $0x38] sm:$0xff] }
 0x298   : > { %3326 = vmatmul.mubr.msk.bf16.vlgmr.msra.gmra.mrb[0].mxu0 %vm1266_vm2, %v1188_v5  ;;  %3334 = vmatmul.mubr.msk.bf16.vlgmr.msra.gmra.mrb[0].mxu1 %vm1266_vm2, %v1188_v5  ;;  %v1204_v61 = vld [vmem:[%s480_s15] sm:$0xf] }
 0x299   : > { %1333 = vmatprep.mubr.bf16.mxu0 %v3751_v19  ;;  %1446 = vmatprep.mubr.bf16.mxu1 %v3751_v19  ;;  %v4447_v59 = vrot.slane %v1204_v61, %v1208_v8  ;;  %v4449_v3 = vrot.slane %v1204_v61, %v1216_v11  ;;  %v4451_v36 = vrot.slane %v1204_v61, %v1212_v53 }
 0x29a   : > { %1576 = vperm.xlu0 %3502, %v1557_v45   ;;  %v4455_v49 = vrot.slane %v1204_v61, %v1220_v15 }
 0x29b   : > { %1588 = vperm.xlu1 %3503, %v1561_v1  }
 0x29e   : > { %1585 = vperm.xlu0 %3502, %v1560_v16  }
 0x29f   : > { %1594 = vperm.xlu1 %3503, %v1563_v44  }
 0x2a0   : > { %3327 = vmatmul.mubr.msk.bf16.gmra.mrb[4].mxu0 %vm1266_vm2, %v1189_v31  ;;  %3335 = vmatmul.mubr.msk.bf16.gmra.mrb[4].mxu1 %vm1266_vm2, %v1189_v31 }
 0x2a1   : > { %1343 = vmatprep.mubr.bf16.mxu0 %v3751_v19  ;;  %1456 = vmatprep.mubr.bf16.mxu1 %v3751_v19 }
 0x2a2   : > { %1591 = vperm.xlu0 %3502, %v1562_v40  }
 0x2a3   : > { %1600 = vperm.xlu1 %3503, %v1565_v48  }
 0x2a6   : > { %1597 = vperm.xlu0 %3502, %v1564_v4  }
 0x2a7   : > { %1606 = vperm.xlu1 %3503, %v1567_v13  }
 0x2a8   : > { %3328 = vmatmul.mubr.msk.bf16.gmra.mrb[8].mxu0 %vm1266_vm2, %v1190_v43  ;;  %3336 = vmatmul.mubr.msk.bf16.gmra.mrb[8].mxu1 %vm1266_vm2, %v1190_v43 }
 0x2a9   : > { %1353 = vmatprep.mubr.bf16.mxu0 %v3751_v19  ;;  %1466 = vmatprep.mubr.bf16.mxu1 %v3751_v19 }
 0x2aa   : > { %1603 = vperm.xlu0 %3502, %v1566_v9  }
 0x2ab   : > { %1612 = vperm.xlu1 %3503, %v1569_v34  }
 0x2ae   : > { %1609 = vperm.xlu0 %3502, %v1568_v58  }
 0x2af   : > { %1618 = vperm.xlu1 %3503, %v1571_v35  }
 0x2b0   : > { %3329 = vmatmul.mubr.msk.bf16.gmra.mrb[12].mxu0 %vm1266_vm2, %v1191_v57  ;;  %3337 = vmatmul.mubr.msk.bf16.gmra.mrb[12].mxu1 %vm1266_vm2, %v1191_v57 }
 0x2b1   : > { %1363 = vmatprep.mubr.bf16.mxu0 %v3751_v19  ;;  %1476 = vmatprep.mubr.bf16.mxu1 %v3751_v19 }
 0x2b2   : > { %1615 = vperm.xlu0 %3502, %v1570_v12  }
 0x2b8   : > { %3330 = vmatmul.mubr.msk.bf16.gmra.mrb[16].mxu0 %vm1266_vm2, %v1192_v2  ;;  %3338 = vmatmul.mubr.msk.bf16.gmra.mrb[16].mxu1 %vm1266_vm2, %v1192_v2 }
 0x2b9   : > { %1373 = vmatprep.mubr.bf16.mxu0 %v3751_v19  ;;  %1486 = vmatprep.mubr.bf16.mxu1 %v3751_v19 }
 0x2c0   : > { %3331 = vmatmul.mubr.msk.bf16.gmra.mrb[20].mxu0 %vm1266_vm2, %v1193_v60  ;;  %3339 = vmatmul.mubr.msk.bf16.gmra.mrb[20].mxu1 %vm1266_vm2, %v1193_v60 }
 0x2c1   : > { %1383 = vmatprep.mubr.bf16.mxu0 %v3751_v19  ;;  %1496 = vmatprep.mubr.bf16.mxu1 %v3751_v19 }
 0x2c8   : > { %3332 = vmatmul.mubr.msk.bf16.gmra.mrb[24].mxu0 %vm1266_vm2, %v1194_v62  ;;  %3340 = vmatmul.mubr.msk.bf16.gmra.mrb[24].mxu1 %vm1266_vm2, %v1194_v62 }
 0x2c9   : > { %1393 = vmatprep.mubr.bf16.mxu0 %v3751_v19  ;;  %1506 = vmatprep.mubr.bf16.mxu1 %v3751_v19 }
 0x2d0   : > { %3333 = vmatmul.mubr.msk.bf16.gmra.mrb[28].mxu0 %vm1266_vm2, %v1195_v42  ;;  %3341 = vmatmul.mubr.msk.bf16.gmra.mrb[28].mxu1 %vm1266_vm2, %v1195_v42 }
 0x312   : > { %v4431_v14 = vpop.permute.xlu1 %1579 }
 0x313   : > { %v4429_v39 = vpop.permute.xlu0 %1573  ;;  %vm1628_vm7 = vcmp.eq.s32.totalorder %v4427_v7, %v4431_v14  ;;  %vm1629_vm8 = vcmp.eq.s32.totalorder %v4439_v17, %v4431_v14  ;;  %vm1630_vm11 = vcmp.eq.s32.totalorder %v4442_v21, %v4431_v14  ;;  %vm1631_vm14 = vcmp.eq.s32.totalorder %v4445_v29, %v4431_v14 }
 0x314   : > { %vm1620_vm3 = vcmp.eq.s32.totalorder %v4427_v7, %v4429_v39  ;;  %vm1621_vm4 = vcmp.eq.s32.totalorder %v4439_v17, %v4429_v39  ;;  %vm1622_vm5 = vcmp.eq.s32.totalorder %v4442_v21, %v4429_v39  ;;  %vm1623_vm6 = vcmp.eq.s32.totalorder %v4445_v29, %v4429_v39 }
 0x316   : > { %v4457_v50 = vpop.permute.xlu1 %1582 }
 0x317   : > { %vm1632_vm15 = vcmp.eq.s32.totalorder %v4427_v7, %v4457_v50  ;;  %vm1633_vm0 = vcmp.eq.s32.totalorder %v4439_v17, %v4457_v50  ;;  %vm1634_vm1 = vcmp.eq.s32.totalorder %v4442_v21, %v4457_v50 }
 0x319   : > { %v4453_v19 = vpop.permute.xlu0 %1576 }
 0x31a   : > { %vm1624_vm9 = vcmp.eq.s32.totalorder %v4427_v7, %v4453_v19  ;;  %vm1625_vm10 = vcmp.eq.s32.totalorder %v4439_v17, %v4453_v19  ;;  %vm1626_vm12 = vcmp.eq.s32.totalorder %v4442_v21, %v4453_v19  ;;  %vm1627_vm13 = vcmp.eq.s32.totalorder %v4445_v29, %v4453_v19  ;;  %v4534_v41 = vpop.permute.xlu1 %1588 }
 0x31d   : > { %v4532_v4 = vpop.permute.xlu0 %1585 }
 0x31e   : > { %vm1636_vm2 = vcmp.eq.s32.totalorder %v4427_v7, %v4532_v4 }
 0x36b   : > { %v1325_v22 = vpop.f32.mrb[0].mxu0  ;;  %v1438_v24 = vpop.f32.mrb[0].mxu1 }
 0x36c   : > { %v4468_v25 = vadd.f32 %v1325_v22, %v4447_v59  ;;  %v4471_v51 = vadd.f32 %v1438_v24, %v4449_v3  ;;  %v1327_v5 = vpop.f32.mrb[1].mxu0  ;;  %v1440_v27 = vpop.f32.mrb[1].mxu1 }
 0x36d   : > { %v4478_v28 = vadd.f32 %v1327_v5, %v4451_v36  ;;  %v1329_v32 = vpop.f32.mrb[2].mxu0  ;;  %v1442_v33 = vpop.f32.mrb[2].mxu1  ;;  %v4487_v23 = vadd.f32 %v1440_v27, %v4455_v49 }
 0x36e   : > { %6322 = vst [vmem:[#allocation11_spill] sm:$0xff] %v4468_v25  ;;  %6323 = vst [vmem:[#allocation12_spill] sm:$0xff] %v4471_v51  ;;  %v4490_v10 = vadd.f32 %v1329_v32, %v4447_v59  ;;  %v1331_v45 = vpop.f32.mrb[3].mxu0  ;;  %v1444_v30 = vpop.f32.mrb[3].mxu1  ;;  %v1684_v20 = vsel %vm1620_vm3, %v4468_v25, 0.0  ;;  %v4499_v18 = vadd.f32 %v1442_v33, %v4449_v3  ;;  %v1686_v37 = vsel %vm1622_vm5, %v4471_v51, 0.0 }
 0x36f   : > { %6324 = vst [vmem:[#allocation13_spill] sm:$0xff] %v4478_v28  ;;  %6325 = vst [vmem:[#allocation14_spill] sm:$0xff] %v4487_v23  ;;  %v4502_v31 = vadd.f32 %v1331_v45, %v4451_v36  ;;  %v1861_v16 = vmax.f32 %v4468_v25, %v4478_v28  ;;  %v1685_v1 = vsel %vm1621_vm4, %v4478_v28, 0.0  ;;  %v4523_v44 = vadd.f32 %v1444_v30, %v4455_v49 }
 0x370   : > { %v1748_v56 = vadd.f32 %v1685_v1, %v1684_v20  ;;  %v1688_v40 = vsel %vm1624_vm9, %v4490_v10, 0.0  ;;  %v1687_v38 = vsel %vm1623_vm6, %v4487_v23, 0.0  ;;  %v1690_v57 = vsel %vm1626_vm12, %v4499_v18, 0.0 }
 0x371   : > { %v1862_v46 = vmax.f32 %v1861_v16, %v4471_v51  ;;  %v1689_v47 = vsel %vm1625_vm10, %v4502_v31, 0.0  ;;  %v1866_v43 = vmax.f32 %v4490_v10, %v4502_v31  ;;  %v1691_v63 = vsel %vm1627_vm13, %v4523_v44, 0.0  ;;  %v4609_v16 = vpop.permute.xlu0 %1591 }
 0x372   : > { %v1749_v48 = vadd.f32 %v1748_v56, %v1686_v37  ;;  %v1753_v6 = vadd.f32 %v1689_v47, %v1688_v40  ;;  %vm1637_vm3 = vcmp.eq.s32.totalorder %v4439_v17, %v4532_v4  ;;  %vm1635_vm4 = vcmp.eq.s32.totalorder %v4445_v29, %v4457_v50  ;;  %v4613_v56 = vpop.permute.xlu1 %1594 }
 0x373   : > { %v1335_v9 = vpop.f32.mrb[4].mxu0  ;;  %v1448_v13 = vpop.f32.mrb[4].mxu1  ;;  %v1863_v54 = vmax.f32 %v1862_v46, %v4487_v23  ;;  %v1867_v58 = vmax.f32 %v1866_v43, %v4499_v18  ;;  %vm1638_vm5 = vcmp.eq.s32.totalorder %v4442_v21, %v4532_v4  ;;  %vm1640_vm6 = vcmp.eq.s32.totalorder %v4427_v7, %v4534_v41 }
 0x374   : > { %v4551_v34 = vadd.f32 %v1335_v9, %v4447_v59  ;;  %v4554_v55 = vadd.f32 %v1448_v13, %v4449_v3  ;;  %v1337_v52 = vpop.f32.mrb[5].mxu0  ;;  %v1450_v12 = vpop.f32.mrb[5].mxu1  ;;  %v1750_v35 = vadd.f32 %v1749_v48, %v1687_v38  ;;  %v1754_v2 = vadd.f32 %v1753_v6, %v1690_v57 }
 0x375   : > { %v4557_v60 = vadd.f32 %v1337_v52, %v4451_v36  ;;  %v1339_v62 = vpop.f32.mrb[6].mxu0  ;;  %v1452_v42 = vpop.f32.mrb[6].mxu1  ;;  %1864 = vmax.xlane.f32.xlu1 %v1863_v54  ;;  %v4577_v53 = vadd.f32 %v1450_v12, %v4455_v49  ;;  %v1868_v24 = vmax.f32 %v1867_v58, %v4523_v44  ;;  %vm1642_vm9 = vcmp.eq.s32.totalorder %v4442_v21, %v4534_v41 }
 0x376   : > { %6326 = vst [vmem:[#allocation15_spill] sm:$0xff] %v4551_v34  ;;  %v4568_v0 = vadd.f32 %v1339_v62, %v4447_v59  ;;  %v1341_v39 = vpop.f32.mrb[7].mxu0  ;;  %v1454_v8 = vpop.f32.mrb[7].mxu1  ;;  %1751 = vadd.xlane.f32.xlu0 %v1750_v35  ;;  %v1755_v11 = vadd.f32 %v1754_v2, %v1691_v63  ;;  %v1692_v61 = vsel %vm1628_vm7, %v4551_v34, 0.0  ;;  %v1694_v5 = vsel %vm1630_vm11, %v4554_v55, 0.0 }
 0x377   : > { %6327 = vst [vmem:[#allocation16_spill] sm:$0xff] %v4557_v60  ;;  %v4580_v15 = vadd.f32 %v1341_v39, %v4451_v36  ;;  %v1871_v19 = vmax.f32 %v4551_v34, %v4557_v60  ;;  %v1693_v22 = vsel %vm1629_vm8, %v4557_v60, 0.0  ;;  %v4600_v33 = vadd.f32 %v1452_v42, %v4449_v3 }
 0x378   : > { %v1758_v27 = vadd.f32 %v1693_v22, %v1692_v61  ;;  %v1696_v32 = vsel %vm1632_vm15, %v4568_v0, 0.0  ;;  %v1695_v43 = vsel %vm1631_vm14, %v4577_v53, 0.0  ;;  %vm1639_vm7 = vcmp.eq.s32.totalorder %v4445_v29, %v4532_v4 }
 0x379   : > { %1756 = vadd.xlane.f32.xlu1 %v1755_v11  ;;  %v1872_v45 = vmax.f32 %v1871_v19, %v4554_v55  ;;  %v1876_v30 = vmax.f32 %v4568_v0, %v4580_v15  ;;  %v1697_v20 = vsel %vm1633_vm0, %v4580_v15, 0.0  ;;  %vm1641_vm8 = vcmp.eq.s32.totalorder %v4439_v17, %v4534_v41 }
 0x37a   : > { %1869 = vmax.xlane.f32.xlu0 %v1868_v24  ;;  %v1759_v1 = vadd.f32 %v1758_v27, %v1694_v5  ;;  %v1763_v37 = vadd.f32 %v1697_v20, %v1696_v32  ;;  %vm1643_vm10 = vcmp.eq.s32.totalorder %v4445_v29, %v4534_v41  ;;  %v1698_v52 = vsel %vm1634_vm1, %v4600_v33, 0.0  ;;  %v4695_v20 = vpop.permute.xlu0 %1597 }
 0x37b   : > { %v1345_v40 = vpop.f32.mrb[8].mxu0  ;;  %v1458_v46 = vpop.f32.mrb[8].mxu1  ;;  %v1873_v47 = vmax.f32 %v1872_v45, %v4577_v53  ;;  %v1877_v54 = vmax.f32 %v1876_v30, %v4600_v33  ;;  %vm1644_vm11 = vcmp.eq.s32.totalorder %v4427_v7, %v4609_v16  ;;  %vm1648_vm12 = vcmp.eq.s32.totalorder %v4427_v7, %v4613_v56 }
 0x37c   : > { %v4629_v48 = vadd.f32 %v1345_v40, %v4447_v59  ;;  %v1347_v6 = vpop.f32.mrb[9].mxu0  ;;  %v1460_v9 = vpop.f32.mrb[9].mxu1  ;;  %v1760_v13 = vadd.f32 %v1759_v1, %v1695_v43  ;;  %v4635_v14 = vadd.f32 %v1458_v46, %v4449_v3  ;;  %v4649_v12 = vadd.f32 %v1454_v8, %v4455_v49 }
 0x37d   : > { %v4638_v38 = vadd.f32 %v1347_v6, %v4451_v36  ;;  %1874 = vmax.xlane.f32.xlu1 %v1873_v47  ;;  %v1349_v57 = vpop.f32.mrb[10].mxu0  ;;  %v1462_v58 = vpop.f32.mrb[10].mxu1  ;;  %v1764_v42 = vadd.f32 %v1763_v37, %v1698_v52  ;;  %vm1645_vm13 = vcmp.eq.s32.totalorder %v4439_v17, %v4609_v16  ;;  %vm1649_vm14 = vcmp.eq.s32.totalorder %v4439_v17, %v4613_v56 }
 0x37e   : > { %1761 = vadd.xlane.f32.xlu0 %v1760_v13  ;;  %v4652_v35 = vadd.f32 %v1349_v57, %v4447_v59  ;;  %v1351_v2 = vpop.f32.mrb[11].mxu0  ;;  %v1464_v62 = vpop.f32.mrb[11].mxu1  ;;  %v1700_v63 = vsel %vm1636_vm2, %v4629_v48, 0.0  ;;  %v4666_v8 = vadd.f32 %v1462_v58, %v4449_v3  ;;  %v4675_v19 = vadd.f32 %v1460_v9, %v4455_v49 }
 0x37f   : > { %v4663_v39 = vadd.f32 %v1351_v2, %v4451_v36  ;;  %v1881_v11 = vmax.f32 %v4629_v48, %v4638_v38  ;;  %v1701_v61 = vsel %vm1637_vm3, %v4638_v38, 0.0  ;;  %v1878_v22 = vmax.f32 %v1877_v54, %v4649_v12  ;;  %v4700_v46 = vpop.permute.xlu1 %1600 }
 0x380   : > { %6328 = vst [vmem:[#allocation17_spill] sm:$0xff] %v4652_v35  ;;  %6330 = vst [vmem:[#allocation19_spill] sm:$0xff] %v4666_v8  ;;  %v1768_v24 = vadd.f32 %v1701_v61, %v1700_v63  ;;  %v1704_v5 = vsel %vm1640_vm6, %v4652_v35, 0.0  ;;  %vm1646_vm15 = vcmp.eq.s32.totalorder %v4442_v21, %v4609_v16  ;;  %v1702_v32 = vsel %vm1638_vm5, %v4635_v14, 0.0 }
 0x381   : > { %6329 = vst [vmem:[#allocation18_spill] sm:$0xff] %v4663_v39  ;;  %v1882_v27 = vmax.f32 %v1881_v11, %v4635_v14  ;;  %v1886_v45 = vmax.f32 %v4652_v35, %v4663_v39  ;;  %v1705_v30 = vsel %vm1641_vm8, %v4663_v39, 0.0  ;;  %v4698_v1 = vadd.f32 %v1464_v62, %v4455_v49 }
 0x382   : > { %1879 = vmax.xlane.f32.xlu0 %v1878_v22  ;;  %v1769_v37 = vadd.f32 %v1768_v24, %v1702_v32  ;;  %v1773_v40 = vadd.f32 %v1705_v30, %v1704_v5  ;;  %vm1650_vm0 = vcmp.eq.s32.totalorder %v4442_v21, %v4613_v56  ;;  %v1699_v9 = vsel %vm1635_vm4, %v4649_v12, 0.0 }
 0x383   : > { %6331 = vst [vmem:[#allocation20_spill] sm:$0xff] %v4698_v1  ;;  %v1355_v47 = vpop.f32.mrb[12].mxu0  ;;  %v1468_v43 = vpop.f32.mrb[12].mxu1  ;;  %v1883_v6 = vmax.f32 %v1882_v27, %v4675_v19  ;;  %v1887_v13 = vmax.f32 %v1886_v45, %v4666_v8  ;;  %v1706_v54 = vsel %vm1642_vm9, %v4666_v8, 0.0  ;;  %vm1647_vm1 = vcmp.eq.s32.totalorder %v4445_v29, %v4609_v16 }
 0x384   : > { %v4717_v57 = vadd.f32 %v1355_v47, %v4447_v59  ;;  %v1357_v58 = vpop.f32.mrb[13].mxu0  ;;  %v1470_v52 = vpop.f32.mrb[13].mxu1  ;;  %v1765_v2 = vadd.f32 %v1764_v42, %v1699_v9  ;;  %v1703_v50 = vsel %vm1639_vm7, %v4675_v19, 0.0  ;;  %vm1651_vm2 = vcmp.eq.s32.totalorder %v4445_v29, %v4613_v56 }
 0x385   : > { %v4726_v62 = vadd.f32 %v1468_v43, %v4449_v3  ;;  %v4729_v63 = vadd.f32 %v1357_v58, %v4451_v36  ;;  %1884 = vmax.xlane.f32.xlu1 %v1883_v6  ;;  %v1359_v11 = vpop.f32.mrb[14].mxu0  ;;  %v1472_v61 = vpop.f32.mrb[14].mxu1  ;;  %v1770_v22 = vadd.f32 %v1769_v37, %v1703_v50  ;;  %v1707_v42 = vsel %vm1643_vm10, %v4698_v1, 0.0 }
 0x386   : > { %6332 = vst [vmem:[#allocation21_spill] sm:$0xff] %v4717_v57  ;;  %vm1652_vm3 = vcmp.eq.s32.totalorder %v4427_v7, %v4695_v20  ;;  %1766 = vadd.xlane.f32.xlu0 %v1765_v2  ;;  %v4738_v4 = vadd.f32 %v1359_v11, %v4447_v59  ;;  %v1361_v24 = vpop.f32.mrb[15].mxu0  ;;  %v1474_v5 = vpop.f32.mrb[15].mxu1  ;;  %v1888_v27 = vmax.f32 %v1887_v13, %v4698_v1  ;;  %v1708_v45 = vsel %vm1644_vm11, %v4717_v57, 0.0 }
 0x387   : > { %6333 = vst [vmem:[#allocation22_spill] sm:$0xff] %v4726_v62  ;;  %6334 = vst [vmem:[#allocation23_spill] sm:$0xff] %v4729_v63  ;;  %v1774_v32 = vadd.f32 %v1773_v40, %v1706_v54  ;;  %vm1653_vm4 = vcmp.eq.s32.totalorder %v4439_v17, %v4695_v20  ;;  %v4748_v41 = vadd.f32 %v1361_v24, %v4451_v36  ;;  %v1709_v40 = vsel %vm1645_vm13, %v4729_v63, 0.0 }
 0x388   : > { %6335 = vst [vmem:[#allocation24_spill] sm:$0xff] %v4738_v4  ;;  %v4751_v30 = vadd.f32 %v1472_v61, %v4449_v3  ;;  %v1891_v37 = vmax.f32 %v4717_v57, %v4729_v63  ;;  %v4760_v47 = vadd.f32 %v1470_v52, %v4455_v49  ;;  %v1778_v43 = vadd.f32 %v1709_v40, %v1708_v45  ;;  %v4781_v52 = vpop.permute.xlu0 %1603 }
 0x389   : > { %6336 = vst [vmem:[#allocation25_spill] sm:$0xff] %v4748_v41  ;;  %v1712_v6 = vsel %vm1648_vm12, %v4738_v4, 0.0  ;;  %vm1654_vm5 = vcmp.eq.s32.totalorder %v4442_v21, %v4695_v20  ;;  %vm1656_vm6 = vcmp.eq.s32.totalorder %v4427_v7, %v4700_v46  ;;  %1771 = vadd.xlane.f32.xlu1 %v1770_v22  ;;  %v1710_v13 = vsel %vm1646_vm15, %v4726_v62, 0.0  ;;  %v4786_v22 = vpop.permute.xlu1 %1606 }
 0x38a   : > { %6337 = vst [vmem:[#allocation26_spill] sm:$0xff] %v4751_v30  ;;  %6338 = vst [vmem:[#allocation27_spill] sm:$0xff] %v4760_v47  ;;  %v1892_v9 = vmax.f32 %v1891_v37, %v4726_v62  ;;  %v1896_v54 = vmax.f32 %v4738_v4, %v4748_v41  ;;  %v1713_v58 = vsel %vm1649_vm14, %v4748_v41, 0.0  ;;  %v4784_v2 = vadd.f32 %v1474_v5, %v4455_v49 }
 0x38b   : > { %1889 = vmax.xlane.f32.xlu0 %v1888_v27  ;;  %v1775_v50 = vadd.f32 %v1774_v32, %v1707_v42  ;;  %v1779_v11 = vadd.f32 %v1778_v43, %v1710_v13  ;;  %v1783_v61 = vadd.f32 %v1713_v58, %v1712_v6  ;;  %v1365_v24 = vpop.f32.mrb[16].mxu0  ;;  %v1478_v45 = vpop.f32.mrb[16].mxu1  ;;  %v1714_v26 = vsel %vm1650_vm0, %v4751_v30, 0.0 }
 0x38c   : > { %6339 = vst [vmem:[#allocation28_spill] sm:$0xff] %v4784_v2  ;;  %v1893_v37 = vmax.f32 %v1892_v9, %v4760_v47  ;;  %v1897_v40 = vmax.f32 %v1896_v54, %v4751_v30  ;;  %vm1655_vm7 = vcmp.eq.s32.totalorder %v4445_v29, %v4695_v20  ;;  %vm1657_vm8 = vcmp.eq.s32.totalorder %v4439_v17, %v4700_v46  ;;  %v1367_v5 = vpop.f32.mrb[17].mxu0  ;;  %v1480_v27 = vpop.f32.mrb[17].mxu1 }
 0x38d   : > { %v4799_v42 = vadd.f32 %v1365_v24, %v4447_v59  ;;  %v1711_v32 = vsel %vm1647_vm1, %v4760_v47, 0.0  ;;  %vm1658_vm9 = vcmp.eq.s32.totalorder %v4442_v21, %v4700_v46  ;;  %vm1659_vm10 = vcmp.eq.s32.totalorder %v4445_v29, %v4700_v46  ;;  %v1369_v9 = vpop.f32.mrb[18].mxu0  ;;  %v1482_v13 = vpop.f32.mrb[18].mxu1 }
 0x38e   : > { %v4810_v43 = vadd.f32 %v1478_v45, %v4449_v3  ;;  %v4813_v6 = vadd.f32 %v1367_v5, %v4451_v36  ;;  %1894 = vmax.xlane.f32.xlu1 %v1893_v37  ;;  %v1780_v54 = vadd.f32 %v1779_v11, %v1711_v32  ;;  %v1715_v16 = vsel %vm1651_vm2, %v4784_v2, 0.0  ;;  %v1371_v24 = vpop.f32.mrb[19].mxu0  ;;  %v1484_v45 = vpop.f32.mrb[19].mxu1 }
 0x38f   : > { %6340 = vst [vmem:[#allocation29_spill] sm:$0xff] %v4799_v42  ;;  %vm1660_vm11 = vcmp.eq.s32.totalorder %v4427_v7, %v4781_v52  ;;  %1776 = vadd.xlane.f32.xlu0 %v1775_v50  ;;  %v4822_v58 = vadd.f32 %v1369_v9, %v4447_v59  ;;  %v1898_v5 = vmax.f32 %v1897_v40, %v4784_v2  ;;  %v1716_v11 = vsel %vm1652_vm3, %v4799_v42, 0.0  ;;  %v4870_v41 = vpop.permute.xlu1 %1612 }
 0x390   : > { %6341 = vst [vmem:[#allocation30_spill] sm:$0xff] %v4810_v43  ;;  %6342 = vst [vmem:[#allocation31_spill] sm:$0xff] %v4813_v6  ;;  %v1784_v37 = vadd.f32 %v1783_v61, %v1714_v26  ;;  %vm1661_vm12 = vcmp.eq.s32.totalorder %v4439_v17, %v4781_v52  ;;  %v4832_v56 = vadd.f32 %v1371_v24, %v4451_v36  ;;  %v1717_v26 = vsel %vm1653_vm4, %v4813_v6, 0.0 }
 0x391   : > { %6343 = vst [vmem:[#allocation32_spill] sm:$0xff] %v4822_v58  ;;  %v4835_v50 = vadd.f32 %v1482_v13, %v4449_v3  ;;  %v1901_v32 = vmax.f32 %v4799_v42, %v4813_v6  ;;  %v4844_v61 = vadd.f32 %v1480_v27, %v4455_v49  ;;  %v1788_v40 = vadd.f32 %v1717_v26, %v1716_v11  ;;  %v4865_v26 = vpop.permute.xlu0 %1609 }
 0x392   : > { %6344 = vst [vmem:[#allocation33_spill] sm:$0xff] %v4832_v56  ;;  %v1720_v9 = vsel %vm1656_vm6, %v4822_v58, 0.0  ;;  %vm1662_vm13 = vcmp.eq.s32.totalorder %v4442_v21, %v4781_v52  ;;  %vm1664_vm14 = vcmp.eq.s32.totalorder %v4427_v7, %v4786_v22  ;;  %1781 = vadd.xlane.f32.xlu1 %v1780_v54  ;;  %v1718_v27 = vsel %vm1654_vm5, %v4810_v43, 0.0 }
 0x393   : > { %6345 = vst [vmem:[#allocation34_spill] sm:$0xff] %v4835_v50  ;;  %6346 = vst [vmem:[#allocation35_spill] sm:$0xff] %v4844_v61  ;;  %v1902_v13 = vmax.f32 %v1901_v32, %v4810_v43  ;;  %v1906_v24 = vmax.f32 %v4822_v58, %v4832_v56  ;;  %v1721_v11 = vsel %vm1657_vm8, %v4832_v56, 0.0  ;;  %v4868_v2 = vadd.f32 %v1484_v45, %v4455_v49  ;;  %v1375_v4 = vpop.f32.mrb[20].mxu0  ;;  %v1488_v47 = vpop.f32.mrb[20].mxu1 }
 0x394   : > { %1899 = vmax.xlane.f32.xlu0 %v1898_v5  ;;  %v1785_v54 = vadd.f32 %v1784_v37, %v1715_v16  ;;  %v1789_v32 = vadd.f32 %v1788_v40, %v1718_v27  ;;  %v1793_v30 = vadd.f32 %v1721_v11, %v1720_v9  ;;  %v1722_v56 = vsel %vm1658_vm9, %v4835_v50, 0.0  ;;  %v1377_v45 = vpop.f32.mrb[21].mxu0  ;;  %v1490_v5 = vpop.f32.mrb[21].mxu1 }
 0x395   : > { %6347 = vst [vmem:[#allocation36_spill] sm:$0xff] %v4868_v2  ;;  %v1903_v58 = vmax.f32 %v1902_v13, %v4844_v61  ;;  %v1907_v1 = vmax.f32 %v1906_v24, %v4835_v50  ;;  %vm1663_vm15 = vcmp.eq.s32.totalorder %v4445_v29, %v4781_v52  ;;  %vm1665_vm0 = vcmp.eq.s32.totalorder %v4439_v17, %v4786_v22  ;;  %v1492_v13 = vpop.f32.mrb[22].mxu1 }
 0x396   : > { %v4883_v16 = vadd.f32 %v1375_v4, %v4447_v59  ;;  %v1719_v37 = vsel %vm1655_vm7, %v4844_v61, 0.0  ;;  %vm1666_vm1 = vcmp.eq.s32.totalorder %v4442_v21, %v4786_v22  ;;  %vm1667_vm2 = vcmp.eq.s32.totalorder %v4445_v29, %v4786_v22  ;;  %v1379_v4 = vpop.f32.mrb[22].mxu0  ;;  %v1494_v11 = vpop.f32.mrb[23].mxu1 }
 0x397   : > { %v4894_v40 = vadd.f32 %v1488_v47, %v4449_v3  ;;  %v4897_v9 = vadd.f32 %v1377_v45, %v4451_v36  ;;  %1904 = vmax.xlane.f32.xlu1 %v1903_v58  ;;  %v1790_v27 = vadd.f32 %v1789_v32, %v1719_v37  ;;  %v1723_v20 = vsel %vm1659_vm10, %v4868_v2, 0.0  ;;  %v1381_v47 = vpop.f32.mrb[23].mxu0 }
 0x398   : > { %6348 = vst [vmem:[#allocation37_spill] sm:$0xff] %v4883_v16  ;;  %vm1668_vm3 = vcmp.eq.s32.totalorder %v4427_v7, %v4865_v26  ;;  %1786 = vadd.xlane.f32.xlu0 %v1785_v54  ;;  %v4906_v24 = vadd.f32 %v1379_v4, %v4447_v59  ;;  %v1908_v45 = vmax.f32 %v1907_v1, %v4868_v2  ;;  %v1724_v46 = vsel %vm1660_vm11, %v4883_v16, 0.0 }
 0x399   : > { %6349 = vst [vmem:[#allocation38_spill] sm:$0xff] %v4894_v40  ;;  %6350 = vst [vmem:[#allocation39_spill] sm:$0xff] %v4897_v9  ;;  %v1794_v58 = vadd.f32 %v1793_v30, %v1722_v56  ;;  %vm1672_vm4 = vcmp.eq.s32.totalorder %v4427_v7, %v4870_v41  ;;  %vm1673_vm5 = vcmp.eq.s32.totalorder %v4439_v17, %v4870_v41  ;;  %v1725_v30 = vsel %vm1661_vm12, %v4897_v9, 0.0 }
 0x39a   : > { %6351 = vst [vmem:[#allocation40_spill] sm:$0xff] %v4906_v24  ;;  %v4918_v54 = vadd.f32 %v1381_v47, %v4451_v36  ;;  %v4921_v32 = vadd.f32 %v1492_v13, %v4449_v3  ;;  %v1911_v1 = vmax.f32 %v4883_v16, %v4897_v9  ;;  %v4930_v56 = vadd.f32 %v1490_v5, %v4455_v49 }
 0x39b   : > { %v1798_v37 = vadd.f32 %v1725_v30, %v1724_v46  ;;  %v1728_v4 = vsel %vm1664_vm14, %v4906_v24, 0.0  ;;  %vm1669_vm6 = vcmp.eq.s32.totalorder %v4439_v17, %v4865_v26  ;;  %1791 = vadd.xlane.f32.xlu1 %v1790_v27  ;;  %v1726_v47 = vsel %vm1662_vm13, %v4894_v40, 0.0  ;;  %v1385_v50 = vpop.f32.mrb[24].mxu0  ;;  %v1498_v62 = vpop.f32.mrb[24].mxu1 }
 0x39c   : > { %6352 = vst [vmem:[#allocation41_spill] sm:$0xff] %v4918_v54  ;;  %6353 = vst [vmem:[#allocation42_spill] sm:$0xff] %v4921_v32  ;;  %v1912_v13 = vmax.f32 %v1911_v1, %v4894_v40  ;;  %v1916_v5 = vmax.f32 %v4906_v24, %v4918_v54  ;;  %v1729_v46 = vsel %vm1665_vm0, %v4918_v54, 0.0  ;;  %v4950_v30 = vadd.f32 %v1494_v11, %v4455_v49 }
 0x39d   : > { %6354 = vst [vmem:[#allocation43_spill] sm:$0xff] %v4930_v56  ;;  %1909 = vmax.xlane.f32.xlu0 %v1908_v45  ;;  %v1795_v27 = vadd.f32 %v1794_v58, %v1723_v20  ;;  %v1799_v2 = vadd.f32 %v1798_v37, %v1726_v47  ;;  %v1803_v1 = vadd.f32 %v1729_v46, %v1728_v4  ;;  %v1730_v57 = vsel %vm1666_vm1, %v4921_v32, 0.0  ;;  %v1387_v20 = vpop.f32.mrb[25].mxu0  ;;  %v1500_v45 = vpop.f32.mrb[25].mxu1 }
 0x39e   : > { %6355 = vst [vmem:[#allocation44_spill] sm:$0xff] %v4950_v30  ;;  %v1913_v8 = vmax.f32 %v1912_v13, %v4930_v56  ;;  %v1917_v63 = vmax.f32 %v1916_v5, %v4921_v32  ;;  %vm1670_vm7 = vcmp.eq.s32.totalorder %v4442_v21, %v4865_v26  ;;  %v4961_v11 = vadd.f32 %v1385_v50, %v4447_v59  ;;  %v1389_v50 = vpop.f32.mrb[26].mxu0  ;;  %v1502_v13 = vpop.f32.mrb[26].mxu1 }
 0x39f   : > { %v1727_v58 = vsel %vm1663_vm15, %v4930_v56, 0.0  ;;  %vm1671_vm8 = vcmp.eq.s32.totalorder %v4445_v29, %v4865_v26  ;;  %vm1674_vm9 = vcmp.eq.s32.totalorder %v4442_v21, %v4870_v41  ;;  %v4972_v37 = vadd.f32 %v1498_v62, %v4449_v3  ;;  %v1391_v46 = vpop.f32.mrb[27].mxu0  ;;  %v1504_v39 = vpop.f32.mrb[27].mxu1 }
 0x3a0   : > { %6356 = vst [vmem:[#allocation45_spill] sm:$0xff] %v4961_v11  ;;  %v4975_v4 = vadd.f32 %v1387_v20, %v4451_v36  ;;  %1914 = vmax.xlane.f32.xlu1 %v1913_v8  ;;  %v1800_v47 = vadd.f32 %v1799_v2, %v1727_v58  ;;  %v1731_v52 = vsel %vm1667_vm2, %v4950_v30, 0.0  ;;  %v4982_v5 = vadd.f32 %v1389_v50, %v4447_v59 }
 0x3a1   : > { %6357 = vst [vmem:[#allocation46_spill] sm:$0xff] %v4972_v37  ;;  %1796 = vadd.xlane.f32.xlu0 %v1795_v27  ;;  %v1918_v62 = vmax.f32 %v1917_v63, %v4950_v30  ;;  %v1804_v35 = vadd.f32 %v1803_v1, %v1730_v57  ;;  %v1732_v8 = vsel %vm1668_vm3, %v4961_v11, 0.0  ;;  %v4990_v2 = vadd.f32 %v1391_v46, %v4451_v36  ;;  %v4995_v27 = vpop.permute.xlu1 %1618  ;;  %v5003_v63 = vpop.permute.xlu0 %1615 }
 0x3a2   : > { %6358 = vst [vmem:[#allocation47_spill] sm:$0xff] %v4975_v4  ;;  %6359 = vst [vmem:[#allocation48_spill] sm:$0xff] %v4982_v5  ;;  %v4993_v22 = vadd.f32 %v1502_v13, %v4449_v3  ;;  %v1921_v20 = vmax.f32 %v4961_v11, %v4975_v4  ;;  %v1733_v57 = vsel %vm1669_vm6, %v4975_v4, 0.0  ;;  %v5006_v1 = vadd.f32 %v1500_v45, %v4455_v49 }
 0x3a3   : > { %6360 = vst [vmem:[#allocation49_spill] sm:$0xff] %v4990_v2  ;;  %v5009_v58 = vadd.f32 %v1504_v39, %v4455_v49  ;;  %v1808_v50 = vadd.f32 %v1733_v57, %v1732_v8  ;;  %vm1675_vm10 = vcmp.eq.s32.totalorder %v4445_v29, %v4870_v41  ;;  %v1926_v46 = vmax.f32 %v4982_v5, %v4990_v2  ;;  %v1395_v8 = vpop.f32.mrb[28].mxu0 }
 0x3a4   : > { %6361 = vst [vmem:[#allocation50_spill] sm:$0xff] %v4993_v22  ;;  %6362 = vst [vmem:[#allocation51_spill] sm:$0xff] %v5006_v1  ;;  %1801 = vadd.xlane.f32.xlu1 %v1800_v47  ;;  %v1922_v13 = vmax.f32 %v1921_v20, %v4972_v37  ;;  %v1736_v4 = vsel %vm1672_vm4, %v4982_v5, 0.0  ;;  %v1737_v39 = vsel %vm1673_vm5, %v4990_v2, 0.0  ;;  %vm1680_vm11 = vcmp.eq.s32.totalorder %v4427_v7, %v4995_v27  ;;  %v1508_v20 = vpop.f32.mrb[28].mxu1  ;;  %v1397_v5 = vpop.f32.mrb[29].mxu0 }
 0x3a5   : > { %6363 = vst [vmem:[#allocation52_spill] sm:$0xff] %v5009_v58  ;;  %1919 = vmax.xlane.f32.xlu0 %v1918_v62  ;;  %vm1681_vm12 = vcmp.eq.s32.totalorder %v4439_v17, %v4995_v27  ;;  %v1805_v45 = vadd.f32 %v1804_v35, %v1731_v52  ;;  %v1734_v47 = vsel %vm1670_vm7, %v4972_v37, 0.0  ;;  %v1927_v2 = vmax.f32 %v1926_v46, %v4993_v22  ;;  %v1510_v35 = vpop.f32.mrb[29].mxu1 }
 0x3a6   : > { %v1923_v57 = vmax.f32 %v1922_v13, %v5006_v1  ;;  %v1809_v11 = vadd.f32 %v1808_v50, %v1734_v47  ;;  %vm1676_vm13 = vcmp.eq.s32.totalorder %v4427_v7, %v5003_v63  ;;  %v5037_v62 = vadd.f32 %v1395_v8, %v4447_v59  ;;  %v1399_v50 = vpop.f32.mrb[30].mxu0  ;;  %v1512_v46 = vpop.f32.mrb[30].mxu1 }
 0x3a7   : > { %v1813_v52 = vadd.f32 %v1737_v39, %v1736_v4  ;;  %vm1677_vm14 = vcmp.eq.s32.totalorder %v4439_v17, %v5003_v63  ;;  %vm1678_vm15 = vcmp.eq.s32.totalorder %v4442_v21, %v5003_v63  ;;  %v5044_v13 = vadd.f32 %v1397_v5, %v4451_v36  ;;  %v1514_v37 = vpop.f32.mrb[31].mxu1 }
 0x3a8   : > { %6364 = vst [vmem:[#allocation53_spill] sm:$0xff] %v5037_v62  ;;  %1924 = vmax.xlane.f32.xlu1 %v1923_v57  ;;  %v1735_v47 = vsel %vm1671_vm8, %v5006_v1, 0.0  ;;  %v1738_v4 = vsel %vm1674_vm9, %v4993_v22, 0.0  ;;  %v1739_v39 = vsel %vm1675_vm10, %v5009_v58, 0.0  ;;  %v5059_v5 = vadd.f32 %v1508_v20, %v4449_v3  ;;  %v1401_v57 = vpop.f32.mrb[31].mxu0 }
 0x3a9   : > { %6365 = vst [vmem:[#allocation54_spill] sm:$0xff] %v5044_v13  ;;  %v5062_v8 = vadd.f32 %v1399_v50, %v4447_v59  ;;  %1806 = vadd.xlane.f32.xlu0 %v1805_v45  ;;  %v1928_v26 = vmax.f32 %v1927_v2, %v5009_v58  ;;  %v1740_v1 = vsel %vm1676_vm13, %v5037_v62, 0.0  ;;  %v5070_v22 = vadd.f32 %v1401_v57, %v4451_v36 }
 0x3aa   : > { %6366 = vst [vmem:[#allocation55_spill] sm:$0xff] %v5059_v5  ;;  %v1810_v41 = vadd.f32 %v1809_v11, %v1735_v47  ;;  %v1931_v20 = vmax.f32 %v5037_v62, %v5044_v13  ;;  %v1741_v59 = vsel %vm1677_vm14, %v5044_v13, 0.0  ;;  %v5079_v45 = vadd.f32 %v1510_v35, %v4455_v49  ;;  %v5238_v62 = vld [vmem:[#allocation3 + $0x50] sm:$0xff] }
 0x3ab   : > { %6367 = vst [vmem:[#allocation56_spill] sm:$0xff] %v5062_v8  ;;  %6368 = vst [vmem:[#allocation57_spill] sm:$0xff] %v5070_v22  ;;  %v5082_v2 = vadd.f32 %v1512_v46, %v4449_v3  ;;  %v1814_v50 = vadd.f32 %v1813_v52, %v1738_v4  ;;  %v1818_v58 = vadd.f32 %v1741_v59, %v1740_v1  ;;  %v1744_v47 = vsel %vm1680_vm11, %v5062_v8, 0.0 }
 0x3ac   : > { %6369 = vst [vmem:[#allocation58_spill] sm:$0xff] %v5079_v45  ;;  %1811 = vadd.xlane.f32.xlu1 %v1810_v41  ;;  %v1932_v36 = vmax.f32 %v1931_v20, %v5059_v5  ;;  %v1936_v11 = vmax.f32 %v5062_v8, %v5070_v22  ;;  %v1745_v35 = vsel %vm1681_vm12, %v5070_v22, 0.0  ;;  %v1742_v3 = vsel %vm1678_vm15, %v5059_v5, 0.0  ;;  %v5186_v5 = vld [vmem:[#allocation3 + $0x30] sm:$0xff]  ;;  %6400 = vst [vmem:[#allocation89_spill] sm:$0xff] %v5238_v62 }
 0x3ad   : > { %6370 = vst [vmem:[#allocation59_spill] sm:$0xff] %v5082_v2  ;;  %1929 = vmax.xlane.f32.xlu0 %v1928_v26  ;;  %v1819_v52 = vadd.f32 %v1818_v58, %v1742_v3  ;;  %v5102_v4 = vadd.f32 %v1514_v37, %v4455_v49  ;;  %v1815_v57 = vadd.f32 %v1814_v50, %v1739_v39  ;;  %v5114_v39 = vld [vmem:[#allocation3] sm:$0xff]  ;;  %vm1844_vm3 = vcmask 7168   ;;  %v1539_v3 = vld [vmem:[#allocation5 + $0x8] sm:$0xff]  ;;  %6389 = vst [vmem:[#allocation78_spill] sm:$0xff] %v5186_v5 }
 0x3ae   : > { %v1933_v1 = vmax.f32 %v1932_v36, %v5079_v45  ;;  %v1937_v46 = vmax.f32 %v1936_v11, %v5082_v2  ;;  %vm1682_vm0 = vcmp.eq.s32.totalorder %v4442_v21, %v4995_v27  ;;  %v1823_v41 = vadd.f32 %v1745_v35, %v1744_v47  ;;  %6372 = vst [vmem:[#allocation61_spill] sm:$0xff] %v5114_v39 }
 0x3af   : > { %6371 = vst [vmem:[#allocation60_spill] sm:$0xff] %v5102_v4  ;;  %vm1679_vm1 = vcmp.eq.s32.totalorder %v4445_v29, %v5003_v63  ;;  %v1746_v59 = vsel %vm1682_vm0, %v5082_v2, 0.0  ;;  %vm1683_vm2 = vcmp.eq.s32.totalorder %v4445_v29, %v4995_v27  ;;  %v1538_v63 = vld [vmem:[#allocation5] sm:$0xff]  ;;  %v5179_v27 = vld [vmem:[#allocation3 + $0x28] sm:$0xff] }
 0x3b0   : > { %1934 = vmax.xlane.f32.xlu1 %v1933_v1  ;;  %v1743_v26 = vsel %vm1679_vm1, %v5079_v45, 0.0  ;;  %v1938_v20 = vmax.f32 %v1937_v46, %v5102_v4  ;;  %v1824_v36 = vadd.f32 %v1823_v41, %v1746_v59  ;;  %v1747_v49 = vsel %vm1683_vm2, %v5102_v4, 0.0  ;;  %v5127_v1 = vld [vmem:[#allocation3 + $0x8] sm:$0xff]  ;;  %6387 = vst [vmem:[#allocation76_spill] sm:$0xff] %v5179_v27 }
 0x3b1   : > { %1816 = vadd.xlane.f32.xlu0 %v1815_v57  ;;  %v1820_v58 = vadd.f32 %v1819_v52, %v1743_v26  ;;  %6375 = vst [vmem:[#allocation64_spill] sm:$0xff] %v5127_v1  ;;  %v5138_v26 = vld [vmem:[#allocation3 + $0x10] sm:$0xff] }
 0x3b2   : > { %v1825_v37 = vadd.f32 %v1824_v36, %v1747_v49  ;;  %6378 = vst [vmem:[#allocation67_spill] sm:$0xff] %v5138_v26 }
 0x3b4   : > { %1821 = vadd.xlane.f32.xlu1 %v1820_v58 }
 0x3b5   : > { %1939 = vmax.xlane.f32.xlu0 %v1938_v20  ;;  %v1540_v20 = vld [vmem:[#allocation5 + $0x10] sm:$0xff] }
 0x3b9   : > { %1826 = vadd.xlane.f32.xlu0 %v1825_v37  ;;  %v5153_v37 = vld [vmem:[#allocation3 + $0x18] sm:$0xff] }
 0x3ba   : > { %6381 = vst [vmem:[#allocation70_spill] sm:$0xff] %v5153_v37 }
 0x402   : > { %v5116_v50 = vpop.xlane.xlu1 %1864 }
 0x403   : > { %6373 = vst [vmem:[#allocation62_spill] sm:$0xff] %v5116_v50  ;;  %v1752_v11 = vpop.xlane.xlu0 %1751  ;;  %v5120_v47 = vmax.f32 %v5114_v39, %v5116_v50  ;;  %vm2421_vm4 = vcmp.gt.f32.partialorder %v5116_v50, %v5114_v39  ;;  %vm1941_vm5 = vcmp.eq.f32.partialorder %v4468_v25, %v5116_v50  ;;  %vm1942_vm6 = vcmp.eq.f32.partialorder %v4478_v28, %v5116_v50 }
 0x404   : > { %v1828_v35 = vadd.f32 %v1752_v11, %v1538_v63  ;;  %v5158_v11 = vld [vmem:[#allocation3 + $0x20] sm:$0xff]  ;;  %vm1943_vm8 = vcmp.eq.f32.partialorder %v4471_v51, %v5116_v50  ;;  %vm1944_vm10 = vcmp.eq.f32.partialorder %v4487_v23, %v5116_v50 }
 0x405   : > { %6374 = vst [vmem:[#allocation63_spill] sm:$0xff] %v5120_v47  ;;  %2583 = vperm.xlu1 %3503, %v5120_v47   ;;  %2965 = vst.msk [vmem:[#allocation3] sm:$0xff] %vm1844_vm3, %v5120_v47  ;;  %v2007_v25 = vsel %vm1943_vm8, %v4442_v21, 1073741824  ;;  %v5212_v51 = vld [vmem:[#allocation3 + $0x40] sm:$0xff] }
 0x406   : > { %1845 = vst.msk [vmem:[#allocation5] sm:$0xff] %vm1844_vm3, %v1828_v35  ;;  %v1757_v52 = vpop.xlane.xlu1 %1756  ;;  %6383 = vst [vmem:[#allocation72_spill] sm:$0xff] %v5158_v11 }
 0x407   : > { %v1829_v46 = vadd.f32 %v1757_v52, %v1539_v3  ;;  %v5132_v57 = vpop.xlane.xlu0 %1869  ;;  %v1541_v3 = vld [vmem:[#allocation5 + $0x18] sm:$0xff]  ;;  %6395 = vst [vmem:[#allocation84_spill] sm:$0xff] %v5212_v51 }
 0x408   : > { %6376 = vst [vmem:[#allocation65_spill] sm:$0xff] %v5132_v57  ;;  %v5136_v41 = vmax.f32 %v5127_v1, %v5132_v57 }
 0x409   : > { %1846 = vst.msk [vmem:[#allocation5 + $0x8] sm:$0xff] %vm1844_vm3, %v1829_v46 }
 0x40a   : > { %6377 = vst [vmem:[#allocation66_spill] sm:$0xff] %v5136_v41  ;;  %v5141_v58 = vpop.xlane.xlu1 %1874  ;;  %2588 = vperm.xlu0 %3502, %v5136_v41   ;;  %2966 = vst.msk [vmem:[#allocation3 + $0x8] sm:$0xff] %vm1844_vm3, %v5136_v41 }
 0x40b   : > { %6379 = vst [vmem:[#allocation68_spill] sm:$0xff] %v5141_v58  ;;  %v1762_v59 = vpop.xlane.xlu0 %1761  ;;  %v5148_v36 = vmax.f32 %v5138_v26, %v5141_v58  ;;  %vm1950_vm8 = vcmp.eq.f32.partialorder %v4557_v60, %v5141_v58 }
 0x40c   : > { %v1830_v49 = vadd.f32 %v1762_v59, %v1540_v20 }
 0x40d   : > { %6380 = vst [vmem:[#allocation69_spill] sm:$0xff] %v5148_v36  ;;  %2593 = vperm.xlu1 %3503, %v5148_v36   ;;  %2967 = vst.msk [vmem:[#allocation3 + $0x10] sm:$0xff] %vm1844_vm3, %v5148_v36  ;;  %v2005_v36 = vsel %vm1941_vm5, %v4427_v7, 1073741824  ;;  %vm1945_vm5 = vcmp.eq.f32.partialorder %v4490_v10, %v5132_v57 }
 0x40e   : > { %1847 = vst.msk [vmem:[#allocation5 + $0x10] sm:$0xff] %vm1844_vm3, %v1830_v49  ;;  %v1542_v49 = vld [vmem:[#allocation5 + $0x20] sm:$0xff] }
 0x40f   : > { %v5156_v63 = vpop.xlane.xlu0 %1879 }
 0x410   : > { %6382 = vst [vmem:[#allocation71_spill] sm:$0xff] %v5156_v63  ;;  %v5162_v35 = vmax.f32 %v5153_v37, %v5156_v63 }
 0x412   : > { %6384 = vst [vmem:[#allocation73_spill] sm:$0xff] %v5162_v35  ;;  %v5164_v52 = vpop.xlane.xlu1 %1884  ;;  %2968 = vst.msk [vmem:[#allocation3 + $0x18] sm:$0xff] %vm1844_vm3, %v5162_v35 }
 0x413   : > { %6385 = vst [vmem:[#allocation74_spill] sm:$0xff] %v5164_v52  ;;  %v1767_v46 = vpop.xlane.xlu0 %1766  ;;  %v5170_v20 = vmax.f32 %v5158_v11, %v5164_v52  ;;  %v2006_v11 = vsel %vm1942_vm6, %v4439_v17, 1073741824  ;;  %vm1946_vm6 = vcmp.eq.f32.partialorder %v4502_v31, %v5132_v57 }
 0x414   : > { %v1831_v59 = vadd.f32 %v1767_v46, %v1541_v3  ;;  %v1543_v46 = vld [vmem:[#allocation5 + $0x28] sm:$0xff]  ;;  %vm2069_vm7 = vcmp.lt.s32.totalorder %v2005_v36, %v2006_v11 }
 0x415   : > { %6386 = vst [vmem:[#allocation75_spill] sm:$0xff] %v5170_v20  ;;  %2969 = vst.msk [vmem:[#allocation3 + $0x20] sm:$0xff] %vm1844_vm3, %v5170_v20  ;;  %2603 = vperm.xlu0 %3502, %v5170_v20   ;;  %v2070_v37 = vsel %vm2069_vm7, %v2005_v36, %v2006_v11  ;;  %v1545_v11 = vld [vmem:[#allocation5 + $0x38] sm:$0xff]  ;;  %vm1949_vm7 = vcmp.eq.f32.partialorder %v4551_v34, %v5141_v58 }
 0x416   : > { %1848 = vst.msk [vmem:[#allocation5 + $0x18] sm:$0xff] %vm1844_vm3, %v1831_v59  ;;  %v1772_v47 = vpop.xlane.xlu1 %1771  ;;  %vm2071_vm9 = vcmp.lt.s32.totalorder %v2070_v37, %v2007_v25 }
 0x417   : > { %v1832_v26 = vadd.f32 %v1772_v47, %v1542_v49 }
 0x418   : > { %v5184_v45 = vpop.xlane.xlu0 %1889 }
 0x419   : > { %6388 = vst [vmem:[#allocation77_spill] sm:$0xff] %v5184_v45  ;;  %v5190_v3 = vmax.f32 %v5179_v27, %v5184_v45  ;;  %1849 = vst.msk [vmem:[#allocation5 + $0x20] sm:$0xff] %vm1844_vm3, %v1832_v26  ;;  %v1544_v27 = vld [vmem:[#allocation5 + $0x30] sm:$0xff]  ;;  %v5206_v26 = vld [vmem:[#allocation3 + $0x38] sm:$0xff] }
 0x41a   : > { %6393 = vst [vmem:[#allocation82_spill] sm:$0xff] %v5206_v26 }
 0x41b   : > { %6390 = vst [vmem:[#allocation79_spill] sm:$0xff] %v5190_v3  ;;  %v5193_v20 = vpop.xlane.xlu1 %1894  ;;  %2970 = vst.msk [vmem:[#allocation3 + $0x28] sm:$0xff] %vm1844_vm3, %v5190_v3 }
 0x41c   : > { %6391 = vst [vmem:[#allocation80_spill] sm:$0xff] %v5193_v20  ;;  %v1777_v59 = vpop.xlane.xlu0 %1776  ;;  %v5199_v47 = vmax.f32 %v5186_v5, %v5193_v20 }
 0x41d   : > { %v1833_v49 = vadd.f32 %v1777_v59, %v1543_v46  ;;  %v2072_v59 = vsel %vm2071_vm9, %v2070_v37, %v2007_v25 }
 0x41e   : > { %6392 = vst [vmem:[#allocation81_spill] sm:$0xff] %v5199_v47  ;;  %2971 = vst.msk [vmem:[#allocation3 + $0x30] sm:$0xff] %vm1844_vm3, %v5199_v47  ;;  %2613 = vperm.xlu0 %3502, %v5199_v47   ;;  %v1546_v47 = vld [vmem:[#allocation5 + $0x40] sm:$0xff] }
 0x41f   : > { %1850 = vst.msk [vmem:[#allocation5 + $0x28] sm:$0xff] %vm1844_vm3, %v1833_v49  ;;  %v1782_v28 = vpop.xlane.xlu1 %1781 }
 0x420   : > { %v1834_v5 = vadd.f32 %v1782_v28, %v1544_v27 }
 0x421   : > { %v5210_v13 = vpop.xlane.xlu0 %1899 }
 0x422   : > { %6394 = vst [vmem:[#allocation83_spill] sm:$0xff] %v5210_v13  ;;  %v5216_v36 = vmax.f32 %v5206_v26, %v5210_v13  ;;  %1851 = vst.msk [vmem:[#allocation5 + $0x30] sm:$0xff] %vm1844_vm3, %v1834_v5  ;;  %v2008_v26 = vsel %vm1944_vm10, %v4445_v29, 1073741824  ;;  %vm1947_vm10 = vcmp.eq.f32.partialorder %v4499_v18, %v5132_v57 }
 0x423   : > { %vm2073_vm11 = vcmp.lt.s32.totalorder %v2072_v59, %v2008_v26  ;;  %v2011_v34 = vsel %vm1947_vm10, %v4442_v21, 1073741824 }
 0x424   : > { %6396 = vst [vmem:[#allocation85_spill] sm:$0xff] %v5216_v36  ;;  %v5221_v46 = vpop.xlane.xlu1 %1904  ;;  %2972 = vst.msk [vmem:[#allocation3 + $0x38] sm:$0xff] %vm1844_vm3, %v5216_v36 }
 0x425   : > { %6397 = vst [vmem:[#allocation86_spill] sm:$0xff] %v5221_v46  ;;  %v1787_v28 = vpop.xlane.xlu0 %1786  ;;  %v5227_v27 = vmax.f32 %v5212_v51, %v5221_v46  ;;  %vm1973_vm12 = vcmp.eq.f32.partialorder %v4799_v42, %v5221_v46  ;;  %vm1974_vm13 = vcmp.eq.f32.partialorder %v4813_v6, %v5221_v46  ;;  %vm1975_vm15 = vcmp.eq.f32.partialorder %v4810_v43, %v5221_v46 }
 0x426   : > { %v1835_v49 = vadd.f32 %v1787_v28, %v1545_v11  ;;  %v5240_v11 = vsel %vm2073_vm11, %v2072_v59, %v2008_v26  ;;  %v1547_v28 = vld [vmem:[#allocation5 + $0x48] sm:$0xff]  ;;  %vm1976_vm1 = vcmp.eq.f32.partialorder %v4844_v61, %v5221_v46  ;;  %v1553_v61 = vld [vmem:[#allocation5 + $0x78] sm:$0xff] }
 0x427   : > { %6398 = vst [vmem:[#allocation87_spill] sm:$0xff] %v5227_v27  ;;  %2973 = vst.msk [vmem:[#allocation3 + $0x40] sm:$0xff] %vm1844_vm3, %v5227_v27  ;;  %2623 = vperm.xlu0 %3502, %v5227_v27  }
 0x428   : > { %1852 = vst.msk [vmem:[#allocation5 + $0x38] sm:$0xff] %vm1844_vm3, %v1835_v49  ;;  %v1792_v25 = vpop.xlane.xlu1 %1791  ;;  %6401 = vst [vmem:[#allocation90_spill] sm:$0xff] %v5240_v11  ;;  %v2076_v49 = vshra.s32 %v5240_v11, 16  ;;  %v5285_v11 = vld [vmem:[#allocation3 + $0x70] sm:$0xff] }
 0x429   : > { %v1836_v37 = vadd.f32 %v1792_v25, %v1546_v47  ;;  %v1548_v47 = vld [vmem:[#allocation5 + $0x50] sm:$0xff]  ;;  %v1549_v25 = vld [vmem:[#allocation5 + $0x58] sm:$0xff]  ;;  %6409 = vst [vmem:[#allocation98_spill] sm:$0xff] %v5285_v11 }
 0x42a   : > { %v5236_v23 = vpop.xlane.xlu0 %1909 }
 0x42b   : > { %6399 = vst [vmem:[#allocation88_spill] sm:$0xff] %v5236_v23  ;;  %1853 = vst.msk [vmem:[#allocation5 + $0x40] sm:$0xff] %vm1844_vm3, %v1836_v37  ;;  %v5262_v37 = vcvt.s32.f32 %v2076_v49 }
 0x42d   : > { %v5243_v5 = vpop.xlane.xlu1 %1914  ;;  %6405 = vst [vmem:[#allocation94_spill] sm:$0xff] %v5262_v37 }
 0x42e   : > { %6402 = vst [vmem:[#allocation91_spill] sm:$0xff] %v5243_v5  ;;  %v1797_v39 = vpop.xlane.xlu0 %1796  ;;  %v5247_v27 = vmax.f32 %v5238_v62, %v5243_v5 }
 0x42f   : > { %v1837_v50 = vadd.f32 %v1797_v39, %v1547_v28  ;;  %v5264_v28 = vld [vmem:[#allocation3 + $0x60] sm:$0xff] }
 0x430   : > { %6403 = vst [vmem:[#allocation92_spill] sm:$0xff] %v5247_v27  ;;  %2975 = vst.msk [vmem:[#allocation3 + $0x50] sm:$0xff] %vm1844_vm3, %v5247_v27  ;;  %2633 = vperm.xlu0 %3502, %v5247_v27   ;;  %v2038_v27 = vsel %vm1974_vm13, %v4439_v17, 1073741824  ;;  %vm1951_vm13 = vcmp.eq.f32.partialorder %v4554_v55, %v5141_v58 }
 0x431   : > { %1854 = vst.msk [vmem:[#allocation5 + $0x48] sm:$0xff] %vm1844_vm3, %v1837_v50  ;;  %v1802_v26 = vpop.xlane.xlu1 %1801  ;;  %6406 = vst [vmem:[#allocation95_spill] sm:$0xff] %v5264_v28  ;;  %2079 = vmin.xlane.f32.xlu1 %v5262_v37  ;;  %v2037_v50 = vsel %vm1973_vm12, %v4427_v7, 1073741824 }
 0x432   : > { %v1838_v59 = vadd.f32 %v1802_v26, %v1548_v47  ;;  %v5260_v39 = vpop.xlane.xlu0 %1919  ;;  %v1550_v26 = vld [vmem:[#allocation5 + $0x60] sm:$0xff]  ;;  %vm2229_vm14 = vcmp.lt.s32.totalorder %v2037_v50, %v2038_v27 }
 0x433   : > { %6404 = vst [vmem:[#allocation93_spill] sm:$0xff] %v5260_v39  ;;  %v2230_v37 = vsel %vm2229_vm14, %v2037_v50, %v2038_v27  ;;  %vm1948_vm14 = vcmp.eq.f32.partialorder %v4523_v44, %v5132_v57 }
 0x434   : > { %1855 = vst.msk [vmem:[#allocation5 + $0x50] sm:$0xff] %vm1844_vm3, %v1838_v59  ;;  %v5289_v59 = vld [vmem:[#allocation3 + $0x48] sm:$0xff] }
 0x435   : > { %v5270_v42 = vpop.xlane.xlu1 %1924  ;;  %6410 = vst [vmem:[#allocation99_spill] sm:$0xff] %v5289_v59 }
 0x436   : > { %v1807_v1 = vpop.xlane.xlu0 %1806  ;;  %v5274_v47 = vmax.f32 %v5264_v28, %v5270_v42 }
 0x437   : > { %v1839_v49 = vadd.f32 %v1807_v1, %v1549_v25  ;;  %v1551_v1 = vld [vmem:[#allocation5 + $0x68] sm:$0xff]  ;;  %v2039_v25 = vsel %vm1975_vm15, %v4442_v21, 1073741824 }
 0x438   : > { %6407 = vst [vmem:[#allocation96_spill] sm:$0xff] %v5274_v47  ;;  %2977 = vst.msk [vmem:[#allocation3 + $0x60] sm:$0xff] %vm1844_vm3, %v5274_v47  ;;  %vm2231_vm0 = vcmp.lt.s32.totalorder %v2230_v37, %v2039_v25 }
 0x439   : > { %1856 = vst.msk [vmem:[#allocation5 + $0x58] sm:$0xff] %vm1844_vm3, %v1839_v49  ;;  %v1812_v6 = vpop.xlane.xlu1 %1811  ;;  %v2232_v27 = vsel %vm2231_vm0, %v2230_v37, %v2039_v25 }
 0x43a   : > { %v1840_v41 = vadd.f32 %v1812_v6, %v1550_v26  ;;  %v5283_v13 = vpop.xlane.xlu0 %1929  ;;  %v1552_v26 = vld [vmem:[#allocation5 + $0x70] sm:$0xff] }
 0x43b   : > { %6408 = vst [vmem:[#allocation97_spill] sm:$0xff] %v5283_v13 }
 0x43c   : > { %1857 = vst.msk [vmem:[#allocation5 + $0x60] sm:$0xff] %vm1844_vm3, %v1840_v41  ;;  %v5301_v41 = vmax.f32 %v5289_v59, %v5236_v23 }
 0x43d   : > { %v5291_v20 = vpop.xlane.xlu1 %1934 }
 0x43e   : > { %v1817_v49 = vpop.xlane.xlu0 %1816  ;;  %v5295_v43 = vmax.f32 %v5285_v11, %v5291_v20  ;;  %6412 = vst [vmem:[#allocation101_spill] sm:$0xff] %v5301_v41  ;;  %2974 = vst.msk [vmem:[#allocation3 + $0x48] sm:$0xff] %vm1844_vm3, %v5301_v41  ;;  %v5317_v41 = vld [vmem:[#allocation3 + $0x58] sm:$0xff] }
 0x43f   : > { %v1841_v6 = vadd.f32 %v1817_v49, %v1551_v1  ;;  %v2040_v49 = vsel %vm1976_vm1, %v4445_v29, 1073741824  ;;  %6415 = vst [vmem:[#allocation104_spill] sm:$0xff] %v5317_v41  ;;  %vm1952_vm1 = vcmp.eq.f32.partialorder %v4577_v53, %v5141_v58  ;;  %vm2432_vm10 = vcmp.gt.f32.partialorder %v5260_v39, %v5317_v41 }
 0x440   : > { %6411 = vst [vmem:[#allocation100_spill] sm:$0xff] %v5295_v43  ;;  %2979 = vst.msk [vmem:[#allocation3 + $0x70] sm:$0xff] %vm1844_vm3, %v5295_v43  ;;  %vm2233_vm2 = vcmp.lt.s32.totalorder %v2232_v27, %v2040_v49 }
 0x441   : > { %1858 = vst.msk [vmem:[#allocation5 + $0x68] sm:$0xff] %vm1844_vm3, %v1841_v6  ;;  %v1822_v50 = vpop.xlane.xlu1 %1821  ;;  %v5313_v25 = vsel %vm2233_vm2, %v2232_v27, %v2040_v49  ;;  %v5338_v27 = vld [vmem:[#allocation3 + $0x68] sm:$0xff]  ;;  %v2013_v49 = vsel %vm1949_vm7, %v4427_v7, 1073741824  ;;  %vm2429_vm7 = vcmp.gt.f32.partialorder %v5221_v46, %v5212_v51 }
 0x442   : > { %v1842_v45 = vadd.f32 %v1822_v50, %v1552_v26  ;;  %v5308_v1 = vpop.xlane.xlu0 %1939  ;;  %2598 = vperm.xlu1 %3503, %v5162_v35   ;;  %6414 = vst [vmem:[#allocation103_spill] sm:$0xff] %v5313_v25  ;;  %v2236_v6 = vshra.s32 %v5313_v25, 16  ;;  %6418 = vst [vmem:[#allocation107_spill] sm:$0xff] %v5338_v27  ;;  %v5340_v50 = vld [vmem:[#allocation3 + $0x78] sm:$0xff]  ;;  %v2016_v25 = vsel %vm1952_vm1, %v4445_v29, 1073741824 }
 0x443   : > { %6413 = vst [vmem:[#allocation102_spill] sm:$0xff] %v5308_v1  ;;  %6419 = vst [vmem:[#allocation108_spill] sm:$0xff] %v5340_v50  ;;  %v5352_v35 = vmax.f32 %v5340_v50, %v5308_v1 }
 0x444   : > { %1859 = vst.msk [vmem:[#allocation5 + $0x70] sm:$0xff] %vm1844_vm3, %v1842_v45  ;;  %v5325_v45 = vmax.f32 %v5317_v41, %v5260_v39  ;;  %v5327_v26 = vcvt.s32.f32 %v2236_v6  ;;  %v5346_v6 = vmax.f32 %v5338_v27, %v5283_v13 }
 0x445   : > { %6421 = vst [vmem:[#allocation110_spill] sm:$0xff] %v5352_v35  ;;  %2980 = vst.msk [vmem:[#allocation3 + $0x78] sm:$0xff] %vm1844_vm3, %v5352_v35 }
 0x446   : > { %v1827_v37 = vpop.xlane.xlu0 %1826  ;;  %6416 = vst [vmem:[#allocation105_spill] sm:$0xff] %v5325_v45  ;;  %6417 = vst [vmem:[#allocation106_spill] sm:$0xff] %v5327_v26 }
 0x447   : > { %v1843_v36 = vadd.f32 %v1827_v37, %v1553_v61  ;;  %v2009_v61 = vsel %vm1945_vm5, %v4427_v7, 1073741824  ;;  %2976 = vst.msk [vmem:[#allocation3 + $0x58] sm:$0xff] %vm1844_vm3, %v5325_v45  ;;  %v2014_v37 = vsel %vm1950_vm8, %v4439_v17, 1073741824  ;;  %6420 = vst [vmem:[#allocation109_spill] sm:$0xff] %v5346_v6  ;;  %vm1981_vm5 = vcmp.eq.f32.partialorder %v4883_v16, %v5243_v5 }
 0x448   : > { %2978 = vst.msk [vmem:[#allocation3 + $0x68] sm:$0xff] %vm1844_vm3, %v5346_v6  ;;  %vm2109_vm11 = vcmp.lt.s32.totalorder %v2013_v49, %v2014_v37  ;;  %vm2431_vm8 = vcmp.gt.f32.partialorder %v5243_v5, %v5238_v62  ;;  %v6424_v62 = vld [vmem:[#allocation50_spill] sm:$0xff] }
 0x449   : > { %1860 = vst.msk [vmem:[#allocation5 + $0x78] sm:$0xff] %vm1844_vm3, %v1843_v36  ;;  %v2010_v36 = vsel %vm1946_vm6, %v4439_v17, 1073741824  ;;  %v2110_v45 = vsel %vm2109_vm11, %v2013_v49, %v2014_v37  ;;  %vm1982_vm6 = vcmp.eq.f32.partialorder %v4897_v9, %v5243_v5  ;;  %vm2434_vm11 = vcmp.gt.f32.partialorder %v5283_v13, %v5338_v27  ;;  %v6440_v58 = vld [vmem:[#allocation103_spill] sm:$0xff] }
 0x44a   : > { %vm2089_vm9 = vcmp.lt.s32.totalorder %v2009_v61, %v2010_v36 }
 0x44b   : > { %v2090_v60 = vsel %vm2089_vm9, %v2009_v61, %v2010_v36  ;;  %v2015_v61 = vsel %vm1951_vm13, %v4442_v21, 1073741824  ;;  %v2012_v36 = vsel %vm1948_vm14, %v4445_v29, 1073741824  ;;  %vm2430_vm9 = vcmp.gt.f32.partialorder %v5236_v23, %v5289_v59 }
 0x44c   : > { %vm2091_vm12 = vcmp.lt.s32.totalorder %v2090_v60, %v2011_v34  ;;  %vm2111_vm15 = vcmp.lt.s32.totalorder %v2110_v45, %v2015_v61  ;;  %vm1985_vm14 = vcmp.eq.f32.partialorder %v4906_v24, %v5260_v39  ;;  %vm1984_vm13 = vcmp.eq.f32.partialorder %v4930_v56, %v5243_v5 }
 0x44d   : > { %v2112_v35 = vsel %vm2111_vm15, %v2110_v45, %v2015_v61  ;;  %vm1986_vm15 = vcmp.eq.f32.partialorder %v4918_v54, %v5260_v39  ;;  %v2048_v28 = vsel %vm1984_vm13, %v4445_v29, 1073741824  ;;  %vm1953_vm13 = vcmp.eq.f32.partialorder %v4568_v0, %v5156_v63 }
 0x44e   : > { %vm2113_vm2 = vcmp.lt.s32.totalorder %v2112_v35, %v2016_v25  ;;  %v2050_v61 = vsel %vm1986_vm15, %v4439_v17, 1073741824  ;;  %v2235_v56 = vand.u32 65535, %v6440_v58 }
 0x44f   : > { %2239 = vmin.xlane.f32.xlu0 %v5327_v26  ;;  %v2092_v26 = vsel %vm2091_vm12, %v2090_v60, %v2011_v34  ;;  %v5371_v37 = vsel %vm2113_vm2, %v2112_v35, %v2016_v25  ;;  %v2045_v35 = vsel %vm1981_vm5, %v4427_v7, 1073741824  ;;  %v2046_v25 = vsel %vm1982_vm6, %v4439_v17, 1073741824 }
 0x450   : > { %vm2093_vm0 = vcmp.lt.s32.totalorder %v2092_v26, %v2012_v36  ;;  %v2116_v60 = vshra.s32 %v5371_v37, 16  ;;  %vm2436_vm12 = vcmp.gt.f32.partialorder %v5308_v1, %v5340_v50  ;;  %vm2269_vm1 = vcmp.lt.s32.totalorder %v2045_v35, %v2046_v25 }
 0x451   : > { %v5367_v6 = vsel %vm2093_vm0, %v2092_v26, %v2012_v36  ;;  %v2049_v26 = vsel %vm1985_vm14, %v4427_v7, 1073741824  ;;  %vm1983_vm2 = vcmp.eq.f32.partialorder %v4894_v40, %v5243_v5  ;;  %v2270_v36 = vsel %vm2269_vm1, %v2045_v35, %v2046_v25 }
 0x452   : > { %v2096_v49 = vshra.s32 %v5367_v6, 16  ;;  %v5404_v45 = vcvt.s32.f32 %v2116_v60  ;;  %vm2289_vm5 = vcmp.lt.s32.totalorder %v2049_v26, %v2050_v61  ;;  %vm1987_vm0 = vcmp.eq.f32.partialorder %v4921_v32, %v5260_v39 }
 0x453   : > { %v2290_v60 = vsel %vm2289_vm5, %v2049_v26, %v2050_v61  ;;  %vm1988_vm1 = vcmp.eq.f32.partialorder %v4950_v30, %v5260_v39  ;;  %vm1957_vm5 = vcmp.eq.f32.partialorder %v4629_v48, %v5164_v52  ;;  %v6435_v30 = vld [vmem:[#allocation19_spill] sm:$0xff] }
 0x454   : > { %v5380_v34 = vcvt.s32.f32 %v2096_v49  ;;  %v2047_v49 = vsel %vm1983_vm2, %v4442_v21, 1073741824  ;;  %v2052_v50 = vsel %vm1988_vm1, %v4445_v29, 1073741824 }
 0x455   : > { %vm2271_vm6 = vcmp.lt.s32.totalorder %v2270_v36, %v2047_v49 }
 0x456   : > { %v2272_v11 = vsel %vm2271_vm6, %v2270_v36, %v2047_v49  ;;  %vm1958_vm6 = vcmp.eq.f32.partialorder %v4638_v38, %v5164_v52 }
 0x457   : > { %vm2273_vm15 = vcmp.lt.s32.totalorder %v2272_v11, %v2048_v28 }
 0x458   : > { %v5420_v25 = vsel %vm2273_vm15, %v2272_v11, %v2048_v28  ;;  %v2017_v28 = vsel %vm1953_vm13, %v4427_v7, 1073741824  ;;  %vm1955_vm15 = vcmp.eq.f32.partialorder %v4600_v33, %v5156_v63  ;;  %vm1959_vm13 = vcmp.eq.f32.partialorder %v4635_v14, %v5164_v52 }
 0x459   : > { %v2276_v26 = vshra.s32 %v5420_v25, 16  ;;  %v2023_v27 = vsel %vm1959_vm13, %v4442_v21, 1073741824  ;;  %vm2001_vm13 = vcmp.eq.f32.partialorder %v5062_v8, %v5308_v1 }
 0x45b   : > { %v5427_v36 = vcvt.s32.f32 %v2276_v26  ;;  %v2019_v26 = vsel %vm1955_vm15, %v4442_v21, 1073741824 }
 0x465   : > { %2643 = vperm.xlu0 %3502, %v5274_v47   ;;  %v2051_v47 = vsel %vm1987_vm0, %v4442_v21, 1073741824  ;;  %vm1954_vm0 = vcmp.eq.f32.partialorder %v4580_v15, %v5156_v63 }
 0x466   : > { %2099 = vmin.xlane.f32.xlu1 %v5380_v34  ;;  %vm2291_vm14 = vcmp.lt.s32.totalorder %v2290_v60, %v2051_v47 }
 0x467   : > { %v2292_v35 = vsel %vm2291_vm14, %v2290_v60, %v2051_v47  ;;  %v2018_v47 = vsel %vm1954_vm0, %v4439_v17, 1073741824  ;;  %v2022_v60 = vsel %vm1958_vm6, %v4439_v17, 1073741824  ;;  %vm1956_vm0 = vcmp.eq.f32.partialorder %v4649_v12, %v5156_v63 }
 0x468   : > { %vm2293_vm2 = vcmp.lt.s32.totalorder %v2292_v35, %v2052_v50  ;;  %vm2129_vm14 = vcmp.lt.s32.totalorder %v2017_v28, %v2018_v47  ;;  %v2020_v41 = vsel %vm1956_vm0, %v4445_v29, 1073741824  ;;  %vm2002_vm0 = vcmp.eq.f32.partialorder %v5070_v22, %v5308_v1 }
 0x469   : > { %v5425_v61 = vsel %vm2293_vm2, %v2292_v35, %v2052_v50  ;;  %v2021_v50 = vsel %vm1957_vm5, %v4427_v7, 1073741824  ;;  %v2130_v35 = vsel %vm2129_vm14, %v2017_v28, %v2018_v47  ;;  %vm1960_vm14 = vcmp.eq.f32.partialorder %v4675_v19, %v5164_v52  ;;  %v6434_v52 = vld [vmem:[#allocation94_spill] sm:$0xff] }
 0x46a   : > { %2119 = vmin.xlane.f32.xlu1 %v5404_v45  ;;  %v2296_v49 = vshra.s32 %v5425_v61, 16  ;;  %vm2149_vm1 = vcmp.lt.s32.totalorder %v2021_v50, %v2022_v60  ;;  %vm2131_vm2 = vcmp.lt.s32.totalorder %v2130_v35, %v2019_v26  ;;  %v2024_v5 = vsel %vm1960_vm14, %v4445_v29, 1073741824 }
 0x46b   : > { %v2132_v39 = vsel %vm2131_vm2, %v2130_v35, %v2019_v26  ;;  %v6422_v35 = vld [vmem:[#allocation48_spill] sm:$0xff]  ;;  %v6423_v26 = vld [vmem:[#allocation49_spill] sm:$0xff]  ;;  %v2066_v59 = vsel %vm2002_vm0, %v4439_v17, 1073741824 }
 0x46c   : > { %v5435_v11 = vcvt.s32.f32 %v2296_v49  ;;  %v2150_v49 = vsel %vm2149_vm1, %v2021_v50, %v2022_v60  ;;  %vm2133_vm6 = vcmp.lt.s32.totalorder %v2132_v39, %v2020_v41  ;;  %vm1993_vm1 = vcmp.eq.f32.partialorder %v6422_v35, %v5283_v13 }
 0x46d   : > { %vm2151_vm5 = vcmp.lt.s32.totalorder %v2150_v49, %v2023_v27  ;;  %v5457_v47 = vsel %vm2133_vm6, %v2132_v39, %v2020_v41  ;;  %vm1994_vm2 = vcmp.eq.f32.partialorder %v6423_v26, %v5283_v13  ;;  %vm1995_vm6 = vcmp.eq.f32.partialorder %v6424_v62, %v5283_v13  ;;  %v6425_v26 = vld [vmem:[#allocation52_spill] sm:$0xff] }
 0x46e   : > { %v2152_v28 = vsel %vm2151_vm5, %v2150_v49, %v2023_v27  ;;  %v2136_v50 = vshra.s32 %v5457_v47, 16  ;;  %v2057_v27 = vsel %vm1993_vm1, %v4427_v7, 1073741824  ;;  %vm2003_vm1 = vcmp.eq.f32.partialorder %v5082_v2, %v5308_v1 }
 0x46f   : > { %vm2153_vm15 = vcmp.lt.s32.totalorder %v2152_v28, %v2024_v5 }
 0x470   : > { %v5461_v60 = vsel %vm2153_vm15, %v2152_v28, %v2024_v5  ;;  %v5468_v46 = vcvt.s32.f32 %v2136_v50  ;;  %v2058_v5 = vsel %vm1994_vm2, %v4439_v17, 1073741824  ;;  %vm1996_vm2 = vcmp.eq.f32.partialorder %v6425_v26, %v5283_v13  ;;  %v6433_v26 = vld [vmem:[#allocation90_spill] sm:$0xff] }
 0x471   : > { %v2156_v39 = vshra.s32 %v5461_v60, 16  ;;  %vm2329_vm5 = vcmp.lt.s32.totalorder %v2057_v27, %v2058_v5  ;;  %v2075_v62 = vand.u32 65535, %v6433_v26 }
 0x472   : > { %v2330_v51 = vsel %vm2329_vm5, %v2057_v27, %v2058_v5  ;;  %v2067_v27 = vsel %vm2003_vm1, %v4442_v21, 1073741824  ;;  %vm2004_vm5 = vcmp.eq.f32.partialorder %v5102_v4, %v5308_v1 }
 0x473   : > { %v5478_v49 = vcvt.s32.f32 %v2156_v39  ;;  %v2059_v39 = vsel %vm1995_vm6, %v4442_v21, 1073741824  ;;  %v2077_v63 = vcvt.s32.f32 %v2075_v62 }
 0x474   : > { %vm2331_vm15 = vcmp.lt.s32.totalorder %v2330_v51, %v2059_v39 }
 0x475   : > { %v2332_v35 = vsel %vm2331_vm15, %v2330_v51, %v2059_v39 }
 0x47b   : > { %2608 = vperm.xlu1 %3503, %v5190_v3  }
 0x484   : > { %2279 = vmin.xlane.f32.xlu0 %v5427_v36 }
 0x488   : > { %2299 = vmin.xlane.f32.xlu0 %v5435_v11 }
 0x489   : > { %v2589_v41 = vpop.permute.xlu0 %2588 }
 0x48a   : > { %v2665_v28 = vsub.f32 %v4490_v10, %v2589_v41  ;;  %v2666_v50 = vsub.f32 %v4502_v31, %v2589_v41  ;;  %v2667_v10 = vsub.f32 %v4499_v18, %v2589_v41  ;;  %v2668_v5 = vsub.f32 %v4523_v44, %v2589_v41 }
 0x48c   : > { %v2733_v8 = vmul.f32 1.442695, %v2665_v28  ;;  %v2735_v22 = vmul.f32 1.442695, %v2666_v50  ;;  %v2737_v28 = vmul.f32 1.442695, %v2667_v10  ;;  %v5505_v10 = vpop.permute.xlu1 %2583 }
 0x48d   : > { %v2060_v50 = vsel %vm1996_vm2, %v4445_v29, 1073741824 }
 0x48e   : > { %3516 = vpow2.f32 %v2733_v8  ;;  %vm2333_vm0 = vcmp.lt.s32.totalorder %v2332_v35, %v2060_v50 }
 0x48f   : > { %3518 = vpow2.f32 %v2735_v22  ;;  %v5498_v8 = vsel %vm2333_vm0, %v2332_v35, %v2060_v50  ;;  %v2068_v22 = vsel %vm2004_vm5, %v4445_v29, 1073741824 }
 0x490   : > { %3520 = vpow2.f32 %v2737_v28  ;;  %v2336_v44 = vshra.s32 %v5498_v8, 16  ;;  %v6429_v28 = vld [vmem:[#allocation18_spill] sm:$0xff]  ;;  %v5515_v13 = vpop.permute.xlu1 %2593 }
 0x492   : > { %v5507_v1 = vcvt.s32.f32 %v2336_v44 }
 0x498   : > { %v3517_v51 = vpop.eup %3516 }
 0x499   : > { %v3519_v41 = vpop.eup %3518 }
 0x49a   : > { %v2858_v35 = vadd.f32 %v3519_v41, %v3517_v51  ;;  %v3521_v50 = vpop.eup %3520  ;;  %v6430_v51 = vld [vmem:[#allocation80_spill] sm:$0xff]  ;;  %v6431_v41 = vld [vmem:[#allocation21_spill] sm:$0xff] }
 0x49b   : > { %vm1965_vm1 = vcmp.eq.f32.partialorder %v6431_v41, %v6430_v51 }
 0x49e   : > { %2653 = vperm.xlu0 %3502, %v5295_v43   ;;  %v2065_v43 = vsel %vm2001_vm13, %v4427_v7, 1073741824 }
 0x49f   : > { %2139 = vmin.xlane.f32.xlu1 %v5468_v46  ;;  %vm2369_vm14 = vcmp.lt.s32.totalorder %v2065_v43, %v2066_v59 }
 0x4a0   : > { %v2370_v31 = vsel %vm2369_vm14, %v2065_v43, %v2066_v59  ;;  %v2739_v43 = vmul.f32 1.442695, %v2668_v5  ;;  %v6426_v59 = vld [vmem:[#allocation85_spill] sm:$0xff] }
 0x4a1   : > { %vm2371_vm13 = vcmp.lt.s32.totalorder %v2370_v31, %v2067_v27  ;;  %v6428_v5 = vld [vmem:[#allocation17_spill] sm:$0xff] }
 0x4a2   : > { %v2372_v18 = vsel %vm2371_vm13, %v2370_v31, %v2067_v27  ;;  %3522 = vpow2.f32 %v2739_v43  ;;  %v6427_v27 = vld [vmem:[#allocation77_spill] sm:$0xff]  ;;  %v2859_v43 = vadd.f32 %v3521_v50, %v2858_v35  ;;  %v2029_v35 = vsel %vm1965_vm1, %v4427_v7, 1073741824 }
 0x4a3   : > { %2159 = vmin.xlane.f32.xlu1 %v5478_v49  ;;  %vm2373_vm6 = vcmp.lt.s32.totalorder %v2372_v18, %v2068_v22  ;;  %vm1961_vm14 = vcmp.eq.f32.partialorder %v6428_v5, %v6427_v27  ;;  %vm1962_vm15 = vcmp.eq.f32.partialorder %v6429_v28, %v6427_v27  ;;  %vm1963_vm5 = vcmp.eq.f32.partialorder %v6435_v30, %v6427_v27 }
 0x4a4   : > { %v5503_v39 = vsel %vm2373_vm6, %v2372_v18, %v2068_v22  ;;  %v2025_v22 = vsel %vm1961_vm14, %v4427_v7, 1073741824  ;;  %v2026_v44 = vsel %vm1962_vm15, %v4439_v17, 1073741824  ;;  %v2027_v24 = vsel %vm1963_vm5, %v4442_v21, 1073741824 }
 0x4a5   : > { %v2376_v31 = vshra.s32 %v5503_v39, 16  ;;  %vm2169_vm13 = vcmp.lt.s32.totalorder %v2025_v22, %v2026_v44 }
 0x4a6   : > { %v2170_v32 = vsel %vm2169_vm13, %v2025_v22, %v2026_v44 }
 0x4a7   : > { %v5517_v18 = vcvt.s32.f32 %v2376_v31  ;;  %vm2171_vm14 = vcmp.lt.s32.totalorder %v2170_v32, %v2027_v24 }
 0x4ac   : > { %v3523_v4 = vpop.eup %3522 }
 0x4ad   : > { %v2860_v31 = vadd.f32 %v3523_v4, %v2859_v43  ;;  %v6436_v4 = vld [vmem:[#allocation22_spill] sm:$0xff]  ;;  %v6437_v43 = vld [vmem:[#allocation20_spill] sm:$0xff] }
 0x4ae   : > { %vm1967_vm15 = vcmp.eq.f32.partialorder %v6436_v4, %v6430_v51  ;;  %vm1964_vm1 = vcmp.eq.f32.partialorder %v6437_v43, %v6427_v27 }
 0x4af   : > { %v2031_v3 = vsel %vm1967_vm15, %v4442_v21, 1073741824  ;;  %v2028_v62 = vsel %vm1964_vm1, %v4445_v29, 1073741824 }
 0x4b4   : > { %2618 = vperm.xlu1 %3503, %v6426_v59   ;;  %v6432_v59 = vld [vmem:[#allocation23_spill] sm:$0xff] }
 0x4b5   : > { %vm1966_vm2 = vcmp.eq.f32.partialorder %v6432_v59, %v6430_v51 }
 0x4b6   : > { %v2030_v50 = vsel %vm1966_vm2, %v4439_v17, 1073741824 }
 0x4b7   : > { %vm2189_vm6 = vcmp.lt.s32.totalorder %v2029_v35, %v2030_v50 }
 0x4b8   : > { %v2190_v26 = vsel %vm2189_vm6, %v2029_v35, %v2030_v50 }
 0x4b9   : > { %vm2191_vm2 = vcmp.lt.s32.totalorder %v2190_v26, %v2031_v3 }
 0x4ba   : > { %v2192_v22 = vsel %vm2191_vm2, %v2190_v26, %v2031_v3 }
 0x4bd   : > { %2339 = vmin.xlane.f32.xlu0 %v5507_v1 }
 0x4be   : > { %v5526_v2 = vpop.xlane.xlu1 %2079 }
 0x4bf   : > { %vm2081_vm0 = vcmp.eq.f32.partialorder %v6434_v52, %v5526_v2  ;;  %v2172_v52 = vsel %vm2171_vm14, %v2170_v32, %v2027_v24 }
 0x4c0   : > { %v2082_v54 = vsel %vm2081_vm0, %v2077_v63, inf  ;;  %vm2173_vm13 = vcmp.lt.s32.totalorder %v2172_v52, %v2028_v62  ;;  %v6438_v63 = vld [vmem:[#allocation27_spill] sm:$0xff] }
 0x4c1   : > { %2379 = vmin.xlane.f32.xlu0 %v5517_v18  ;;  %vm1968_vm0 = vcmp.eq.f32.partialorder %v6438_v63, %v6430_v51  ;;  %v5548_v44 = vsel %vm2173_vm13, %v2172_v52, %v2028_v62  ;;  %v2237_v52 = vcvt.s32.f32 %v2235_v56 }
 0x4c2   : > { %v2032_v35 = vsel %vm1968_vm0, %v4445_v29, 1073741824  ;;  %v2176_v24 = vshra.s32 %v5548_v44, 16  ;;  %v2599_v3 = vpop.permute.xlu1 %2598 }
 0x4c3   : > { %vm2193_vm5 = vcmp.lt.s32.totalorder %v2192_v22, %v2032_v35  ;;  %v2673_v62 = vsub.f32 %v4568_v0, %v2599_v3  ;;  %v2675_v16 = vsub.f32 %v4600_v33, %v2599_v3  ;;  %v2676_v56 = vsub.f32 %v4649_v12, %v2599_v3  ;;  %v6444_v33 = vld [vmem:[#allocation83_spill] sm:$0xff]  ;;  %v6446_v12 = vld [vmem:[#allocation25_spill] sm:$0xff] }
 0x4c4   : > { %v5554_v32 = vsel %vm2193_vm5, %v2192_v22, %v2032_v35  ;;  %v5559_v57 = vcvt.s32.f32 %v2176_v24  ;;  %v6442_v22 = vld [vmem:[#allocation106_spill] sm:$0xff]  ;;  %v2674_v35 = vsub.f32 %v4580_v15, %v2599_v3  ;;  %v2095_v15 = vand.u32 65535, %v5367_v6 }
 0x4c5   : > { %2861 = vadd.xlane.f32.xlu0 %v2860_v31  ;;  %v5540_v31 = vpop.permute.xlu0 %2603  ;;  %v2196_v51 = vshra.s32 %v5554_v32, 16  ;;  %v2749_v24 = vmul.f32 1.442695, %v2673_v62  ;;  %v2753_v0 = vmul.f32 1.442695, %v2675_v16  ;;  %vm1970_vm15 = vcmp.eq.f32.partialorder %v6446_v12, %v6444_v33 }
 0x4c6   : > { %v2751_v9 = vmul.f32 1.442695, %v2674_v35  ;;  %v2097_v35 = vcvt.s32.f32 %v2095_v15  ;;  %v2034_v6 = vsel %vm1970_vm15, %v4439_v17, 1073741824 }
 0x4c7   : > { %v5566_v40 = vcvt.s32.f32 %v2196_v51  ;;  %3524 = vpow2.f32 %v2749_v24  ;;  %v2755_v51 = vmul.f32 1.442695, %v2676_v56  ;;  %v6445_v24 = vld [vmem:[#allocation24_spill] sm:$0xff]  ;;  %v2115_v56 = vand.u32 65535, %v5371_v37 }
 0x4c8   : > { %3526 = vpow2.f32 %v2751_v9  ;;  %vm1969_vm14 = vcmp.eq.f32.partialorder %v6445_v24, %v6444_v33 }
 0x4c9   : > { %2083 = vmin.xlane.f32.xlu0 %v2082_v54  ;;  %v5546_v54 = vpop.permute.xlu0 %2613  ;;  %3528 = vpow2.f32 %v2753_v0  ;;  %v2033_v3 = vsel %vm1969_vm14, %v4427_v7, 1073741824 }
 0x4ca   : > { %3530 = vpow2.f32 %v2755_v51  ;;  %vm2209_vm2 = vcmp.lt.s32.totalorder %v2033_v3, %v2034_v6  ;;  %v2117_v51 = vcvt.s32.f32 %v2115_v56 }
 0x4cd   : > { %v5551_v50 = vpop.permute.xlu0 %2623 }
 0x4d1   : > { %v5556_v27 = vpop.permute.xlu0 %2633 }
 0x4d2   : > { %6439 = vst [vmem:[#allocation17_spill] sm:$0xff] %v5556_v27  ;;  %v3525_v27 = vpop.eup %3524 }
 0x4d3   : > { %v3527_v63 = vpop.eup %3526 }
 0x4d8   : > { %2179 = vmin.xlane.f32.xlu1 %v5559_v57 }
 0x4dc   : > { %v5563_v26 = vpop.xlane.xlu0 %2239  ;;  %2199 = vmin.xlane.f32.xlu1 %v5566_v40 }
 0x4dd   : > { %6441 = vst [vmem:[#allocation18_spill] sm:$0xff] %v5563_v26  ;;  %vm2241_vm6 = vcmp.eq.f32.partialorder %v6442_v22, %v5563_v26  ;;  %v6443_v22 = vld [vmem:[#allocation101_spill] sm:$0xff]  ;;  %v3529_v26 = vpop.eup %3528 }
 0x4de   : > { %v5571_v58 = vsel %vm2241_vm6, %v2237_v52, inf  ;;  %v2868_v52 = vadd.f32 %v3527_v63, %v3525_v27  ;;  %v3531_v27 = vpop.eup %3530 }
 0x4e0   : > { %v2869_v16 = vadd.f32 %v3529_v26, %v2868_v52  ;;  %v2210_v26 = vsel %vm2209_vm2, %v2033_v3, %v2034_v6  ;;  %v2295_v6 = vand.u32 65535, %v5425_v61 }
 0x4e2   : > { %v2870_v0 = vadd.f32 %v3531_v27, %v2869_v16 }
 0x4e4   : > { %v5602_v27 = vpop.permute.xlu0 %2643 }
 0x4e5   : > { %6449 = vst [vmem:[#allocation21_spill] sm:$0xff] %v5602_v27 }
 0x4ed   : > { %2628 = vperm.xlu1 %3503, %v6443_v22  }
 0x4f3   : > { %v5578_v62 = vpop.xlane.xlu1 %2099 }
 0x4f4   : > { %vm2101_vm1 = vcmp.eq.f32.partialorder %v5380_v34, %v5578_v62  ;;  %v6447_v34 = vld [vmem:[#allocation26_spill] sm:$0xff] }
 0x4f5   : > { %v2102_v9 = vsel %vm2101_vm1, %v2097_v35, inf  ;;  %vm1971_vm0 = vcmp.eq.f32.partialorder %v6447_v34, %v6444_v33  ;;  %v6448_v35 = vld [vmem:[#allocation28_spill] sm:$0xff] }
 0x4f6   : > { %2103 = vmin.xlane.f32.xlu0 %v2102_v9  ;;  %v2035_v52 = vsel %vm1971_vm0, %v4442_v21, 1073741824  ;;  %vm1972_vm6 = vcmp.eq.f32.partialorder %v6448_v35, %v6444_v33 }
 0x4f7   : > { %v5588_v63 = vpop.xlane.xlu1 %2119  ;;  %vm2211_vm5 = vcmp.lt.s32.totalorder %v2210_v26, %v2035_v52  ;;  %v2036_v16 = vsel %vm1972_vm6, %v4445_v29, 1073741824 }
 0x4f8   : > { %vm2121_vm13 = vcmp.eq.f32.partialorder %v5404_v45, %v5588_v63  ;;  %v2212_v37 = vsel %vm2211_vm5, %v2210_v26, %v2035_v52  ;;  %v2275_v45 = vand.u32 65535, %v5420_v25  ;;  %v2297_v52 = vcvt.s32.f32 %v2295_v6 }
 0x4f9   : > { %v2122_v15 = vsel %vm2121_vm13, %v2117_v51, inf  ;;  %vm2213_vm14 = vcmp.lt.s32.totalorder %v2212_v37, %v2036_v16 }
 0x4fa   : > { %2871 = vadd.xlane.f32.xlu0 %v2870_v0  ;;  %v5599_v9 = vsel %vm2213_vm14, %v2212_v37, %v2036_v16  ;;  %v2277_v0 = vcvt.s32.f32 %v2275_v45 }
 0x4fb   : > { %v2216_v3 = vshra.s32 %v5599_v9, 16  ;;  %v2609_v26 = vpop.permute.xlu1 %2608 }
 0x4fc   : > { %v2681_v37 = vsub.f32 %v6428_v5, %v2609_v26  ;;  %v2682_v61 = vsub.f32 %v6429_v28, %v2609_v26  ;;  %v6453_v28 = vld [vmem:[#allocation32_spill] sm:$0xff] }
 0x4fd   : > { %v5610_v51 = vcvt.s32.f32 %v2216_v3  ;;  %v2683_v3 = vsub.f32 %v6435_v30, %v2609_v26  ;;  %vm1977_vm2 = vcmp.eq.f32.partialorder %v6453_v28, %v5236_v23 }
 0x4fe   : > { %2123 = vmin.xlane.f32.xlu0 %v2122_v15  ;;  %v2767_v45 = vmul.f32 1.442695, %v2682_v61 }
 0x4ff   : > { %v2769_v33 = vmul.f32 1.442695, %v2683_v3 }
 0x511   : > { %v5606_v56 = vpop.xlane.xlu0 %2279  ;;  %2219 = vmin.xlane.f32.xlu1 %v5610_v51 }
 0x512   : > { %6450 = vst [vmem:[#allocation23_spill] sm:$0xff] %v5606_v56  ;;  %vm2281_vm15 = vcmp.eq.f32.partialorder %v5427_v36, %v5606_v56  ;;  %v2765_v36 = vmul.f32 1.442695, %v2681_v37  ;;  %v6452_v56 = vld [vmem:[#allocation105_spill] sm:$0xff]  ;;  %v2041_v37 = vsel %vm1977_vm2, %v4427_v7, 1073741824 }
 0x513   : > { %v5612_v15 = vsel %vm2281_vm15, %v2277_v0, inf  ;;  %v2684_v0 = vsub.f32 %v6437_v43, %v2609_v26 }
 0x514   : > { %3532 = vpow2.f32 %v2765_v36 }
 0x515   : > { %v5615_v25 = vpop.xlane.xlu0 %2299  ;;  %3534 = vpow2.f32 %v2767_v45  ;;  %v2771_v6 = vmul.f32 1.442695, %v2684_v0  ;;  %v6455_v0 = vld [vmem:[#allocation34_spill] sm:$0xff] }
 0x516   : > { %6451 = vst [vmem:[#allocation90_spill] sm:$0xff] %v5615_v25  ;;  %vm2301_vm1 = vcmp.eq.f32.partialorder %v5435_v11, %v5615_v25  ;;  %3536 = vpow2.f32 %v2769_v33  ;;  %v2135_v11 = vand.u32 65535, %v5457_v47  ;;  %vm1979_vm6 = vcmp.eq.f32.partialorder %v6455_v0, %v5236_v23 }
 0x517   : > { %v5621_v16 = vsel %vm2301_vm1, %v2297_v52, inf  ;;  %3538 = vpow2.f32 %v2771_v6  ;;  %v6454_v52 = vld [vmem:[#allocation33_spill] sm:$0xff] }
 0x518   : > { %vm1978_vm13 = vcmp.eq.f32.partialorder %v6454_v52, %v5236_v23  ;;  %v2137_v61 = vcvt.s32.f32 %v2135_v11 }
 0x519   : > { %v2042_v43 = vsel %vm1978_vm13, %v4439_v17, 1073741824 }
 0x51a   : > { %vm2249_vm5 = vcmp.lt.s32.totalorder %v2041_v37, %v2042_v43 }
 0x51e   : > { %v3533_v5 = vpop.eup %3532 }
 0x51f   : > { %v3535_v22 = vpop.eup %3534 }
 0x520   : > { %v2878_v30 = vadd.f32 %v3535_v22, %v3533_v5  ;;  %v3537_v33 = vpop.eup %3536  ;;  %v2155_v22 = vand.u32 65535, %v5461_v60  ;;  %v2250_v5 = vsel %vm2249_vm5, %v2041_v37, %v2042_v43  ;;  %v6457_v60 = vld [vmem:[#allocation66_spill] sm:$0xff] }
 0x521   : > { %v3539_v45 = vpop.eup %3538 }
 0x522   : > { %2638 = vperm.xlu1 %3503, %v6452_v56   ;;  %v2879_v36 = vadd.f32 %v3537_v33, %v2878_v30  ;;  %v2157_v11 = vcvt.s32.f32 %v2155_v22  ;;  %v6456_v33 = vld [vmem:[#allocation36_spill] sm:$0xff]  ;;  %v5654_v22 = vpop.permute.xlu0 %2653 }
 0x523   : > { %vm1980_vm1 = vcmp.eq.f32.partialorder %v6456_v33, %v5236_v23  ;;  %6459 = vst [vmem:[#allocation94_spill] sm:$0xff] %v5654_v22 }
 0x524   : > { %v2880_v6 = vadd.f32 %v3539_v45, %v2879_v36  ;;  %v2044_v36 = vsel %vm1980_vm1, %v4445_v29, 1073741824  ;;  %v2335_v45 = vand.u32 65535, %v5498_v8  ;;  %v2502_v8 = vld [vmem:[#allocation4 + $0x8] sm:$0xff] }
 0x52c   : > { %v5633_v26 = vpop.xlane.xlu1 %2139 }
 0x52d   : > { %vm2141_vm0 = vcmp.eq.f32.partialorder %v5468_v46, %v5633_v26  ;;  %v2043_v46 = vsel %vm1979_vm6, %v4442_v21, 1073741824 }
 0x52e   : > { %v2142_v47 = vsel %vm2141_vm0, %v2137_v61, inf  ;;  %vm2251_vm15 = vcmp.lt.s32.totalorder %v2250_v5, %v2043_v46 }
 0x52f   : > { %2143 = vmin.xlane.f32.xlu0 %v2142_v47  ;;  %v2252_v61 = vsel %vm2251_vm15, %v2250_v5, %v2043_v46  ;;  %v6458_v47 = vld [vmem:[#allocation64_spill] sm:$0xff]  ;;  %v2375_v5 = vand.u32 65535, %v5503_v39 }
 0x530   : > { %v5637_v3 = vpop.xlane.xlu1 %2159  ;;  %v2518_v25 = vsub.f32 %v6458_v47, %v6457_v60  ;;  %vm2253_vm2 = vcmp.lt.s32.totalorder %v2252_v61, %v2044_v36 }
 0x531   : > { %vm2161_vm14 = vcmp.eq.f32.partialorder %v5478_v49, %v5637_v3  ;;  %v5650_v43 = vsel %vm2253_vm2, %v2252_v61, %v2044_v36  ;;  %v2377_v36 = vcvt.s32.f32 %v2375_v5 }
 0x532   : > { %v2162_v30 = vsel %vm2161_vm14, %v2157_v11, inf  ;;  %v2535_v37 = vmul.f32 1.442695, %v2518_v25  ;;  %v2256_v49 = vshra.s32 %v5650_v43, 16  ;;  %v2337_v11 = vcvt.s32.f32 %v2335_v45 }
 0x533   : > { %2881 = vadd.xlane.f32.xlu0 %v2880_v6 }
 0x534   : > { %3540 = vpow2.f32 %v2535_v37  ;;  %v5656_v6 = vcvt.s32.f32 %v2256_v49  ;;  %v2619_v25 = vpop.permute.xlu1 %2618 }
 0x535   : > { %v2689_v37 = vsub.f32 %v6445_v24, %v2619_v25  ;;  %v2690_v39 = vsub.f32 %v6446_v12, %v2619_v25  ;;  %v2691_v5 = vsub.f32 %v6447_v34, %v2619_v25  ;;  %v2692_v12 = vsub.f32 %v6448_v35, %v2619_v25  ;;  %v6467_v35 = vld [vmem:[#allocation45_spill] sm:$0xff] }
 0x536   : > { %vm1989_vm5 = vcmp.eq.f32.partialorder %v6467_v35, %v5270_v42  ;;  %v2175_v25 = vand.u32 65535, %v5548_v44 }
 0x537   : > { %2163 = vmin.xlane.f32.xlu0 %v2162_v30  ;;  %v2783_v56 = vmul.f32 1.442695, %v2690_v39  ;;  %v2787_v34 = vmul.f32 1.442695, %v2692_v12 }
 0x538   : > { %v2177_v12 = vcvt.s32.f32 %v2175_v25 }
 0x53e   : > { %v3541_v61 = vpop.eup %3540 }
 0x53f   : > { %v2566_v45 = vmul.f32 %v3541_v61, %v2502_v8  ;;  %v2437_v61 = vld [vmem:[#allocation6] sm:$0xff]  ;;  %v6462_v8 = vld [vmem:[#allocation109_spill] sm:$0xff] }
 0x546   : > { %2259 = vmin.xlane.f32.xlu1 %v5656_v6 }
 0x54a   : > { %v5660_v46 = vpop.xlane.xlu0 %2339 }
 0x54b   : > { %6460 = vst [vmem:[#allocation19_spill] sm:$0xff] %v5660_v46  ;;  %vm2341_vm13 = vcmp.eq.f32.partialorder %v5507_v1, %v5660_v46  ;;  %v2086_v1 = vcvt.f32.s32 %v5526_v2  ;;  %v6463_v2 = vld [vmem:[#allocation10_spill] sm:$0xff] }
 0x54c   : > { %v5664_v30 = vsel %vm2341_vm13, %v2337_v11, inf  ;;  %v2781_v11 = vmul.f32 1.442695, %v2689_v37 }
 0x54d   : > { %v2087_v24 = vshll.u32 %v2086_v1, 16 }
 0x54e   : > { %v5666_v60 = vpop.xlane.xlu0 %2379  ;;  %3542 = vpow2.f32 %v2781_v11  ;;  %v2053_v11 = vsel %vm1989_vm5, %v4427_v7, 1073741824 }
 0x54f   : > { %6461 = vst [vmem:[#allocation22_spill] sm:$0xff] %v5666_v60  ;;  %vm2381_vm0 = vcmp.eq.f32.partialorder %v5517_v18, %v5666_v60  ;;  %3544 = vpow2.f32 %v2783_v56 }
 0x550   : > { %v5672_v49 = vsel %vm2381_vm0, %v2377_v36, inf  ;;  %v2785_v36 = vmul.f32 1.442695, %v2691_v5 }
 0x552   : > { %v2862_v23 = vpop.xlane.xlu0 %2861  ;;  %3546 = vpow2.f32 %v2785_v36  ;;  %v6469_v36 = vld [vmem:[#allocation53_spill] sm:$0xff] }
 0x553   : > { %v2934_v46 = vadd.f32 %v2862_v23, %v2566_v45  ;;  %v6466_v45 = vld [vmem:[#allocation110_spill] sm:$0xff]  ;;  %3548 = vpow2.f32 %v2787_v34  ;;  %vm1997_vm14 = vcmp.eq.f32.partialorder %v6469_v36, %v5291_v20 }
 0x554   : > { %v2061_v60 = vsel %vm1997_vm14, %v4427_v7, 1073741824 }
 0x555   : > { %2950 = vst.msk [vmem:[#allocation4 + $0x8] sm:$0xff] %vm1844_vm3, %v2934_v46 }
 0x556   : > { %v2084_v22 = vpop.xlane.xlu0 %2083 }
 0x557   : > { %v2085_v27 = vcvt.f32.s32 %v2084_v22  ;;  %2648 = vperm.xlu1 %3503, %v6462_v8   ;;  %v6468_v22 = vld [vmem:[#allocation47_spill] sm:$0xff] }
 0x558   : > { %v3543_v56 = vpop.eup %3542  ;;  %vm1990_vm6 = vcmp.eq.f32.partialorder %v6468_v22, %v5270_v42 }
 0x559   : > { %v2088_v18 = vadd.s32 %v2087_v24, %v2085_v27  ;;  %v3545_v27 = vpop.eup %3544  ;;  %v2054_v5 = vsel %vm1990_vm6, %v4439_v17, 1073741824 }
 0x55a   : > { %v2888_v1 = vadd.f32 %v3545_v27, %v3543_v56  ;;  %v6473_v27 = vld [vmem:[#allocation46_spill] sm:$0xff] }
 0x55b   : > { %v2389_v37 = vadd.s32 %v2088_v18, %v6463_v2  ;;  %2658 = vperm.xlu1 %3503, %v6466_v45   ;;  %vm1991_vm2 = vcmp.eq.f32.partialorder %v6473_v27, %v5270_v42 }
 0x55c   : > { %v3547_v24 = vpop.eup %3546 }
 0x55d   : > { %v2453_v46 = vsel %vm2421_vm4, %v2389_v37, %v2437_v61  ;;  %vm2309_vm4 = vcmp.lt.s32.totalorder %v2053_v11, %v2054_v5  ;;  %v6470_v61 = vld [vmem:[#allocation54_spill] sm:$0xff]  ;;  %v6471_v37 = vld [vmem:[#allocation11_spill] sm:$0xff]  ;;  %v2889_v44 = vadd.f32 %v3547_v24, %v2888_v1  ;;  %v3549_v8 = vpop.eup %3548  ;;  %v2055_v24 = vsel %vm1991_vm2, %v4442_v21, 1073741824 }
 0x55e   : > { %2469 = vst.msk [vmem:[#allocation6] sm:$0xff] %vm1844_vm3, %v2453_v46  ;;  %vm1998_vm15 = vcmp.eq.f32.partialorder %v6470_v61, %v5291_v20  ;;  %v2661_v23 = vsub.f32 %v6471_v37, %v5505_v10  ;;  %v6472_v46 = vld [vmem:[#allocation13_spill] sm:$0xff]  ;;  %v2310_v25 = vsel %vm2309_vm4, %v2053_v11, %v2054_v5  ;;  %v2195_v37 = vand.u32 65535, %v5554_v32  ;;  %v6475_v11 = vld [vmem:[#allocation16_spill] sm:$0xff]  ;;  %v6477_v5 = vld [vmem:[#allocation70_spill] sm:$0xff] }
 0x55f   : > { %v2662_v34 = vsub.f32 %v6472_v46, %v5505_v10  ;;  %v2062_v45 = vsel %vm1998_vm15, %v4439_v17, 1073741824  ;;  %v2890_v1 = vadd.f32 %v3549_v8, %v2889_v44  ;;  %vm2311_vm13 = vcmp.lt.s32.totalorder %v2310_v25, %v2055_v24  ;;  %v6476_v17 = vld [vmem:[#allocation73_spill] sm:$0xff]  ;;  %v6478_v8 = vld [vmem:[#allocation12_spill] sm:$0xff] }
 0x560   : > { %vm2349_vm0 = vcmp.lt.s32.totalorder %v2061_v60, %v2062_v45  ;;  %v2670_v7 = vsub.f32 %v6475_v11, %v5515_v13  ;;  %v2520_v32 = vsub.f32 %v6477_v5, %v6476_v17  ;;  %v2197_v44 = vcvt.s32.f32 %v2195_v37 }
 0x561   : > { %v2727_v46 = vmul.f32 1.442695, %v2662_v34  ;;  %v6479_v34 = vld [vmem:[#allocation55_spill] sm:$0xff]  ;;  %v2350_v11 = vsel %vm2349_vm0, %v2061_v60, %v2062_v45  ;;  %v2671_v45 = vsub.f32 %v4554_v55, %v5515_v13  ;;  %v2672_v55 = vsub.f32 %v4577_v53, %v5515_v13 }
 0x562   : > { %vm1999_vm6 = vcmp.eq.f32.partialorder %v6479_v34, %v5291_v20  ;;  %v2743_v17 = vmul.f32 1.442695, %v2670_v7  ;;  %v2539_v60 = vmul.f32 1.442695, %v2520_v32  ;;  %v6484_v53 = vld [vmem:[#allocation31_spill] sm:$0xff] }
 0x563   : > { %v2063_v37 = vsel %vm1999_vm6, %v4442_v21, 1073741824  ;;  %v2745_v7 = vmul.f32 1.442695, %v2671_v45 }
 0x564   : > { %vm2351_vm14 = vcmp.lt.s32.totalorder %v2350_v11, %v2063_v37 }
 0x565   : > { %v5692_v18 = vpop.xlane.xlu1 %2179 }
 0x566   : > { %vm2181_vm1 = vcmp.eq.f32.partialorder %v5559_v57, %v5692_v18  ;;  %v2725_v57 = vmul.f32 1.442695, %v2661_v23  ;;  %v2663_v23 = vsub.f32 %v6478_v8, %v5505_v10  ;;  %v2678_v8 = vsub.f32 %v4638_v38, %v5540_v31 }
 0x567   : > { %v2182_v56 = vsel %vm2181_vm1, %v2177_v12, inf  ;;  %v6474_v12 = vld [vmem:[#allocation15_spill] sm:$0xff]  ;;  %v2685_v38 = vsub.f32 %v6431_v41, %v5546_v54  ;;  %v2679_v41 = vsub.f32 %v4635_v14, %v5540_v31 }
 0x568   : > { %2183 = vmin.xlane.f32.xlu0 %v2182_v56  ;;  %v2669_v61 = vsub.f32 %v6474_v12, %v5515_v13  ;;  %3550 = vpow2.f32 %v2725_v57  ;;  %v6480_v56 = vld [vmem:[#allocation51_spill] sm:$0xff]  ;;  %v2312_v12 = vsel %vm2311_vm13, %v2310_v25, %v2055_v24  ;;  %v6481_v57 = vld [vmem:[#allocation14_spill] sm:$0xff]  ;;  %v2729_v36 = vmul.f32 1.442695, %v2663_v23 }
 0x569   : > { %v5708_v39 = vpop.xlane.xlu1 %2199  ;;  %vm1992_vm4 = vcmp.eq.f32.partialorder %v6480_v56, %v5270_v42  ;;  %3552 = vpow2.f32 %v2727_v46  ;;  %v2664_v34 = vsub.f32 %v6481_v57, %v5505_v10  ;;  %v2759_v21 = vmul.f32 1.442695, %v2678_v8 }
 0x56a   : > { %vm2201_vm5 = vcmp.eq.f32.partialorder %v5566_v40, %v5708_v39  ;;  %v2677_v40 = vsub.f32 %v4629_v48, %v5540_v31  ;;  %v2056_v25 = vsel %vm1992_vm4, %v4445_v29, 1073741824  ;;  %v2686_v10 = vsub.f32 %v6432_v59, %v5546_v54 }
 0x56b   : > { %v2202_v27 = vsel %vm2201_vm5, %v2197_v44, inf  ;;  %vm2313_vm15 = vcmp.lt.s32.totalorder %v2312_v12, %v2056_v25  ;;  %v2731_v24 = vmul.f32 1.442695, %v2664_v34  ;;  %v2773_v23 = vmul.f32 1.442695, %v2685_v38  ;;  %v6483_v44 = vld [vmem:[#allocation29_spill] sm:$0xff] }
 0x56c   : > { %2891 = vadd.xlane.f32.xlu0 %v2890_v1  ;;  %v2741_v1 = vmul.f32 1.442695, %v2669_v61  ;;  %v2757_v48 = vmul.f32 1.442695, %v2677_v40  ;;  %v6482_v61 = vld [vmem:[#allocation58_spill] sm:$0xff]  ;;  %v5744_v46 = vsel %vm2313_vm15, %v2312_v12, %v2056_v25  ;;  %v2693_v59 = vsub.f32 %v6483_v44, %v5551_v50 }
 0x56d   : > { %vm2000_vm1 = vcmp.eq.f32.partialorder %v6482_v61, %v5291_v20  ;;  %v2775_v34 = vmul.f32 1.442695, %v2686_v10  ;;  %v2694_v13 = vsub.f32 %v6484_v53, %v5551_v50  ;;  %v2316_v12 = vshra.s32 %v5744_v46, 16 }
 0x56e   : > { %3554 = vpow2.f32 %v2741_v1  ;;  %v2064_v32 = vsel %vm2000_vm1, %v4445_v29, 1073741824  ;;  %v2747_v1 = vmul.f32 1.442695, %v2672_v55  ;;  %v2680_v29 = vsub.f32 %v4675_v19, %v5540_v31  ;;  %v6488_v55 = vld [vmem:[#allocation37_spill] sm:$0xff] }
 0x56f   : > { %3556 = vpow2.f32 %v2743_v17  ;;  %v2761_v14 = vmul.f32 1.442695, %v2679_v41  ;;  %v2687_v40 = vsub.f32 %v6436_v4, %v5546_v54  ;;  %v2789_v8 = vmul.f32 1.442695, %v2693_v59  ;;  %v2504_v59 = vld [vmem:[#allocation4 + $0x18] sm:$0xff] }
 0x570   : > { %2203 = vmin.xlane.f32.xlu0 %v2202_v27  ;;  %v2352_v27 = vsel %vm2351_vm14, %v2350_v11, %v2063_v37  ;;  %3558 = vpow2.f32 %v2729_v36  ;;  %v2791_v37 = vmul.f32 1.442695, %v2694_v13  ;;  %v5760_v57 = vcvt.s32.f32 %v2316_v12 }
 0x571   : > { %3560 = vpow2.f32 %v2539_v60  ;;  %vm2353_vm2 = vcmp.lt.s32.totalorder %v2352_v27, %v2064_v32  ;;  %v2763_v45 = vmul.f32 1.442695, %v2680_v29  ;;  %v2777_v4 = vmul.f32 1.442695, %v2687_v40 }
 0x572   : > { %3562 = vpow2.f32 %v2757_v48  ;;  %v3551_v36 = vpop.eup %3550  ;;  %v5758_v17 = vsel %vm2353_vm2, %v2352_v27, %v2064_v32  ;;  %v6485_v48 = vld [vmem:[#allocation27_spill] sm:$0xff] }
 0x573   : > { %3564 = vpow2.f32 %v2759_v21  ;;  %v3553_v11 = vpop.eup %3552  ;;  %v2688_v19 = vsub.f32 %v6485_v48, %v5546_v54  ;;  %v2356_v31 = vshra.s32 %v5758_v17, 16  ;;  %v6486_v21 = vld [vmem:[#allocation30_spill] sm:$0xff]  ;;  %v6489_v32 = vld [vmem:[#allocation39_spill] sm:$0xff] }
 0x574   : > { %3566 = vpow2.f32 %v2731_v24  ;;  %v2853_v25 = vadd.f32 %v3553_v11, %v3551_v36  ;;  %v2695_v10 = vsub.f32 %v6486_v21, %v5551_v50  ;;  %v6487_v24 = vld [vmem:[#allocation17_spill] sm:$0xff]  ;;  %v6490_v11 = vld [vmem:[#allocation35_spill] sm:$0xff] }
 0x575   : > { %3568 = vpow2.f32 %v2745_v7  ;;  %v2701_v7 = vsub.f32 %v6488_v55, %v6487_v24  ;;  %v2702_v54 = vsub.f32 %v6489_v32, %v6487_v24  ;;  %v5773_v53 = vcvt.s32.f32 %v2356_v31 }
 0x576   : > { %3570 = vpow2.f32 %v2773_v23  ;;  %v2106_v23 = vcvt.f32.s32 %v5578_v62  ;;  %v2793_v29 = vmul.f32 1.442695, %v2695_v10 }
 0x577   : > { %3572 = vpow2.f32 %v2775_v34  ;;  %v2779_v34 = vmul.f32 1.442695, %v2688_v19  ;;  %v2807_v19 = vmul.f32 1.442695, %v2702_v54 }
 0x578   : > { %v3555_v60 = vpop.eup %3554  ;;  %3574 = vpow2.f32 %v2747_v1  ;;  %v2696_v1 = vsub.f32 %v6490_v11, %v5551_v50 }
 0x579   : > { %v3557_v38 = vpop.eup %3556  ;;  %3576 = vpow2.f32 %v2761_v14  ;;  %v5777_v14 = vpop.permute.xlu1 %2628 }
 0x57a   : > { %v3559_v27 = vpop.eup %3558  ;;  %3578 = vpow2.f32 %v2789_v8  ;;  %v2863_v13 = vadd.f32 %v3557_v38, %v3555_v60  ;;  %v6491_v8 = vld [vmem:[#allocation38_spill] sm:$0xff]  ;;  %v2107_v60 = vshll.u32 %v2106_v23, 16  ;;  %v2697_v50 = vsub.f32 %v6453_v28, %v5777_v14  ;;  %v6492_v23 = vld [vmem:[#allocation65_spill] sm:$0xff] }
 0x57b   : > { %v3561_v41 = vpop.eup %3560  ;;  %3580 = vpow2.f32 %v2791_v37  ;;  %v2854_v44 = vadd.f32 %v3559_v27, %v2853_v25  ;;  %v2703_v62 = vsub.f32 %v6491_v8, %v6487_v24  ;;  %v2805_v37 = vmul.f32 1.442695, %v2701_v7  ;;  %v6493_v8 = vld [vmem:[#allocation43_spill] sm:$0xff] }
 0x57c   : > { %v3563_v36 = vpop.eup %3562  ;;  %3582 = vpow2.f32 %v2763_v45  ;;  %v2568_v45 = vmul.f32 %v3561_v41, %v2504_v59  ;;  %v2795_v55 = vmul.f32 1.442695, %v2696_v1  ;;  %v2698_v7 = vsub.f32 %v6454_v52, %v5777_v14 }
 0x57d   : > { %v3565_v12 = vpop.eup %3564  ;;  %3584 = vpow2.f32 %v2777_v4  ;;  %v2809_v54 = vmul.f32 1.442695, %v2703_v62  ;;  %vm2422_vm13 = vcmp.gt.f32.partialorder %v6492_v23, %v6458_v47  ;;  %v2126_v28 = vcvt.f32.s32 %v5588_v63 }
 0x57e   : > { %v3567_v40 = vpop.eup %3566  ;;  %3586 = vpow2.f32 %v2779_v34  ;;  %v2873_v10 = vadd.f32 %v3565_v12, %v3563_v36  ;;  %v2797_v11 = vmul.f32 1.442695, %v2697_v50  ;;  %v2704_v62 = vsub.f32 %v6493_v8, %v6487_v24 }
 0x57f   : > { %2319 = vmin.xlane.f32.xlu1 %v5760_v57  ;;  %v3569_v48 = vpop.eup %3568  ;;  %v2855_v38 = vadd.f32 %v3567_v40, %v2854_v44  ;;  %3588 = vpow2.f32 %v2793_v29  ;;  %v2438_v44 = vld [vmem:[#allocation6 + $0x8] sm:$0xff] }
 0x580   : > { %v3571_v4 = vpop.eup %3570  ;;  %v2864_v21 = vadd.f32 %v3569_v48, %v2863_v13  ;;  %3590 = vpow2.f32 %v2805_v37  ;;  %v2799_v37 = vmul.f32 1.442695, %v2698_v7  ;;  %v2811_v47 = vmul.f32 1.442695, %v2704_v62 }
 0x581   : > { %v3573_v27 = vpop.eup %3572  ;;  %3592 = vpow2.f32 %v2807_v19  ;;  %v2127_v19 = vshll.u32 %v2126_v28, 16 }
 0x582   : > { %v3575_v41 = vpop.eup %3574  ;;  %v2883_v29 = vadd.f32 %v3573_v27, %v3571_v4  ;;  %3594 = vpow2.f32 %v2795_v55  ;;  %v2700_v55 = vsub.f32 %v6456_v33, %v5777_v14 }
 0x583   : > { %2359 = vmin.xlane.f32.xlu1 %v5773_v53  ;;  %v2104_v25 = vpop.xlane.xlu0 %2103  ;;  %v3577_v34 = vpop.eup %3576  ;;  %v2865_v52 = vadd.f32 %v3575_v41, %v2864_v21  ;;  %3596 = vpow2.f32 %v2809_v54  ;;  %v6495_v54 = vld [vmem:[#allocation68_spill] sm:$0xff] }
 0x584   : > { %v2105_v31 = vcvt.f32.s32 %v2104_v25  ;;  %v3579_v12 = vpop.eup %3578  ;;  %v2874_v1 = vadd.f32 %v3577_v34, %v2873_v10  ;;  %3598 = vpow2.f32 %v2797_v11  ;;  %v2439_v10 = vld [vmem:[#allocation6 + $0x10] sm:$0xff] }
 0x585   : > { %v3581_v40 = vpop.eup %3580  ;;  %3600 = vpow2.f32 %v2799_v37 }
 0x586   : > { %v2108_v32 = vadd.s32 %v2107_v60, %v2105_v31  ;;  %v3583_v63 = vpop.eup %3582  ;;  %v2699_v60 = vsub.f32 %v6455_v0, %v5777_v14  ;;  %v2893_v4 = vadd.f32 %v3581_v40, %v3579_v12  ;;  %v6494_v0 = vld [vmem:[#allocation67_spill] sm:$0xff]  ;;  %3602 = vpow2.f32 %v2811_v47 }
 0x587   : > { %2856 = vadd.xlane.f32.xlu1 %v2855_v38  ;;  %v2872_v59 = vpop.xlane.xlu0 %2871  ;;  %v3585_v48 = vpop.eup %3584  ;;  %v2875_v24 = vadd.f32 %v3583_v63, %v2874_v1  ;;  %vm2423_vm0 = vcmp.gt.f32.partialorder %v6495_v54, %v6494_v0  ;;  %v2215_v1 = vand.u32 65535, %v5599_v9 }
 0x588   : > { %v2390_v36 = vadd.s32 %v2108_v32, %v6463_v2  ;;  %v2936_v13 = vadd.f32 %v2872_v59, %v2568_v45  ;;  %v2884_v38 = vadd.f32 %v3585_v48, %v2883_v29  ;;  %v3587_v21 = vpop.eup %3586  ;;  %v2801_v7 = vmul.f32 1.442695, %v2699_v60 }
 0x589   : > { %v3589_v27 = vpop.eup %3588 }
 0x58a   : > { %v2454_v25 = vsel %vm2422_vm13, %v2390_v36, %v2438_v44  ;;  %2952 = vst.msk [vmem:[#allocation4 + $0x18] sm:$0xff] %vm1844_vm3, %v2936_v13  ;;  %v3591_v41 = vpop.eup %3590  ;;  %v2885_v23 = vadd.f32 %v3587_v21, %v2884_v38  ;;  %v2894_v44 = vadd.f32 %v3589_v27, %v2893_v4  ;;  %3604 = vpow2.f32 %v2801_v7  ;;  %v6498_v4 = vld [vmem:[#allocation40_spill] sm:$0xff]  ;;  %v2506_v27 = vld [vmem:[#allocation4 + $0x28] sm:$0xff] }
 0x58b   : > { %2470 = vst.msk [vmem:[#allocation6 + $0x8] sm:$0xff] %vm1844_vm3, %v2454_v25  ;;  %2866 = vadd.xlane.f32.xlu1 %v2865_v52  ;;  %v2124_v45 = vpop.xlane.xlu0 %2123  ;;  %v3593_v59 = vpop.eup %3592  ;;  %v2803_v36 = vmul.f32 1.442695, %v2700_v55  ;;  %v2217_v25 = vcvt.s32.f32 %v2215_v1  ;;  %v2146_v38 = vcvt.f32.s32 %v5633_v26 }
 0x58c   : > { %v2125_v31 = vcvt.f32.s32 %v2124_v45  ;;  %v3595_v28 = vpop.eup %3594  ;;  %v2903_v33 = vadd.f32 %v3593_v59, %v3591_v41  ;;  %v2440_v59 = vld [vmem:[#allocation6 + $0x18] sm:$0xff] }
 0x58d   : > { %v2895_v13 = vadd.f32 %v3595_v28, %v2894_v44  ;;  %v3597_v14 = vpop.eup %3596  ;;  %3606 = vpow2.f32 %v2803_v36  ;;  %v2147_v55 = vshll.u32 %v2146_v38, 16  ;;  %v2166_v28 = vcvt.f32.s32 %v5637_v3 }
 0x58e   : > { %v2128_v50 = vadd.s32 %v2127_v19, %v2125_v31  ;;  %v3599_v12 = vpop.eup %3598  ;;  %v2904_v52 = vadd.f32 %v3597_v14, %v2903_v33  ;;  %v6497_v19 = vld [vmem:[#allocation76_spill] sm:$0xff] }
 0x58f   : > { %2876 = vadd.xlane.f32.xlu1 %v2875_v24  ;;  %v3601_v11 = vpop.eup %3600  ;;  %v6502_v14 = vld [vmem:[#allocation44_spill] sm:$0xff]  ;;  %v2167_v1 = vshll.u32 %v2166_v28, 16  ;;  %v6510_v28 = vld [vmem:[#allocation57_spill] sm:$0xff] }
 0x590   : > { %v2391_v32 = vadd.s32 %v2128_v50, %v6463_v2  ;;  %v2898_v29 = vadd.f32 %v3601_v11, %v3599_v12  ;;  %v3603_v40 = vpop.eup %3602  ;;  %v6499_v50 = vld [vmem:[#allocation41_spill] sm:$0xff] }
 0x591   : > { %v2905_v8 = vadd.f32 %v3603_v40, %v2904_v52 }
 0x592   : > { %v2455_v34 = vsel %vm2423_vm0, %v2391_v32, %v2439_v10 }
 0x593   : > { %2471 = vst.msk [vmem:[#allocation6 + $0x10] sm:$0xff] %vm1844_vm3, %v2455_v34  ;;  %2886 = vadd.xlane.f32.xlu1 %v2885_v23  ;;  %v6500_v23 = vld [vmem:[#allocation42_spill] sm:$0xff] }
 0x594   : > { %v3605_v62 = vpop.eup %3604 }
 0x595   : > { %v2899_v63 = vadd.f32 %v3605_v62, %v2898_v29 }
 0x597   : > { %2896 = vadd.xlane.f32.xlu1 %v2895_v13  ;;  %v3607_v48 = vpop.eup %3606  ;;  %v6501_v13 = vld [vmem:[#allocation71_spill] sm:$0xff] }
 0x598   : > { %v2900_v9 = vadd.f32 %v3607_v48, %v2899_v63  ;;  %vm2424_vm6 = vcmp.gt.f32.partialorder %v6501_v13, %v6477_v5  ;;  %v6504_v63 = vld [vmem:[#allocation74_spill] sm:$0xff] }
 0x59b   : > { %2243 = vmin.xlane.f32.xlu1 %v5571_v58  ;;  %v6496_v58 = vld [vmem:[#allocation79_spill] sm:$0xff] }
 0x59c   : > { %v2522_v60 = vsub.f32 %v6497_v19, %v6496_v58 }
 0x59e   : > { %v5807_v37 = vpop.xlane.xlu1 %2219  ;;  %v2543_v31 = vmul.f32 1.442695, %v2522_v60 }
 0x59f   : > { %2906 = vadd.xlane.f32.xlu1 %v2905_v8  ;;  %vm2221_vm5 = vcmp.eq.f32.partialorder %v5610_v51, %v5807_v37  ;;  %v2441_v8 = vld [vmem:[#allocation6 + $0x20] sm:$0xff] }
 0x5a0   : > { %v2222_v45 = vsel %vm2221_vm5, %v2217_v25, inf  ;;  %3608 = vpow2.f32 %v2543_v31  ;;  %v6503_v25 = vld [vmem:[#allocation72_spill] sm:$0xff] }
 0x5a1   : > { %2223 = vmin.xlane.f32.xlu0 %v2222_v45  ;;  %vm2425_vm4 = vcmp.gt.f32.partialorder %v6504_v63, %v6503_v25 }
 0x5a2   : > { %v2639_v24 = vpop.permute.xlu1 %2638 }
 0x5a3   : > { %2283 = vmin.xlane.f32.xlu1 %v5612_v15  ;;  %v2705_v47 = vsub.f32 %v6498_v4, %v2639_v24  ;;  %v2706_v51 = vsub.f32 %v6499_v50, %v2639_v24  ;;  %v2707_v44 = vsub.f32 %v6500_v23, %v2639_v24  ;;  %v2708_v12 = vsub.f32 %v6502_v14, %v2639_v24 }
 0x5a5   : > { %2901 = vadd.xlane.f32.xlu0 %v2900_v9  ;;  %v2813_v7 = vmul.f32 1.442695, %v2705_v47  ;;  %v2815_v32 = vmul.f32 1.442695, %v2706_v51  ;;  %v2817_v11 = vmul.f32 1.442695, %v2707_v44 }
 0x5a6   : > { %v2819_v40 = vmul.f32 1.442695, %v2708_v12  ;;  %v2255_v9 = vand.u32 65535, %v5650_v43 }
 0x5a7   : > { %3610 = vpow2.f32 %v2813_v7  ;;  %v6507_v7 = vld [vmem:[#allocation50_spill] sm:$0xff] }
 0x5a8   : > { %3612 = vpow2.f32 %v2815_v32  ;;  %v2257_v24 = vcvt.s32.f32 %v2255_v9 }
 0x5a9   : > { %3614 = vpow2.f32 %v2817_v11 }
 0x5aa   : > { %v3609_v21 = vpop.eup %3608  ;;  %3616 = vpow2.f32 %v2819_v40 }
 0x5ab   : > { %v2570_v54 = vmul.f32 %v3609_v21, %v2506_v27  ;;  %v6505_v21 = vld [vmem:[#allocation48_spill] sm:$0xff]  ;;  %v6506_v27 = vld [vmem:[#allocation49_spill] sm:$0xff] }
 0x5b1   : > { %v3611_v5 = vpop.eup %3610 }
 0x5b2   : > { %v3613_v48 = vpop.eup %3612 }
 0x5b3   : > { %v2908_v58 = vadd.f32 %v3613_v48, %v3611_v5  ;;  %v3615_v60 = vpop.eup %3614 }
 0x5b4   : > { %v3617_v47 = vpop.eup %3616 }
 0x5b5   : > { %v2909_v38 = vadd.f32 %v3615_v60, %v2908_v58 }
 0x5b7   : > { %v2910_v51 = vadd.f32 %v3617_v47, %v2909_v38 }
 0x5bc   : > { %v2144_v10 = vpop.xlane.xlu0 %2143 }
 0x5bd   : > { %v2145_v15 = vcvt.f32.s32 %v2144_v10 }
 0x5bf   : > { %v2148_v41 = vadd.s32 %v2147_v55, %v2145_v15  ;;  %v6508_v15 = vld [vmem:[#allocation52_spill] sm:$0xff] }
 0x5c0   : > { %v2882_v34 = vpop.xlane.xlu0 %2881 }
 0x5c1   : > { %v2392_v26 = vadd.s32 %v2148_v41, %v6463_v2  ;;  %v2938_v36 = vadd.f32 %v2882_v34, %v2570_v54 }
 0x5c3   : > { %v2456_v33 = vsel %vm2424_vm6, %v2392_v26, %v2440_v59  ;;  %2954 = vst.msk [vmem:[#allocation4 + $0x28] sm:$0xff] %vm1844_vm3, %v2938_v36  ;;  %v6511_v36 = vld [vmem:[#allocation59_spill] sm:$0xff] }
 0x5c4   : > { %2472 = vst.msk [vmem:[#allocation6 + $0x18] sm:$0xff] %vm1844_vm3, %v2456_v33  ;;  %v2164_v52 = vpop.xlane.xlu0 %2163  ;;  %v6512_v33 = vld [vmem:[#allocation60_spill] sm:$0xff] }
 0x5c5   : > { %v2165_v29 = vcvt.f32.s32 %v2164_v52 }
 0x5c7   : > { %v2168_v3 = vadd.s32 %v2167_v1, %v2165_v29  ;;  %v6513_v29 = vld [vmem:[#allocation85_spill] sm:$0xff] }
 0x5c9   : > { %v2393_v62 = vadd.s32 %v2168_v3, %v6463_v2  ;;  %v6514_v3 = vld [vmem:[#allocation82_spill] sm:$0xff] }
 0x5ca   : > { %v2524_v40 = vsub.f32 %v6514_v3, %v6513_v29 }
 0x5cb   : > { %v2457_v45 = vsel %vm2425_vm4, %v2393_v62, %v2441_v8 }
 0x5cc   : > { %2473 = vst.msk [vmem:[#allocation6 + $0x20] sm:$0xff] %vm1844_vm3, %v2457_v45  ;;  %v2547_v63 = vmul.f32 1.442695, %v2524_v40 }
 0x5d3   : > { %v5830_v31 = vpop.xlane.xlu1 %2259 }
 0x5d4   : > { %vm2261_vm14 = vcmp.eq.f32.partialorder %v5656_v6, %v5830_v31  ;;  %v6509_v6 = vld [vmem:[#allocation56_spill] sm:$0xff] }
 0x5d5   : > { %v2262_v4 = vsel %vm2261_vm14, %v2257_v24, inf }
 0x5d6   : > { %2263 = vmin.xlane.f32.xlu0 %v2262_v4 }
 0x5d7   : > { %v2649_v50 = vpop.permute.xlu1 %2648 }
 0x5d8   : > { %v2713_v10 = vsub.f32 %v6505_v21, %v2649_v50  ;;  %v2714_v55 = vsub.f32 %v6506_v27, %v2649_v50  ;;  %v2715_v43 = vsub.f32 %v6507_v7, %v2649_v50  ;;  %v2716_v32 = vsub.f32 %v6508_v15, %v2649_v50  ;;  %v2508_v21 = vld [vmem:[#allocation4 + $0x38] sm:$0xff] }
 0x5d9   : > { %v2186_v50 = vcvt.f32.s32 %v5692_v18 }
 0x5da   : > { %v2829_v41 = vmul.f32 1.442695, %v2713_v10  ;;  %v2831_v54 = vmul.f32 1.442695, %v2714_v55  ;;  %v2833_v23 = vmul.f32 1.442695, %v2715_v43  ;;  %2911 = vadd.xlane.f32.xlu0 %v2910_v51 }
 0x5db   : > { %v2835_v44 = vmul.f32 1.442695, %v2716_v32  ;;  %v2659_v59 = vpop.permute.xlu1 %2658  ;;  %v2187_v10 = vshll.u32 %v2186_v50, 16  ;;  %v6515_v55 = vld [vmem:[#allocation21_spill] sm:$0xff] }
 0x5dc   : > { %3618 = vpow2.f32 %v2829_v41  ;;  %v2721_v34 = vsub.f32 %v6509_v6, %v2659_v59  ;;  %v2722_v26 = vsub.f32 %v6510_v28, %v2659_v59  ;;  %v2723_v13 = vsub.f32 %v6511_v36, %v2659_v59  ;;  %v2442_v41 = vld [vmem:[#allocation6 + $0x28] sm:$0xff]  ;;  %v6516_v6 = vld [vmem:[#allocation94_spill] sm:$0xff] }
 0x5dd   : > { %3620 = vpow2.f32 %v2831_v54  ;;  %v2724_v14 = vsub.f32 %v6512_v33, %v2659_v59  ;;  %v2709_v7 = vsub.f32 %v6467_v35, %v6515_v55  ;;  %v2710_v43 = vsub.f32 %v6468_v22, %v6515_v55  ;;  %v6519_v36 = vld [vmem:[#allocation54_spill] sm:$0xff] }
 0x5de   : > { %3622 = vpow2.f32 %v2833_v23  ;;  %v2845_v12 = vmul.f32 1.442695, %v2721_v34  ;;  %v2847_v11 = vmul.f32 1.442695, %v2722_v26  ;;  %2303 = vmin.xlane.f32.xlu0 %v5621_v16  ;;  %v2849_v52 = vmul.f32 1.442695, %v2723_v13 }
 0x5df   : > { %3624 = vpow2.f32 %v2835_v44  ;;  %v2851_v1 = vmul.f32 1.442695, %v2724_v14  ;;  %v2206_v23 = vcvt.f32.s32 %v5708_v39  ;;  %v2821_v59 = vmul.f32 1.442695, %v2709_v7  ;;  %v6517_v34 = vld [vmem:[#allocation53_spill] sm:$0xff]  ;;  %v6520_v33 = vld [vmem:[#allocation46_spill] sm:$0xff] }
 0x5e0   : > { %3626 = vpow2.f32 %v2845_v12  ;;  %v2717_v28 = vsub.f32 %v6517_v34, %v6516_v6  ;;  %v6518_v26 = vld [vmem:[#allocation77_spill] sm:$0xff]  ;;  %v2823_v35 = vmul.f32 1.442695, %v2710_v43  ;;  %v2718_v22 = vsub.f32 %v6519_v36, %v6516_v6 }
 0x5e1   : > { %3628 = vpow2.f32 %v2847_v11  ;;  %vm2426_vm15 = vcmp.gt.f32.partialorder %v6518_v26, %v6497_v19  ;;  %v2711_v14 = vsub.f32 %v6520_v33, %v6515_v55  ;;  %v2207_v12 = vshll.u32 %v2206_v23, 16 }
 0x5e2   : > { %2343 = vmin.xlane.f32.xlu0 %v5664_v30  ;;  %3630 = vpow2.f32 %v2849_v52  ;;  %v2837_v52 = vmul.f32 1.442695, %v2717_v28  ;;  %v2839_v29 = vmul.f32 1.442695, %v2718_v22  ;;  %v2355_v43 = vand.u32 65535, %v5758_v17  ;;  %v2501_v17 = vld [vmem:[#allocation4] sm:$0xff] }
 0x5e3   : > { %3632 = vpow2.f32 %v2851_v1  ;;  %v6521_v1 = vld [vmem:[#allocation69_spill] sm:$0xff] }
 0x5e4   : > { %3634 = vpow2.f32 %v2547_v63  ;;  %v2519_v19 = vsub.f32 %v6494_v0, %v6521_v1  ;;  %v6527_v0 = vld [vmem:[#allocation80_spill] sm:$0xff] }
 0x5e5   : > { %3636 = vpow2.f32 %v2821_v59 }
 0x5e6   : > { %v3619_v8 = vpop.eup %3618  ;;  %2383 = vmin.xlane.f32.xlu0 %v5672_v49  ;;  %3638 = vpow2.f32 %v2823_v35  ;;  %v6531_v35 = vld [vmem:[#allocation87_spill] sm:$0xff] }
 0x5e7   : > { %v3621_v62 = vpop.eup %3620  ;;  %3640 = vpow2.f32 %v2837_v52 }
 0x5e8   : > { %v3623_v5 = vpop.eup %3622  ;;  %v2918_v45 = vadd.f32 %v3621_v62, %v3619_v8  ;;  %v6522_v8 = vld [vmem:[#allocation61_spill] sm:$0xff]  ;;  %v6523_v62 = vld [vmem:[#allocation63_spill] sm:$0xff]  ;;  %3642 = vpow2.f32 %v2839_v29 }
 0x5e9   : > { %v3625_v16 = vpop.eup %3624  ;;  %v6524_v63 = vsub.f32 %v6522_v8, %v6523_v62  ;;  %v2505_v62 = vld [vmem:[#allocation4 + $0x20] sm:$0xff] }
 0x5ea   : > { %v3627_v48 = vpop.eup %3626  ;;  %v2919_v9 = vadd.f32 %v3623_v5, %v2918_v45  ;;  %v2712_v45 = vsub.f32 %v6480_v56, %v6515_v55  ;;  %v2720_v56 = vsub.f32 %v6482_v61, %v6516_v6  ;;  %v6529_v55 = vld [vmem:[#allocation81_spill] sm:$0xff] }
 0x5eb   : > { %v3629_v58 = vpop.eup %3628  ;;  %v2533_v5 = vmul.f32 1.442695, %v6524_v63 }
 0x5ec   : > { %v2920_v60 = vadd.f32 %v3625_v16, %v2919_v9  ;;  %v2928_v24 = vadd.f32 %v3629_v58, %v3627_v48  ;;  %v3631_v30 = vpop.eup %3630  ;;  %v2443_v16 = vld [vmem:[#allocation6 + $0x30] sm:$0xff]  ;;  %v2825_v48 = vmul.f32 1.442695, %v2711_v14  ;;  %v6525_v9 = vld [vmem:[#allocation55_spill] sm:$0xff]  ;;  %v2827_v50 = vmul.f32 1.442695, %v2712_v45 }
 0x5ed   : > { %v3633_v4 = vpop.eup %3632  ;;  %v2719_v58 = vsub.f32 %v6525_v9, %v6516_v6  ;;  %3644 = vpow2.f32 %v2533_v5  ;;  %v2357_v6 = vcvt.s32.f32 %v2355_v43  ;;  %v6533_v45 = vld [vmem:[#allocation89_spill] sm:$0xff] }
 0x5ee   : > { %2921 = vadd.xlane.f32.xlu0 %v2920_v60  ;;  %v2929_v38 = vadd.f32 %v3631_v30, %v2928_v24  ;;  %v3635_v49 = vpop.eup %3634  ;;  %v6526_v24 = vld [vmem:[#allocation78_spill] sm:$0xff]  ;;  %v2537_v30 = vmul.f32 1.442695, %v2519_v19  ;;  %3646 = vpow2.f32 %v2825_v48 }
 0x5ef   : > { %v2572_v32 = vmul.f32 %v3635_v49, %v2508_v21  ;;  %vm2427_vm1 = vcmp.gt.f32.partialorder %v6527_v0, %v6526_v24  ;;  %v2841_v49 = vmul.f32 1.442695, %v2719_v58  ;;  %v3637_v21 = vpop.eup %3636  ;;  %v2523_v7 = vsub.f32 %v6526_v24, %v6529_v55  ;;  %v6536_v24 = vld [vmem:[#allocation101_spill] sm:$0xff]  ;;  %v6537_v0 = vld [vmem:[#allocation99_spill] sm:$0xff] }
 0x5f0   : > { %v2930_v47 = vadd.f32 %v3633_v4, %v2929_v38  ;;  %v6528_v4 = vld [vmem:[#allocation75_spill] sm:$0xff]  ;;  %3648 = vpow2.f32 %v2537_v30  ;;  %v2526_v30 = vsub.f32 %v6537_v0, %v6536_v24 }
 0x5f1   : > { %3650 = vpow2.f32 %v2827_v50 }
 0x5f2   : > { %2931 = vadd.xlane.f32.xlu0 %v2930_v47  ;;  %v2521_v47 = vsub.f32 %v6503_v25, %v6528_v4  ;;  %3652 = vpow2.f32 %v2841_v49  ;;  %v2843_v25 = vmul.f32 1.442695, %v2720_v56  ;;  %v2507_v4 = vld [vmem:[#allocation4 + $0x30] sm:$0xff]  ;;  %v2551_v49 = vmul.f32 1.442695, %v2526_v30 }
 0x5f5   : > { %v2184_v51 = vpop.xlane.xlu0 %2183 }
 0x5f6   : > { %v2185_v27 = vcvt.f32.s32 %v2184_v51  ;;  %v2315_v51 = vand.u32 65535, %v5744_v46 }
 0x5f8   : > { %v2188_v15 = vadd.s32 %v2187_v10, %v2185_v27  ;;  %v2541_v10 = vmul.f32 1.442695, %v2521_v47  ;;  %v3639_v27 = vpop.eup %3638 }
 0x5f9   : > { %v2892_v54 = vpop.xlane.xlu0 %2891  ;;  %v2913_v61 = vadd.f32 %v3639_v27, %v3637_v21  ;;  %v2509_v21 = vld [vmem:[#allocation4 + $0x40] sm:$0xff] }
 0x5fa   : > { %v2394_v18 = vadd.s32 %v2188_v15, %v6463_v2  ;;  %v2940_v44 = vadd.f32 %v2892_v54, %v2572_v32  ;;  %v2317_v32 = vcvt.s32.f32 %v2315_v51  ;;  %3654 = vpow2.f32 %v2541_v10 }
 0x5fb   : > { %v2545_v54 = vmul.f32 1.442695, %v2523_v7  ;;  %3656 = vpow2.f32 %v2843_v25  ;;  %v6538_v7 = vld [vmem:[#allocation18_spill] sm:$0xff] }
 0x5fc   : > { %v2458_v13 = vsel %vm2426_vm15, %v2394_v18, %v2442_v41  ;;  %2956 = vst.msk [vmem:[#allocation4 + $0x38] sm:$0xff] %vm1844_vm3, %v2940_v44  ;;  %v3641_v41 = vpop.eup %3640  ;;  %v2246_v25 = vcvt.f32.s32 %v6538_v7  ;;  %v6547_v7 = vld [vmem:[#allocation90_spill] sm:$0xff] }
 0x5fd   : > { %2474 = vst.msk [vmem:[#allocation6 + $0x28] sm:$0xff] %vm1844_vm3, %v2458_v13  ;;  %v2204_v39 = vpop.xlane.xlu0 %2203  ;;  %v3643_v46 = vpop.eup %3642  ;;  %3658 = vpow2.f32 %v2545_v54 }
 0x5fe   : > { %v2205_v11 = vcvt.f32.s32 %v2204_v39  ;;  %v3645_v18 = vpop.eup %3644  ;;  %v2923_v28 = vadd.f32 %v3643_v46, %v3641_v41  ;;  %v2247_v46 = vshll.u32 %v2246_v25, 16  ;;  %v2306_v25 = vcvt.f32.s32 %v6547_v7 }
 0x5ff   : > { %v3647_v44 = vpop.eup %3646  ;;  %v2565_v33 = vmul.f32 %v3645_v18, %v2501_v17 }
 0x600   : > { %v2208_v40 = vadd.s32 %v2207_v12, %v2205_v11  ;;  %v2914_v34 = vadd.f32 %v3647_v44, %v2913_v61  ;;  %v3649_v26 = vpop.eup %3648  ;;  %v2503_v11 = vld [vmem:[#allocation4 + $0x10] sm:$0xff] }
 0x601   : > { %v3651_v39 = vpop.eup %3650  ;;  %v2567_v29 = vmul.f32 %v3649_v26, %v2503_v11  ;;  %v2511_v61 = vld [vmem:[#allocation4 + $0x50] sm:$0xff] }
 0x602   : > { %v2395_v60 = vadd.s32 %v2208_v40, %v6463_v2  ;;  %v3653_v14 = vpop.eup %3652  ;;  %v2915_v1 = vadd.f32 %v3651_v39, %v2914_v34  ;;  %v6539_v34 = vld [vmem:[#allocation23_spill] sm:$0xff] }
 0x603   : > { %v2924_v19 = vadd.f32 %v3653_v14, %v2923_v28  ;;  %v2286_v28 = vcvt.f32.s32 %v6539_v34 }
 0x604   : > { %v2459_v38 = vsel %vm2427_vm1, %v2395_v60, %v2443_v16  ;;  %v6534_v16 = vld [vmem:[#allocation92_spill] sm:$0xff] }
 0x605   : > { %2475 = vst.msk [vmem:[#allocation6 + $0x30] sm:$0xff] %vm1844_vm3, %v2459_v38  ;;  %v6535_v48 = vsub.f32 %v6533_v45, %v6534_v16  ;;  %v2287_v11 = vshll.u32 %v2286_v28, 16 }
 0x607   : > { %v2553_v9 = vmul.f32 1.442695, %v6535_v48 }
 0x60c   : > { %v5885_v15 = vpop.xlane.xlu1 %2319 }
 0x60d   : > { %vm2321_vm2 = vcmp.eq.f32.partialorder %v5760_v57, %v5885_v15  ;;  %v6530_v57 = vld [vmem:[#allocation84_spill] sm:$0xff] }
 0x60e   : > { %v2322_v23 = vsel %vm2321_vm2, %v2317_v32, inf  ;;  %v6532_v36 = vsub.f32 %v6530_v57, %v6531_v35  ;;  %v2447_v57 = vld [vmem:[#allocation6 + $0x50] sm:$0xff] }
 0x60f   : > { %2323 = vmin.xlane.f32.xlu1 %v2322_v23  ;;  %v2226_v23 = vcvt.f32.s32 %v5807_v37 }
 0x610   : > { %v5889_v59 = vpop.xlane.xlu1 %2359  ;;  %v2549_v22 = vmul.f32 1.442695, %v6532_v36 }
 0x611   : > { %vm2361_vm13 = vcmp.eq.f32.partialorder %v5773_v53, %v5889_v59  ;;  %v3655_v53 = vpop.eup %3654  ;;  %v2227_v39 = vshll.u32 %v2226_v23, 16 }
 0x612   : > { %v2362_v13 = vsel %vm2361_vm13, %v2357_v6, inf  ;;  %3660 = vpow2.f32 %v2549_v22  ;;  %v3657_v40 = vpop.eup %3656  ;;  %v2569_v58 = vmul.f32 %v3655_v53, %v2505_v62  ;;  %v2445_v6 = vld [vmem:[#allocation6 + $0x40] sm:$0xff]  ;;  %v2444_v53 = vld [vmem:[#allocation6 + $0x38] sm:$0xff] }
 0x613   : > { %2363 = vmin.xlane.f32.xlu1 %v2362_v13  ;;  %v2925_v5 = vadd.f32 %v3657_v40, %v2924_v19  ;;  %v3659_v60 = vpop.eup %3658  ;;  %3662 = vpow2.f32 %v2553_v9  ;;  %v2510_v13 = vld [vmem:[#allocation4 + $0x48] sm:$0xff] }
 0x614   : > { %v2857_v12 = vpop.xlane.xlu1 %2856  ;;  %v2571_v50 = vmul.f32 %v3659_v60, %v2507_v4  ;;  %3664 = vpow2.f32 %v2551_v49  ;;  %v6544_v60 = vld [vmem:[#allocation104_spill] sm:$0xff]  ;;  %v6545_v49 = vld [vmem:[#allocation109_spill] sm:$0xff] }
 0x615   : > { %v2933_v52 = vadd.f32 %v2857_v12, %v2565_v33 }
 0x617   : > { %2949 = vst.msk [vmem:[#allocation4] sm:$0xff] %vm1844_vm3, %v2933_v52  ;;  %2916 = vadd.xlane.f32.xlu1 %v2915_v1 }
 0x618   : > { %v2867_v8 = vpop.xlane.xlu1 %2866 }
 0x619   : > { %v2935_v63 = vadd.f32 %v2867_v8, %v2567_v29 }
 0x61b   : > { %2951 = vst.msk [vmem:[#allocation4 + $0x10] sm:$0xff] %vm1844_vm3, %v2935_v63  ;;  %2926 = vadd.xlane.f32.xlu1 %v2925_v5  ;;  %v6541_v63 = vld [vmem:[#allocation83_spill] sm:$0xff] }
 0x61c   : > { %v2877_v38 = vpop.xlane.xlu1 %2876  ;;  %v3661_v56 = vpop.eup %3660  ;;  %vm2428_vm0 = vcmp.gt.f32.partialorder %v6541_v63, %v6514_v3  ;;  %v2266_v3 = vcvt.f32.s32 %v5830_v31  ;;  %v6549_v31 = vld [vmem:[#allocation108_spill] sm:$0xff]  ;;  %v2452_v63 = vld [vmem:[#allocation6 + $0x78] sm:$0xff] }
 0x61d   : > { %v2937_v47 = vadd.f32 %v2877_v38, %v2569_v58  ;;  %v2573_v27 = vmul.f32 %v3661_v56, %v2509_v21  ;;  %v3663_v32 = vpop.eup %3662  ;;  %v6543_v58 = vld [vmem:[#allocation105_spill] sm:$0xff] }
 0x61e   : > { %v2575_v44 = vmul.f32 %v3663_v32, %v2511_v61  ;;  %v3665_v36 = vpop.eup %3664  ;;  %v2528_v24 = vsub.f32 %v6544_v60, %v6543_v58  ;;  %v6548_v61 = vld [vmem:[#allocation110_spill] sm:$0xff] }
 0x61f   : > { %2953 = vst.msk [vmem:[#allocation4 + $0x20] sm:$0xff] %vm1844_vm3, %v2937_v47  ;;  %v2574_v19 = vmul.f32 %v3665_v36, %v2510_v13  ;;  %v2512_v47 = vld [vmem:[#allocation4 + $0x58] sm:$0xff]  ;;  %v6552_v13 = vld [vmem:[#allocation22_spill] sm:$0xff] }
 0x620   : > { %v2887_v51 = vpop.xlane.xlu1 %2886  ;;  %v2555_v30 = vmul.f32 1.442695, %v2528_v24  ;;  %v2516_v24 = vld [vmem:[#allocation4 + $0x78] sm:$0xff] }
 0x621   : > { %v2939_v10 = vadd.f32 %v2887_v51, %v2571_v50  ;;  %v2267_v50 = vshll.u32 %v2266_v3, 16  ;;  %v6546_v51 = vld [vmem:[#allocation107_spill] sm:$0xff] }
 0x622   : > { %3666 = vpow2.f32 %v2555_v30  ;;  %v2530_v21 = vsub.f32 %v6546_v51, %v6545_v49  ;;  %v6559_v51 = vld [vmem:[#allocation100_spill] sm:$0xff] }
 0x623   : > { %2955 = vst.msk [vmem:[#allocation4 + $0x30] sm:$0xff] %vm1844_vm3, %v2939_v10 }
 0x624   : > { %v2897_v55 = vpop.xlane.xlu1 %2896 }
 0x625   : > { %v2941_v43 = vadd.f32 %v2897_v55, %v2573_v27  ;;  %v2446_v27 = vld [vmem:[#allocation6 + $0x48] sm:$0xff] }
 0x627   : > { %2957 = vst.msk [vmem:[#allocation4 + $0x40] sm:$0xff] %vm1844_vm3, %v2941_v43 }
 0x628   : > { %v2244_v41 = vpop.xlane.xlu1 %2243 }
 0x629   : > { %v2245_v54 = vcvt.f32.s32 %v2244_v41  ;;  %v2559_v41 = vmul.f32 1.442695, %v2530_v21  ;;  %v6560_v21 = vld [vmem:[#allocation98_spill] sm:$0xff] }
 0x62b   : > { %v2248_v18 = vadd.s32 %v2247_v46, %v2245_v54  ;;  %v2532_v46 = vsub.f32 %v6549_v31, %v6548_v61  ;;  %3668 = vpow2.f32 %v2559_v41  ;;  %v2449_v61 = vld [vmem:[#allocation6 + $0x60] sm:$0xff] }
 0x62c   : > { %v2907_v17 = vpop.xlane.xlu1 %2906  ;;  %v3667_v38 = vpop.eup %3666 }
 0x62d   : > { %v2397_v26 = vadd.s32 %v2248_v18, %v6463_v2  ;;  %v2943_v35 = vadd.f32 %v2907_v17, %v2575_v44  ;;  %v2576_v45 = vmul.f32 %v3667_v38, %v2512_v47  ;;  %v2307_v44 = vshll.u32 %v2306_v25, 16  ;;  %v6556_v47 = vld [vmem:[#allocation95_spill] sm:$0xff] }
 0x62e   : > { %v2224_v22 = vpop.xlane.xlu0 %2223  ;;  %v2563_v28 = vmul.f32 1.442695, %v2532_v46  ;;  %v2366_v25 = vcvt.f32.s32 %v5889_v59  ;;  %v2513_v46 = vld [vmem:[#allocation4 + $0x60] sm:$0xff]  ;;  %v2451_v59 = vld [vmem:[#allocation6 + $0x70] sm:$0xff] }
 0x62f   : > { %v2461_v14 = vsel %vm2429_vm7, %v2397_v26, %v2445_v6  ;;  %2959 = vst.msk [vmem:[#allocation4 + $0x50] sm:$0xff] %vm1844_vm3, %v2943_v35  ;;  %v2225_v37 = vcvt.f32.s32 %v2224_v22  ;;  %v6551_v6 = vld [vmem:[#allocation19_spill] sm:$0xff]  ;;  %v2448_v35 = vld [vmem:[#allocation6 + $0x58] sm:$0xff]  ;;  %vm6561_vm7 = vcmp.gt.f32.partialorder %v5270_v42, %v6556_v47 }
 0x630   : > { %2477 = vst.msk [vmem:[#allocation6 + $0x40] sm:$0xff] %vm1844_vm3, %v2461_v14  ;;  %v2284_v12 = vpop.xlane.xlu1 %2283  ;;  %v2346_v17 = vcvt.f32.s32 %v6551_v6  ;;  %3670 = vpow2.f32 %v2563_v28  ;;  %v2367_v54 = vshll.u32 %v2366_v25, 16  ;;  %v2515_v28 = vld [vmem:[#allocation4 + $0x70] sm:$0xff] }
 0x631   : > { %v2228_v52 = vadd.s32 %v2227_v39, %v2225_v37  ;;  %v2285_v1 = vcvt.f32.s32 %v2284_v12  ;;  %v2386_v39 = vcvt.f32.s32 %v6552_v13 }
 0x632   : > { %v2902_v29 = vpop.xlane.xlu0 %2901  ;;  %v2347_v22 = vshll.u32 %v2346_v17, 16 }
 0x633   : > { %v2396_v40 = vadd.s32 %v2228_v52, %v6463_v2  ;;  %v2288_v8 = vadd.s32 %v2287_v11, %v2285_v1  ;;  %v2942_v62 = vadd.f32 %v2902_v29, %v2574_v19  ;;  %v2450_v11 = vld [vmem:[#allocation6 + $0x68] sm:$0xff]  ;;  %v2387_v1 = vshll.u32 %v2386_v39, 16 }
 0x635   : > { %v2460_v5 = vsel %vm2428_vm0, %v2396_v40, %v2444_v53  ;;  %v2399_v16 = vadd.s32 %v2288_v8, %v6463_v2  ;;  %2958 = vst.msk [vmem:[#allocation4 + $0x48] sm:$0xff] %vm1844_vm3, %v2942_v62  ;;  %v3669_v62 = vpop.eup %3668 }
 0x636   : > { %2476 = vst.msk [vmem:[#allocation6 + $0x38] sm:$0xff] %vm1844_vm3, %v2460_v5 }
 0x637   : > { %v2463_v9 = vsel %vm2431_vm8, %v2399_v16, %v2447_v57  ;;  %v2514_v57 = vld [vmem:[#allocation4 + $0x68] sm:$0xff]  ;;  %vm6562_vm8 = vcmp.gt.f32.partialorder %v5291_v20, %v6560_v21 }
 0x638   : > { %2479 = vst.msk [vmem:[#allocation6 + $0x50] sm:$0xff] %vm1844_vm3, %v2463_v9  ;;  %v2578_v9 = vmul.f32 %v3669_v62, %v2514_v57 }
 0x63a   : > { %v3671_v58 = vpop.eup %3670 }
 0x63b   : > { %v2580_v3 = vmul.f32 %v3671_v58, %v2516_v24 }
 0x663   : > { %v2264_v4 = vpop.xlane.xlu0 %2263 }
 0x664   : > { %v2265_v56 = vcvt.f32.s32 %v2264_v4 }
 0x666   : > { %v2268_v10 = vadd.s32 %v2267_v50, %v2265_v56  ;;  %v6557_v50 = vld [vmem:[#allocation96_spill] sm:$0xff] }
 0x667   : > { %v2912_v55 = vpop.xlane.xlu0 %2911  ;;  %v6558_v56 = vsub.f32 %v6556_v47, %v6557_v50 }
 0x668   : > { %v2398_v43 = vadd.s32 %v2268_v10, %v6463_v2  ;;  %v2944_v32 = vadd.f32 %v2912_v55, %v2576_v45  ;;  %v2531_v10 = vsub.f32 %v6560_v21, %v6559_v51 }
 0x669   : > { %v2557_v49 = vmul.f32 1.442695, %v6558_v56 }
 0x66a   : > { %v2462_v23 = vsel %vm2430_vm9, %v2398_v43, %v2446_v27  ;;  %2960 = vst.msk [vmem:[#allocation4 + $0x58] sm:$0xff] %vm1844_vm3, %v2944_v32  ;;  %v2561_v45 = vmul.f32 1.442695, %v2531_v10  ;;  %v2326_v27 = vcvt.f32.s32 %v5885_v15 }
 0x66b   : > { %2478 = vst.msk [vmem:[#allocation6 + $0x48] sm:$0xff] %vm1844_vm3, %v2462_v23  ;;  %v2304_v18 = vpop.xlane.xlu0 %2303  ;;  %3672 = vpow2.f32 %v2557_v49 }
 0x66c   : > { %v2305_v34 = vcvt.f32.s32 %v2304_v18  ;;  %3674 = vpow2.f32 %v2561_v45  ;;  %v2327_v7 = vshll.u32 %v2326_v27, 16 }
 0x66e   : > { %v2308_v26 = vadd.s32 %v2307_v44, %v2305_v34 }
 0x66f   : > { %v2344_v36 = vpop.xlane.xlu0 %2343 }
 0x670   : > { %v2400_v0 = vadd.s32 %v2308_v26, %v6463_v2  ;;  %v2345_v33 = vcvt.f32.s32 %v2344_v36 }
 0x672   : > { %v2464_v37 = vsel %vm2432_vm10, %v2400_v0, %v2448_v35  ;;  %v2348_v12 = vadd.s32 %v2347_v22, %v2345_v33 }
 0x673   : > { %2480 = vst.msk [vmem:[#allocation6 + $0x58] sm:$0xff] %vm1844_vm3, %v2464_v37  ;;  %v2384_v52 = vpop.xlane.xlu0 %2383 }
 0x674   : > { %v2402_v19 = vadd.s32 %v2348_v12, %v6463_v2  ;;  %v2385_v53 = vcvt.f32.s32 %v2384_v52 }
 0x675   : > { %v3673_v41 = vpop.eup %3672 }
 0x676   : > { %v2466_v40 = vsel %vm2434_vm11, %v2402_v19, %v2450_v11  ;;  %v2388_v8 = vadd.s32 %v2387_v1, %v2385_v53  ;;  %v2577_v6 = vmul.f32 %v3673_v41, %v2513_v46  ;;  %v3675_v17 = vpop.eup %3674 }
 0x677   : > { %2482 = vst.msk [vmem:[#allocation6 + $0x68] sm:$0xff] %vm1844_vm3, %v2466_v40  ;;  %v2579_v22 = vmul.f32 %v3675_v17, %v2515_v28 }
 0x678   : > { %v2404_v5 = vadd.s32 %v2388_v8, %v6463_v2 }
 0x67a   : > { %v2468_v48 = vsel %vm2436_vm12, %v2404_v5, %v2452_v63 }
 0x67b   : > { %2484 = vst.msk [vmem:[#allocation6 + $0x78] sm:$0xff] %vm1844_vm3, %v2468_v48  ;;  %v2922_v60 = vpop.xlane.xlu0 %2921 }
 0x67c   : > { %v2946_v30 = vadd.f32 %v2922_v60, %v2578_v9 }
 0x67e   : > { %2962 = vst.msk [vmem:[#allocation4 + $0x68] sm:$0xff] %vm1844_vm3, %v2946_v30 }
 0x67f   : > { %v2932_v38 = vpop.xlane.xlu0 %2931 }
 0x680   : > { %v2948_v4 = vadd.f32 %v2932_v38, %v2580_v3 }
 0x682   : > { %2964 = vst.msk [vmem:[#allocation4 + $0x78] sm:$0xff] %vm1844_vm3, %v2948_v4 }
 0x69c   : > { %v2324_v55 = vpop.xlane.xlu1 %2323 }
 0x69d   : > { %v2325_v43 = vcvt.f32.s32 %v2324_v55 }
 0x69f   : > { %v2328_v32 = vadd.s32 %v2327_v7, %v2325_v43 }
 0x6a0   : > { %v2364_v31 = vpop.xlane.xlu1 %2363 }
 0x6a1   : > { %v2401_v23 = vadd.s32 %v2328_v32, %v6463_v2  ;;  %v2365_v18 = vcvt.f32.s32 %v2364_v31 }
 0x6a3   : > { %v2465_v44 = vsel %vm6561_vm7, %v2401_v23, %v2449_v61  ;;  %v2368_v15 = vadd.s32 %v2367_v54, %v2365_v18 }
 0x6a4   : > { %2481 = vst.msk [vmem:[#allocation6 + $0x60] sm:$0xff] %vm1844_vm3, %v2465_v44  ;;  %v2917_v34 = vpop.xlane.xlu1 %2916 }
 0x6a5   : > { %v2403_v26 = vadd.s32 %v2368_v15, %v6463_v2  ;;  %v2945_v35 = vadd.f32 %v2917_v34, %v2577_v6 }
 0x6a7   : > { %v2467_v36 = vsel %vm6562_vm8, %v2403_v26, %v2451_v59  ;;  %2961 = vst.msk [vmem:[#allocation4 + $0x60] sm:$0xff] %vm1844_vm3, %v2945_v35 }
 0x6a8   : > { %2483 = vst.msk [vmem:[#allocation6 + $0x70] sm:$0xff] %vm1844_vm3, %v2467_v36  ;;  %v2927_v42 = vpop.xlane.xlu1 %2926 }
 0x6a9   : > { %v2947_v13 = vadd.f32 %v2927_v42, %v2579_v22 }
 0x6ab   : > { %2963 = vst.msk [vmem:[#allocation4 + $0x70] sm:$0xff] %vm1844_vm3, %v2947_v13 }
 0x6ac PF: > { %p2981_p0 = scmp.eq.s32.totalorder %s3738_s17, 1 }
 0x6ae   : > { %p2982_p1 = pnand %p2981_p0, %p498_p10 }
 0x6af   : > { %v3002_v2 = vld [vmem:[#allocation4] sm:$0xff] (!%p2982_p1)  ;;  %v3003_v20 = vld [vmem:[#allocation4 + $0x8] sm:$0xff] (!%p2982_p1)  ;;  %v3004_v39 = vld [vmem:[#allocation4 + $0x10] sm:$0xff] (!%p2982_p1)  ;;  %vm3098_vm3 = vcmask (!%p2982_p1), 7168  }
 0x6b0   : > { %2985 = sbr.rel (%p2982_p1) target bundleno = 1745 (0x6d1), region = 87  ;;  %3676 = vlog2.f32 (!%p2982_p1), %v3002_v2  ;;  %v3005_v0 = vld [vmem:[#allocation4 + $0x18] sm:$0xff] (!%p2982_p1)  ;;  %v3006_v33 = vld [vmem:[#allocation4 + $0x20] sm:$0xff] (!%p2982_p1)  ;;  %v3007_v14 = vld [vmem:[#allocation4 + $0x28] sm:$0xff] (!%p2982_p1) }
 0x6b1   : > { %3678 = vlog2.f32 (!%p2982_p1), %v3003_v20  ;;  %v3008_v37 = vld [vmem:[#allocation4 + $0x30] sm:$0xff] (!%p2982_p1)  ;;  %v3009_v12 = vld [vmem:[#allocation4 + $0x38] sm:$0xff] (!%p2982_p1)  ;;  %v3010_v11 = vld [vmem:[#allocation4 + $0x40] sm:$0xff] (!%p2982_p1) }
 0x6b2   : > { %3680 = vlog2.f32 (!%p2982_p1), %v3004_v39  ;;  %v3011_v52 = vld [vmem:[#allocation4 + $0x48] sm:$0xff] (!%p2982_p1)  ;;  %v2986_v1 = vld [vmem:[#allocation3] sm:$0xff] (!%p2982_p1)  ;;  %v3012_v19 = vld [vmem:[#allocation4 + $0x50] sm:$0xff] (!%p2982_p1) }
 0x6b3   : > { %3682 = vlog2.f32 (!%p2982_p1), %v3005_v0  ;;  %v3066_v29 = vld [vmem:[#allocation5] sm:$0xff] (!%p2982_p1)  ;;  %v2987_v40 = vld [vmem:[#allocation3 + $0x8] sm:$0xff] (!%p2982_p1)  ;;  %v3013_v8 = vld [vmem:[#allocation4 + $0x58] sm:$0xff] (!%p2982_p1) }
 0x6b4   : > { %3684 = vlog2.f32 (!%p2982_p1), %v3006_v33  ;;  %v5980_v57 = vld [vmem:[#allocation5 + $0x8] sm:$0xff] (!%p2982_p1)  ;;  %v2988_v5 = vld [vmem:[#allocation3 + $0x10] sm:$0xff] (!%p2982_p1)  ;;  %v3014_v16 = vld [vmem:[#allocation4 + $0x60] sm:$0xff] (!%p2982_p1) }
 0x6b5   : > { %3686 = vlog2.f32 (!%p2982_p1), %v3007_v14  ;;  %v5982_v58 = vld [vmem:[#allocation5 + $0x10] sm:$0xff] (!%p2982_p1)  ;;  %v2989_v60 = vld [vmem:[#allocation3 + $0x18] sm:$0xff] (!%p2982_p1)  ;;  %v3015_v24 = vld [vmem:[#allocation4 + $0x68] sm:$0xff] (!%p2982_p1) }
 0x6b6   : > { %3688 = vlog2.f32 (!%p2982_p1), %v3008_v37  ;;  %v5984_v4 = vld [vmem:[#allocation5 + $0x18] sm:$0xff] (!%p2982_p1)  ;;  %v2990_v47 = vld [vmem:[#allocation3 + $0x20] sm:$0xff] (!%p2982_p1)  ;;  %v3016_v50 = vld [vmem:[#allocation4 + $0x70] sm:$0xff] (!%p2982_p1) }
 0x6b7   : > { %3690 = vlog2.f32 %v3009_v12  ;;  %v5986_v21 = vld [vmem:[#allocation5 + $0x20] sm:$0xff]  ;;  %v2991_v10 = vld [vmem:[#allocation3 + $0x28] sm:$0xff]  ;;  %v2992_v45 = vld [vmem:[#allocation3 + $0x30] sm:$0xff] }
 0x6b8   : > { %3692 = vlog2.f32 %v3010_v11  ;;  %v3017_v27 = vld [vmem:[#allocation4 + $0x78] sm:$0xff]  ;;  %v5988_v32 = vld [vmem:[#allocation5 + $0x28] sm:$0xff]  ;;  %v3115_v61 = vld [vmem:[#allocation6] sm:$0xff] }
 0x6b9   : > { %3694 = vlog2.f32 %v3011_v52  ;;  %v2993_v41 = vld [vmem:[#allocation3 + $0x38] sm:$0xff]  ;;  %v3116_v31 = vld [vmem:[#allocation6 + $0x8] sm:$0xff]  ;;  %v3117_v46 = vld [vmem:[#allocation6 + $0x10] sm:$0xff]  ;;  %3131 = vst.msk [vmem:[%s6154_s10] sm:$0xff] %vm3098_vm3, %v3115_v61 }
 0x6ba   : > { %v3677_v53 = vpop.eup %3676  ;;  %3696 = vlog2.f32 %v3012_v19  ;;  %v5991_v15 = vld [vmem:[#allocation5 + $0x30] sm:$0xff]  ;;  %v2994_v6 = vld [vmem:[#allocation3 + $0x40] sm:$0xff]  ;;  %3132 = vst.msk [vmem:[%s6154_s10 + $0x8] sm:$0xff] %vm3098_vm3, %v3116_v31  ;;  %3133 = vst.msk [vmem:[%s6154_s10 + $0x10] sm:$0xff] %vm3098_vm3, %v3117_v46 }
 0x6bb   : > { %v3679_v62 = vpop.eup %3678  ;;  %v3019_v63 = vmul.f32 0.6931472, %v3677_v53  ;;  %3698 = vlog2.f32 %v3013_v8  ;;  %v3118_v17 = vld [vmem:[#allocation6 + $0x18] sm:$0xff]  ;;  %v3119_v59 = vld [vmem:[#allocation6 + $0x20] sm:$0xff]  ;;  %v3120_v34 = vld [vmem:[#allocation6 + $0x28] sm:$0xff] }
 0x6bc   : > { %v3681_v48 = vpop.eup %3680  ;;  %v3021_v9 = vmul.f32 0.6931472, %v3679_v62  ;;  %3700 = vlog2.f32 %v3014_v16  ;;  %v6010_v22 = vld [vmem:[#allocation5 + $0x38] sm:$0xff]  ;;  %v2995_v42 = vld [vmem:[#allocation3 + $0x48] sm:$0xff]  ;;  %3134 = vst.msk [vmem:[%s6154_s10 + $0x18] sm:$0xff] %vm3098_vm3, %v3118_v17  ;;  %3135 = vst.msk [vmem:[%s6154_s10 + $0x20] sm:$0xff] %vm3098_vm3, %v3119_v59 }
 0x6bd   : > { %v3683_v30 = vpop.eup %3682  ;;  %v3050_v3 = vadd.f32 %v3019_v63, %v2986_v1  ;;  %v3023_v38 = vmul.f32 0.6931472, %v3681_v48  ;;  %3702 = vlog2.f32 %v3015_v24  ;;  %3136 = vst.msk [vmem:[%s6154_s10 + $0x28] sm:$0xff] %vm3098_vm3, %v3120_v34  ;;  %v3121_v13 = vld [vmem:[#allocation6 + $0x30] sm:$0xff]  ;;  %v3122_v2 = vld [vmem:[#allocation6 + $0x38] sm:$0xff]  ;;  %v3123_v20 = vld [vmem:[#allocation6 + $0x40] sm:$0xff] }
 0x6be   : > { %v3685_v56 = vpop.eup %3684  ;;  %v3051_v49 = vadd.f32 %v3021_v9, %v2987_v40  ;;  %v3025_v51 = vmul.f32 0.6931472, %v3683_v30  ;;  %3704 = vlog2.f32 %v3016_v50  ;;  %3137 = vst.msk [vmem:[%s6154_s10 + $0x30] sm:$0xff] %vm3098_vm3, %v3121_v13  ;;  %3138 = vst.msk [vmem:[%s6154_s10 + $0x38] sm:$0xff] %vm3098_vm3, %v3122_v2  ;;  %v3124_v37 = vld [vmem:[#allocation6 + $0x48] sm:$0xff]  ;;  %v3125_v12 = vld [vmem:[#allocation6 + $0x50] sm:$0xff] }
 0x6bf   : > { %v3687_v55 = vpop.eup %3686  ;;  %v3082_v7 = vsub.f32 %v3050_v3, %v3066_v29  ;;  %v3052_v25 = vadd.f32 %v3023_v38, %v2988_v5  ;;  %v3027_v43 = vmul.f32 0.6931472, %v3685_v56  ;;  %3706 = vlog2.f32 %v3017_v27  ;;  %3139 = vst.msk [vmem:[%s6154_s10 + $0x40] sm:$0xff] %vm3098_vm3, %v3123_v20  ;;  %v3126_v11 = vld [vmem:[#allocation6 + $0x58] sm:$0xff]  ;;  %3140 = vst.msk [vmem:[%s6154_s10 + $0x48] sm:$0xff] %vm3098_vm3, %v3124_v37  ;;  %v3127_v29 = vld [vmem:[#allocation6 + $0x60] sm:$0xff] }
 0x6c0   : > { %v3689_v54 = vpop.eup %3688  ;;  %v3083_v23 = vsub.f32 %v3051_v49, %v5980_v57  ;;  %v3053_v18 = vadd.f32 %v3025_v51, %v2989_v60  ;;  %v3029_v44 = vmul.f32 0.6931472, %v3687_v55  ;;  %3141 = vst.msk [vmem:[%s6154_s10 + $0x50] sm:$0xff] %vm3098_vm3, %v3125_v12  ;;  %3142 = vst.msk [vmem:[%s6154_s10 + $0x58] sm:$0xff] %vm3098_vm3, %v3126_v11  ;;  %v3128_v40 = vld [vmem:[#allocation6 + $0x68] sm:$0xff]  ;;  %v3129_v8 = vld [vmem:[#allocation6 + $0x70] sm:$0xff] }
 0x6c1   : > { %v3691_v28 = vpop.eup %3690  ;;  %3099 = vst.msk [vmem:[%s6153_s9] sm:$0xff] %vm3098_vm3, %v3082_v7  ;;  %v3084_v26 = vsub.f32 %v3052_v25, %v5982_v58  ;;  %v3054_v35 = vadd.f32 %v3027_v43, %v2990_v47  ;;  %v3031_v36 = vmul.f32 0.6931472, %v3689_v54  ;;  %v3074_v5 = vld [vmem:[#allocation5 + $0x40] sm:$0xff]  ;;  %v2996_v48 = vld [vmem:[#allocation3 + $0x50] sm:$0xff]  ;;  %3143 = vst.msk [vmem:[%s6154_s10 + $0x60] sm:$0xff] %vm3098_vm3, %v3127_v29 }
 0x6c2   : > { %v3693_v39 = vpop.eup %3692  ;;  %3100 = vst.msk [vmem:[%s6153_s9 + $0x8] sm:$0xff] %vm3098_vm3, %v3083_v23  ;;  %v3085_v0 = vsub.f32 %v3053_v18, %v5984_v4  ;;  %v3055_v33 = vadd.f32 %v3029_v44, %v2991_v10  ;;  %v3033_v14 = vmul.f32 0.6931472, %v3691_v28  ;;  %3144 = vst.msk [vmem:[%s6154_s10 + $0x68] sm:$0xff] %vm3098_vm3, %v3128_v40  ;;  %v3130_v9 = vld [vmem:[#allocation6 + $0x78] sm:$0xff]  ;;  %v3075_v30 = vld [vmem:[#allocation5 + $0x48] sm:$0xff] }
 0x6c3   : > { %v3695_v52 = vpop.eup %3694  ;;  %3101 = vst.msk [vmem:[%s6153_s9 + $0x10] sm:$0xff] %vm3098_vm3, %v3084_v26  ;;  %v3086_v1 = vsub.f32 %v3054_v35, %v5986_v21  ;;  %v3056_v19 = vadd.f32 %v3031_v36, %v2992_v45  ;;  %v3035_v53 = vmul.f32 0.6931472, %v3693_v39  ;;  %3145 = vst.msk [vmem:[%s6154_s10 + $0x70] sm:$0xff] %vm3098_vm3, %v3129_v8  ;;  %v2997_v38 = vld [vmem:[#allocation3 + $0x58] sm:$0xff]  ;;  %v3076_v56 = vld [vmem:[#allocation5 + $0x50] sm:$0xff] }
 0x6c4   : > { %v3697_v62 = vpop.eup %3696  ;;  %3102 = vst.msk [vmem:[%s6153_s9 + $0x18] sm:$0xff] %vm3098_vm3, %v3085_v0  ;;  %v3087_v63 = vsub.f32 %v3055_v33, %v5988_v32  ;;  %v3057_v57 = vadd.f32 %v3033_v14, %v2993_v41  ;;  %v3037_v16 = vmul.f32 0.6931472, %v3695_v52  ;;  %3146 = vst.msk [vmem:[%s6154_s10 + $0x78] sm:$0xff] %vm3098_vm3, %v3130_v9  ;;  %v2998_v51 = vld [vmem:[#allocation3 + $0x60] sm:$0xff]  ;;  %v3077_v27 = vld [vmem:[#allocation5 + $0x58] sm:$0xff] }
 0x6c5   : > { %v3699_v58 = vpop.eup %3698  ;;  %3103 = vst.msk [vmem:[%s6153_s9 + $0x20] sm:$0xff] %vm3098_vm3, %v3086_v1  ;;  %v3088_v60 = vsub.f32 %v3056_v19, %v5991_v15  ;;  %v3058_v24 = vadd.f32 %v3035_v53, %v2994_v6  ;;  %v3039_v3 = vmul.f32 0.6931472, %v3697_v62  ;;  %v2999_v7 = vld [vmem:[#allocation3 + $0x68] sm:$0xff]  ;;  %v3078_v41 = vld [vmem:[#allocation5 + $0x60] sm:$0xff]  ;;  %v3000_v31 = vld [vmem:[#allocation3 + $0x70] sm:$0xff] }
 0x6c6   : > { %v3701_v4 = vpop.eup %3700  ;;  %3104 = vst.msk [vmem:[%s6153_s9 + $0x28] sm:$0xff] %vm3098_vm3, %v3087_v63  ;;  %v3089_v47 = vsub.f32 %v3057_v57, %v6010_v22  ;;  %v3059_v50 = vadd.f32 %v3037_v16, %v2995_v42  ;;  %v3041_v49 = vmul.f32 0.6931472, %v3699_v58  ;;  %v3079_v18 = vld [vmem:[#allocation5 + $0x68] sm:$0xff]  ;;  %v3001_v15 = vld [vmem:[#allocation3 + $0x78] sm:$0xff]  ;;  %v3080_v59 = vld [vmem:[#allocation5 + $0x70] sm:$0xff] }
 0x6c7   : > { %v3703_v21 = vpop.eup %3702  ;;  %3105 = vst.msk [vmem:[%s6153_s9 + $0x30] sm:$0xff] %vm3098_vm3, %v3088_v60  ;;  %v3090_v10 = vsub.f32 %v3058_v24, %v3074_v5  ;;  %v3060_v45 = vadd.f32 %v3039_v3, %v2996_v48  ;;  %v3043_v55 = vmul.f32 0.6931472, %v3701_v4  ;;  %v3081_v35 = vld [vmem:[#allocation5 + $0x78] sm:$0xff] }
 0x6c8   : > { %v3705_v25 = vpop.eup %3704  ;;  %3106 = vst.msk [vmem:[%s6153_s9 + $0x38] sm:$0xff] %vm3098_vm3, %v3089_v47  ;;  %v3091_v43 = vsub.f32 %v3059_v50, %v3075_v30  ;;  %v3061_v32 = vadd.f32 %v3041_v49, %v2997_v38  ;;  %v3045_v61 = vmul.f32 0.6931472, %v3703_v21 }
 0x6c9   : > { %v3707_v46 = vpop.eup %3706  ;;  %3107 = vst.msk [vmem:[%s6153_s9 + $0x40] sm:$0xff] %vm3098_vm3, %v3090_v10  ;;  %v3092_v54 = vsub.f32 %v3060_v45, %v3076_v56  ;;  %v3062_v23 = vadd.f32 %v3043_v55, %v2998_v51  ;;  %v3047_v44 = vmul.f32 0.6931472, %v3705_v25 }
 0x6ca   : > { %3108 = vst.msk [vmem:[%s6153_s9 + $0x48] sm:$0xff] %vm3098_vm3, %v3091_v43  ;;  %v3093_v6 = vsub.f32 %v3061_v32, %v3077_v27  ;;  %v3063_v17 = vadd.f32 %v3045_v61, %v2999_v7  ;;  %v3049_v34 = vmul.f32 0.6931472, %v3707_v46 }
 0x6cb   : > { %3109 = vst.msk [vmem:[%s6153_s9 + $0x50] sm:$0xff] %vm3098_vm3, %v3092_v54  ;;  %v3094_v28 = vsub.f32 %v3062_v23, %v3078_v41  ;;  %v3064_v26 = vadd.f32 %v3047_v44, %v3000_v31 }
 0x6cc   : > { %3110 = vst.msk [vmem:[%s6153_s9 + $0x58] sm:$0xff] %vm3098_vm3, %v3093_v6  ;;  %v3095_v36 = vsub.f32 %v3063_v17, %v3079_v18  ;;  %v3065_v22 = vadd.f32 %v3049_v34, %v3001_v15 }
 0x6cd   : > { %3111 = vst.msk [vmem:[%s6153_s9 + $0x60] sm:$0xff] %vm3098_vm3, %v3094_v28  ;;  %v3096_v42 = vsub.f32 %v3064_v26, %v3080_v59 }
 0x6ce   : > { %3112 = vst.msk [vmem:[%s6153_s9 + $0x68] sm:$0xff] %vm3098_vm3, %v3095_v36  ;;  %v3097_v13 = vsub.f32 %v3065_v22, %v3081_v35 }
 0x6cf   : > { %3113 = vst.msk [vmem:[%s6153_s9 + $0x70] sm:$0xff] %vm3098_vm3, %v3096_v42 }
 0x6d0   : > { %3114 = vst.msk [vmem:[%s6153_s9 + $0x78] sm:$0xff] %vm3098_vm3, %v3097_v13 }
 0x6d1 PF: > { %s22_s19 = sadd.s32 1, %s3746_s19   ;;  %s6563_s15 = smov %s3734_s16 }
 0x6d2   : > { %p19_p2 = scmp.ge.s32.totalorder %s22_s19, 4   ;;  %s6564_s16 = smov %s3845_s25 }
 0x6d3   : > { %s6565_s17 = smov %s3742_s18  ;;  %s6566_s18 = smov %s6568_s0 }
 0x6d4   :  { %21 = sbr.rel (!%p19_p2) target bundleno = 5 (0x5), region = 143 }

</bundles_post_ra>
